<compile_context>
chip_gen: v6e
topology: v6e:2x2x1
jax: 0.10.0
libtpu: 0.0.40
codegen_flags: <defaults>
</compile_context>

<pallas_src>
import functools

import jax
import jax.numpy as jnp
from jax import lax
from jax.experimental import pallas as pl
from jax.experimental.pallas import tpu as pltpu


def _upsample_kernel(x_ref, w1_ref, b1_ref, w2_ref, b2br_ref, wr_ref,
                     out_ref, mid_ref, *, cin, cout, H, W, B):
    # x_ref    : (B, cin, H*W)        raw input, spatial flattened (lane-dense)
    # w1_ref   : (cout, cin*9)        ConvT1 weights, column = ci*9 + kh*3 + kw
    # b1_ref   : (cout, 1)
    # w2_ref   : (cout, cout*9)       Conv2 weights, column = ci*9 + kh*3 + kw
    # b2br_ref : (cout, 1)            b2 + br (conv2 bias + residual bias)
    # wr_ref   : (cout, cin*4)        residual ConvT weights, column = ci*4 + r*2 + c
    # out_ref  : (B, 4*cout, H*W)     phase-separated output, row = (2r+c)*cout + co
    # mid_ref  : (4*ph, H*W) scratch  ReLU(convT1) phases, phase p at rows [p*ph, p*ph+cout)
    HW = H * W
    ph = ((cout + 7) // 8) * 8          # sublane-aligned stride between mid phases

    lane = lax.broadcasted_iota(jnp.int32, (1, HW), 1)
    col = lane % W
    first_col = col == 0
    last_col = col == W - 1

    def shift(v, k):
        # y[:, f] = v[:, f + k], zero-filled outside [0, HW)  (k is a static int)
        if k == 0:
            return v
        z = jnp.zeros((v.shape[0], abs(k)), v.dtype)
        if k > 0:
            return jnp.concatenate([v[:, k:], z], axis=1)
        return jnp.concatenate([z, v[:, :HW + k]], axis=1)

    def col_mask(v, db):
        # zero the flat positions whose column wrapped across a row boundary
        if db == 1:
            return jnp.where(last_col, 0.0, v)
        if db == -1:
            return jnp.where(first_col, 0.0, v)
        return v

    # small weight tables resident as VMEM values; columns sliced per tap
    w1 = w1_ref[...]
    w2 = w2_ref[...]
    wr = wr_ref[...]
    b1 = b1_ref[...]
    b2br = b2br_ref[...]

    # output parity -> per conv2-tap (source mid phase, coarse offset):
    #   u = parity + k - 1 = 2*offset + phase
    PMAP = (((1, -1), (0, 0), (1, 0)),    # parity 0, taps k = 0, 1, 2
            ((0, 0), (1, 0), (0, 1)))     # parity 1, taps k = 0, 1, 2
    phases = ((0, 0), (0, 1), (1, 0), (1, 1))

    for b in range(B):
        xv = x_ref[b]                               # (cin, HW)
        # shifted input taps: computed once, reused by all (ci, co) and phases
        xs01 = col_mask(shift(xv, 1), 1)            # x[a, b+1]
        xs10 = shift(xv, W)                         # x[a+1, b]   (zero-fill handles a+1==H)
        xs11 = col_mask(shift(xv, W + 1), 1)        # x[a+1, b+1]

        # ---- stage 1: ConvTranspose2d(3, s=2, p=1, op=1) + ReLU, phase decomposed
        #   mid[2a  , 2b  ] = sum w1[..,1,1] x[a,b]
        #   mid[2a  , 2b+1] = sum w1[..,1,2] x[a,b] + w1[..,1,0] x[a,b+1]
        #   mid[2a+1, 2b  ] = sum w1[..,2,1] x[a,b] + w1[..,0,1] x[a+1,b]
        #   mid[2a+1, 2b+1] = sum w1[..,2,2] x[a,b] + w1[..,2,0] x[a,b+1]
        #                       + w1[..,0,2] x[a+1,b] + w1[..,0,0] x[a+1,b+1]
        taps1 = {
            (0, 0): ((xv, 1, 1),),
            (0, 1): ((xv, 1, 2), (xs01, 1, 0)),
            (1, 0): ((xv, 2, 1), (xs10, 0, 1)),
            (1, 1): ((xv, 2, 2), (xs01, 2, 0), (xs10, 0, 2), (xs11, 0, 0)),
        }
        for p, (r, c) in enumerate(phases):
            acc = jnp.broadcast_to(b1, (cout, HW))
            for tap, kh, kw in taps1[(r, c)]:
                for ci in range(cin):
                    wcol = w1[:, ci * 9 + kh * 3 + kw:ci * 9 + kh * 3 + kw + 1]
                    acc = acc + wcol * tap[ci:ci + 1, :]
            mid_ref[p * ph:p * ph + cout, :] = jnp.maximum(acc, 0.0)

        # ---- stage 2: Conv2d(3, s=1, p=1) on mid + residual ConvT(2, s=2), ReLU
        for p, (r, c) in enumerate(phases):
            acc = jnp.broadcast_to(b2br, (cout, HW))
            # residual: out[2a+r, 2b+c] += sum_ci wr[ci, co, r, c] * x[ci, a, b]
            for ci in range(cin):
                idx = ci * 4 + r * 2 + c
                acc = acc + wr[:, idx:idx + 1] * xv[ci:ci + 1, :]
            # conv2 taps: one shifted (cout, HW) slab per (kh, kw), shared by all
            # (ci, co) pairs
            for kh in range(3):
                r2, da = PMAP[r][kh]
                for kw in range(3):
                    c2, db = PMAP[c][kw]
                    mp = 2 * r2 + c2
                    src = mid_ref[mp * ph:mp * ph + cout, :]
                    tap = col_mask(shift(src, da * W + db), db)
                    for ci2 in range(cout):
                        idx = ci2 * 9 + kh * 3 + kw
                        acc = acc + w2[:, idx:idx + 1] * tap[ci2:ci2 + 1, :]
            out_ref[b, p * cout:(p + 1) * cout, :] = jnp.maximum(acc, 0.0)


def upsample_block_forward(x, params, *, batch_block=1):
    """x: (N, Cin, H, W) float32 -> (N, Cout, 2H, 2W) float32."""
    N, cin, H, W = x.shape
    cout = params["b1"].shape[0]
    HW = H * W
    Ho, Wo = 2 * H, 2 * W
    B = batch_block
    assert N % B == 0, "batch_block must divide N"

    # Lane-dense, free reshape of the input (no dilated copy anywhere).
    xf = x.reshape(N, cin, HW).astype(jnp.float32)

    # Weight tables: one (cout, K) matrix per conv so the kernel can slice
    # (cout, 1) columns and fold the co loop into sublanes.
    w1v = jnp.transpose(params["w1"], (1, 0, 2, 3)).reshape(cout, cin * 9).astype(jnp.float32)
    w2v = params["w2"].reshape(cout, cout * 9).astype(jnp.float32)
    wrv = jnp.transpose(params["wr"], (1, 0, 2, 3)).reshape(cout, cin * 4).astype(jnp.float32)
    b1v = params["b1"].reshape(cout, 1).astype(jnp.float32)
    b2brv = (params["b2"] + params["br"]).reshape(cout, 1).astype(jnp.float32)

    ph = ((cout + 7) // 8) * 8
    kernel = functools.partial(_upsample_kernel, cin=cin, cout=cout, H=H, W=W, B=B)

    def full(shape):
        return pl.BlockSpec(shape, lambda n: (0,) * len(shape))

    out_ph = pl.pallas_call(
        kernel,
        out_shape=jax.ShapeDtypeStruct((N, 4 * cout, HW), jnp.float32),
        grid=(N // B,),
        in_specs=[
            pl.BlockSpec((B, cin, HW), lambda n: (n, 0, 0)),
            full((cout, cin * 9)),
            full((cout, 1)),
            full((cout, cout * 9)),
            full((cout, 1)),
            full((cout, cin * 4)),
        ],
        out_specs=pl.BlockSpec((B, 4 * cout, HW), lambda n: (n, 0, 0)),
        scratch_shapes=[pltpu.VMEM((4 * ph, HW), jnp.float32)],
        compiler_params=pltpu.CompilerParams(dimension_semantics=("parallel",)),
    )(xf, w1v, b1v, w2v, b2brv, wrv)

    # De-phase: row = (2r+c)*cout + co, flat = a*W + b  ->  (N, cout, 2H, 2W).
    # Pure layout plumbing on the small output (reshape + tiny transpose).
    out = (out_ph.reshape(N, 2, 2, cout, H, W)
           .transpose(0, 3, 4, 1, 5, 2)
           .reshape(N, cout, Ho, Wo))
    return out


# ----------------------- pure-JAX reference (for checking) -----------------------
def _conv_transpose_ref(x, w, b, stride, pad, opad):
    k = w.shape[-1]
    w_conv = jnp.transpose(w[:, :, ::-1, ::-1], (1, 0, 2, 3))  # (Cout, Cin, k, k)
    y = lax.conv_general_dilated(
        x, w_conv, window_strides=(1, 1),
        padding=[(k - 1 - pad, k - 1 - pad + opad)] * 2,
        lhs_dilation=(stride, stride),
        dimension_numbers=("NCHW", "OIHW", "NCHW"))
    return y + b.reshape(1, -1, 1, 1)


def _conv_ref(x, w, b, pad):
    y = lax.conv_general_dilated(
        x, w, window_strides=(1, 1), padding=[(pad, pad)] * 2,
        dimension_numbers=("NCHW", "OIHW", "NCHW"))
    return y + b.reshape(1, -1, 1, 1)


def upsample_block_ref(x, p):
    h = jax.nn.relu(_conv_transpose_ref(x, p["w1"], p["b1"], 2, 1, 1))
    h = _conv_ref(h, p["w2"], p["b2"], 1)
    r = _conv_transpose_ref(x, p["wr"], p["br"], 2, 0, 0)
    return jax.nn.relu(h + r)


if __name__ == "__main__":
    key = jax.random.PRNGKey(0)
    N, cin, cout, H, W = 2, 4, 3, 16, 16
    ks = jax.random.split(key, 7)
    params = {
        "w1": 0.1 * jax.random.normal(ks[0], (cin, cout, 3, 3), jnp.float32),
        "b1": 0.1 * jax.random.normal(ks[1], (cout,), jnp.float32),
        "w2": 0.1 * jax.random.normal(ks[2], (cout, cout, 3, 3), jnp.float32),
        "b2": 0.1 * jax.random.normal(ks[3], (cout,), jnp.float32),
        "wr": 0.1 * jax.random.normal(ks[4], (cin, cout, 2, 2), jnp.float32),
        "br": 0.1 * jax.random.normal(ks[5], (cout,), jnp.float32),
    }
    x = jax.random.normal(ks[6], (N, cin, H, W), jnp.float32)

    out = jax.block_until_ready(upsample_block_forward(x, params))
    ref = jax.block_until_ready(upsample_block_ref(x, params))

    assert out.shape == (N, cout, 2 * H, 2 * W), out.shape
    assert jnp.allclose(out, ref, atol=1e-4, rtol=1e-4), float(
        jnp.max(jnp.abs(out - ref)))
    print("KERNEL_OK")
</pallas_src>

<mosaic_0001>
module attributes {stable_mosaic.version = 11 : i64} {
  func.func @_upsample_kernel(%arg0: i32, %arg1: memref<1x4x256xf32, #tpu.memory_space<vmem>>, %arg2: memref<3x36xf32, #tpu.memory_space<vmem>>, %arg3: memref<3x1xf32, #tpu.memory_space<vmem>>, %arg4: memref<3x27xf32, #tpu.memory_space<vmem>>, %arg5: memref<3x1xf32, #tpu.memory_space<vmem>>, %arg6: memref<3x16xf32, #tpu.memory_space<vmem>>, %arg7: memref<1x12x256xf32, #tpu.memory_space<vmem>>, %arg8: memref<32x256xf32, #tpu.memory_space<vmem>>) attributes {dimension_semantics = [#tpu.dimension_semantics<parallel>], iteration_bounds = array<i64: 2>, scalar_prefetch = 0 : i64, scratch_operands = 1 : i64, tpu.core_type = #tpu.core_type<tc>, window_params = [{transform_indices = @transform_0, window_bounds = array<i64: 1, 4, 256>}, {pipeline_mode = #tpu.pipeline_mode<synchronous>, transform_indices = @transform_1, window_bounds = array<i64: 3, 36>}, {pipeline_mode = #tpu.pipeline_mode<synchronous>, transform_indices = @transform_2, window_bounds = array<i64: 3, 1>}, {pipeline_mode = #tpu.pipeline_mode<synchronous>, transform_indices = @transform_3, window_bounds = array<i64: 3, 27>}, {pipeline_mode = #tpu.pipeline_mode<synchronous>, transform_indices = @transform_4, window_bounds = array<i64: 3, 1>}, {pipeline_mode = #tpu.pipeline_mode<synchronous>, transform_indices = @transform_5, window_bounds = array<i64: 3, 16>}, {transform_indices = @transform_6, window_bounds = array<i64: 1, 12, 256>}]} {
    %0 = tpu.iota {dimensions = array<i32: 1>} : vector<1x256xi32>
    %c16_i32 = arith.constant 16 : i32
    %c0_i32 = arith.constant 0 : i32
    %1 = arith.cmpi eq, %c16_i32, %c0_i32 : i32
    %c1_i32 = arith.constant 1 : i32
    %2 = arith.select %1, %c1_i32, %c16_i32 : i32
    %3 = vector.broadcast %2 : i32 to vector<1x256xi32>
    %4 = arith.remsi %0, %3 : vector<1x256xi32>
    %c0_i32_0 = arith.constant 0 : i32
    %5 = vector.broadcast %c0_i32_0 : i32 to vector<1x256xi32>
    %6 = arith.cmpi ne, %4, %5 : vector<1x256xi32>
    %c0_i32_1 = arith.constant 0 : i32
    %7 = vector.broadcast %c0_i32_1 : i32 to vector<1x256xi32>
    %8 = arith.cmpi slt, %4, %7 : vector<1x256xi32>
    %c0_i32_2 = arith.constant 0 : i32
    %9 = arith.cmpi slt, %2, %c0_i32_2 : i32
    %10 = vector.broadcast %9 : i1 to vector<1x256xi1>
    %11 = vector.broadcast %10 : vector<1x256xi1> to vector<1x256xi1>
    %12 = arith.xori %8, %11 : vector<1x256xi1>
    %13 = arith.andi %12, %6 : vector<1x256xi1>
    %14 = vector.broadcast %2 : i32 to vector<1x256xi32>
    %15 = arith.addi %4, %14 : vector<1x256xi32>
    %16 = arith.select %13, %15, %4 : vector<1x256xi1>, vector<1x256xi32>
    %c0_i32_3 = arith.constant 0 : i32
    %17 = vector.broadcast %c0_i32_3 : i32 to vector<1x256xi32>
    %18 = arith.cmpi eq, %16, %17 : vector<1x256xi32>
    %c15_i32 = arith.constant 15 : i32
    %19 = vector.broadcast %c15_i32 : i32 to vector<1x256xi32>
    %20 = arith.cmpi eq, %16, %19 : vector<1x256xi32>
    %c0 = arith.constant 0 : index
    %c0_4 = arith.constant 0 : index
    %21 = vector.load %arg2[%c0, %c0_4] : memref<3x36xf32, #tpu.memory_space<vmem>>, vector<3x36xf32>
    %c0_5 = arith.constant 0 : index
    %c0_6 = arith.constant 0 : index
    %22 = vector.load %arg4[%c0_5, %c0_6] : memref<3x27xf32, #tpu.memory_space<vmem>>, vector<3x27xf32>
    %c0_7 = arith.constant 0 : index
    %c0_8 = arith.constant 0 : index
    %23 = vector.load %arg6[%c0_7, %c0_8] : memref<3x16xf32, #tpu.memory_space<vmem>>, vector<3x16xf32>
    %c0_9 = arith.constant 0 : index
    %c0_10 = arith.constant 0 : index
    %24 = vector.load %arg3[%c0_9, %c0_10] : memref<3x1xf32, #tpu.memory_space<vmem>>, vector<3x1xf32>
    %c0_11 = arith.constant 0 : index
    %c0_12 = arith.constant 0 : index
    %25 = vector.load %arg5[%c0_11, %c0_12] : memref<3x1xf32, #tpu.memory_space<vmem>>, vector<3x1xf32>
    %c0_13 = arith.constant 0 : index
    %c0_14 = arith.constant 0 : index
    %c0_15 = arith.constant 0 : index
    %26 = vector.load %arg1[%c0_13, %c0_14, %c0_15] : memref<1x4x256xf32, #tpu.memory_space<vmem>>, vector<1x4x256xf32>
    %27 = vector.shape_cast %26 : vector<1x4x256xf32> to vector<4x256xf32>
    %cst = arith.constant 0.000000e+00 : f32
    %28 = vector.broadcast %cst : f32 to vector<4x1xf32>
    %29 = vector.extract_strided_slice %27 {offsets = [0, 1], sizes = [4, 255], strides = [1, 1]} : vector<4x256xf32> to vector<4x255xf32>
    %30 = tpu.concatenate %29, %28 in 1 : vector<4x255xf32>, vector<4x1xf32> -> vector<4x256xf32>
    %cst_16 = arith.constant 0.000000e+00 : f32
    %31 = vector.shape_cast %20 : vector<1x256xi1> to vector<1x256xi1>
    %32 = vector.broadcast %31 : vector<1x256xi1> to vector<4x256xi1>
    %33 = vector.broadcast %cst_16 : f32 to vector<4x256xf32>
    %34 = arith.select %32, %33, %30 : vector<4x256xi1>, vector<4x256xf32>
    %cst_17 = arith.constant 0.000000e+00 : f32
    %35 = vector.broadcast %cst_17 : f32 to vector<4x16xf32>
    %36 = vector.extract_strided_slice %27 {offsets = [0, 16], sizes = [4, 240], strides = [1, 1]} : vector<4x256xf32> to vector<4x240xf32>
    %37 = tpu.concatenate %36, %35 in 1 : vector<4x240xf32>, vector<4x16xf32> -> vector<4x256xf32>
    %cst_18 = arith.constant 0.000000e+00 : f32
    %38 = vector.broadcast %cst_18 : f32 to vector<4x17xf32>
    %39 = vector.extract_strided_slice %27 {offsets = [0, 17], sizes = [4, 239], strides = [1, 1]} : vector<4x256xf32> to vector<4x239xf32>
    %40 = tpu.concatenate %39, %38 in 1 : vector<4x239xf32>, vector<4x17xf32> -> vector<4x256xf32>
    %cst_19 = arith.constant 0.000000e+00 : f32
    %41 = vector.shape_cast %20 : vector<1x256xi1> to vector<1x256xi1>
    %42 = vector.broadcast %41 : vector<1x256xi1> to vector<4x256xi1>
    %43 = vector.broadcast %cst_19 : f32 to vector<4x256xf32>
    %44 = arith.select %42, %43, %40 : vector<4x256xi1>, vector<4x256xf32>
    %45 = vector.shape_cast %24 : vector<3x1xf32> to vector<3x1xf32>
    %46 = vector.broadcast %45 : vector<3x1xf32> to vector<3x256xf32>
    %47 = vector.extract_strided_slice %21 {offsets = [0, 4], sizes = [3, 1], strides = [1, 1]} : vector<3x36xf32> to vector<3x1xf32>
    %48 = vector.extract_strided_slice %27 {offsets = [0, 0], sizes = [1, 256], strides = [1, 1]} : vector<4x256xf32> to vector<1x256xf32>
    %49 = vector.broadcast %47 : vector<3x1xf32> to vector<3x256xf32>
    %50 = vector.broadcast %48 : vector<1x256xf32> to vector<3x256xf32>
    %51 = arith.mulf %49, %50 : vector<3x256xf32>
    %52 = arith.addf %46, %51 : vector<3x256xf32>
    %53 = vector.extract_strided_slice %21 {offsets = [0, 13], sizes = [3, 1], strides = [1, 1]} : vector<3x36xf32> to vector<3x1xf32>
    %54 = vector.extract_strided_slice %27 {offsets = [1, 0], sizes = [1, 256], strides = [1, 1]} : vector<4x256xf32> to vector<1x256xf32>
    %55 = vector.broadcast %53 : vector<3x1xf32> to vector<3x256xf32>
    %56 = vector.broadcast %54 : vector<1x256xf32> to vector<3x256xf32>
    %57 = arith.mulf %55, %56 : vector<3x256xf32>
    %58 = arith.addf %52, %57 : vector<3x256xf32>
    %59 = vector.extract_strided_slice %21 {offsets = [0, 22], sizes = [3, 1], strides = [1, 1]} : vector<3x36xf32> to vector<3x1xf32>
    %60 = vector.extract_strided_slice %27 {offsets = [2, 0], sizes = [1, 256], strides = [1, 1]} : vector<4x256xf32> to vector<1x256xf32>
    %61 = vector.broadcast %59 : vector<3x1xf32> to vector<3x256xf32>
    %62 = vector.broadcast %60 : vector<1x256xf32> to vector<3x256xf32>
    %63 = arith.mulf %61, %62 : vector<3x256xf32>
    %64 = arith.addf %58, %63 : vector<3x256xf32>
    %65 = vector.extract_strided_slice %21 {offsets = [0, 31], sizes = [3, 1], strides = [1, 1]} : vector<3x36xf32> to vector<3x1xf32>
    %66 = vector.extract_strided_slice %27 {offsets = [3, 0], sizes = [1, 256], strides = [1, 1]} : vector<4x256xf32> to vector<1x256xf32>
    %67 = vector.broadcast %65 : vector<3x1xf32> to vector<3x256xf32>
    %68 = vector.broadcast %66 : vector<1x256xf32> to vector<3x256xf32>
    %69 = arith.mulf %67, %68 : vector<3x256xf32>
    %70 = arith.addf %64, %69 : vector<3x256xf32>
    %cst_20 = arith.constant 0.000000e+00 : f32
    %71 = vector.broadcast %cst_20 : f32 to vector<3x256xf32>
    %72 = arith.maximumf %70, %71 : vector<3x256xf32>
    %c0_21 = arith.constant 0 : index
    %c0_22 = arith.constant 0 : index
    %73 = vector.load %arg8[%c0_21, %c0_22] : memref<32x256xf32, #tpu.memory_space<vmem>>, vector<3x256xf32>
    tpu.vector_store %arg8[%c0_21, %c0_22], %72 {strides = array<i32>} : memref<32x256xf32, #tpu.memory_space<vmem>>, vector<3x256xf32>,
    %74 = vector.shape_cast %24 : vector<3x1xf32> to vector<3x1xf32>
    %75 = vector.broadcast %74 : vector<3x1xf32> to vector<3x256xf32>
    %76 = vector.extract_strided_slice %21 {offsets = [0, 5], sizes = [3, 1], strides = [1, 1]} : vector<3x36xf32> to vector<3x1xf32>
    %77 = vector.extract_strided_slice %27 {offsets = [0, 0], sizes = [1, 256], strides = [1, 1]} : vector<4x256xf32> to vector<1x256xf32>
    %78 = vector.broadcast %76 : vector<3x1xf32> to vector<3x256xf32>
    %79 = vector.broadcast %77 : vector<1x256xf32> to vector<3x256xf32>
    %80 = arith.mulf %78, %79 : vector<3x256xf32>
    %81 = arith.addf %75, %80 : vector<3x256xf32>
    %82 = vector.extract_strided_slice %21 {offsets = [0, 14], sizes = [3, 1], strides = [1, 1]} : vector<3x36xf32> to vector<3x1xf32>
    %83 = vector.extract_strided_slice %27 {offsets = [1, 0], sizes = [1, 256], strides = [1, 1]} : vector<4x256xf32> to vector<1x256xf32>
    %84 = vector.broadcast %82 : vector<3x1xf32> to vector<3x256xf32>
    %85 = vector.broadcast %83 : vector<1x256xf32> to vector<3x256xf32>
    %86 = arith.mulf %84, %85 : vector<3x256xf32>
    %87 = arith.addf %81, %86 : vector<3x256xf32>
    %88 = vector.extract_strided_slice %21 {offsets = [0, 23], sizes = [3, 1], strides = [1, 1]} : vector<3x36xf32> to vector<3x1xf32>
    %89 = vector.extract_strided_slice %27 {offsets = [2, 0], sizes = [1, 256], strides = [1, 1]} : vector<4x256xf32> to vector<1x256xf32>
    %90 = vector.broadcast %88 : vector<3x1xf32> to vector<3x256xf32>
    %91 = vector.broadcast %89 : vector<1x256xf32> to vector<3x256xf32>
    %92 = arith.mulf %90, %91 : vector<3x256xf32>
    %93 = arith.addf %87, %92 : vector<3x256xf32>
    %94 = vector.extract_strided_slice %21 {offsets = [0, 32], sizes = [3, 1], strides = [1, 1]} : vector<3x36xf32> to vector<3x1xf32>
    %95 = vector.extract_strided_slice %27 {offsets = [3, 0], sizes = [1, 256], strides = [1, 1]} : vector<4x256xf32> to vector<1x256xf32>
    %96 = vector.broadcast %94 : vector<3x1xf32> to vector<3x256xf32>
    %97 = vector.broadcast %95 : vector<1x256xf32> to vector<3x256xf32>
    %98 = arith.mulf %96, %97 : vector<3x256xf32>
    %99 = arith.addf %93, %98 : vector<3x256xf32>
    %100 = vector.extract_strided_slice %21 {offsets = [0, 3], sizes = [3, 1], strides = [1, 1]} : vector<3x36xf32> to vector<3x1xf32>
    %101 = vector.extract_strided_slice %34 {offsets = [0, 0], sizes = [1, 256], strides = [1, 1]} : vector<4x256xf32> to vector<1x256xf32>
    %102 = vector.broadcast %100 : vector<3x1xf32> to vector<3x256xf32>
    %103 = vector.broadcast %101 : vector<1x256xf32> to vector<3x256xf32>
    %104 = arith.mulf %102, %103 : vector<3x256xf32>
    %105 = arith.addf %99, %104 : vector<3x256xf32>
    %106 = vector.extract_strided_slice %21 {offsets = [0, 12], sizes = [3, 1], strides = [1, 1]} : vector<3x36xf32> to vector<3x1xf32>
    %107 = vector.extract_strided_slice %34 {offsets = [1, 0], sizes = [1, 256], strides = [1, 1]} : vector<4x256xf32> to vector<1x256xf32>
    %108 = vector.broadcast %106 : vector<3x1xf32> to vector<3x256xf32>
    %109 = vector.broadcast %107 : vector<1x256xf32> to vector<3x256xf32>
    %110 = arith.mulf %108, %109 : vector<3x256xf32>
    %111 = arith.addf %105, %110 : vector<3x256xf32>
    %112 = vector.extract_strided_slice %21 {offsets = [0, 21], sizes = [3, 1], strides = [1, 1]} : vector<3x36xf32> to vector<3x1xf32>
    %113 = vector.extract_strided_slice %34 {offsets = [2, 0], sizes = [1, 256], strides = [1, 1]} : vector<4x256xf32> to vector<1x256xf32>
    %114 = vector.broadcast %112 : vector<3x1xf32> to vector<3x256xf32>
    %115 = vector.broadcast %113 : vector<1x256xf32> to vector<3x256xf32>
    %116 = arith.mulf %114, %115 : vector<3x256xf32>
    %117 = arith.addf %111, %116 : vector<3x256xf32>
    %118 = vector.extract_strided_slice %21 {offsets = [0, 30], sizes = [3, 1], strides = [1, 1]} : vector<3x36xf32> to vector<3x1xf32>
    %119 = vector.extract_strided_slice %34 {offsets = [3, 0], sizes = [1, 256], strides = [1, 1]} : vector<4x256xf32> to vector<1x256xf32>
    %120 = vector.broadcast %118 : vector<3x1xf32> to vector<3x256xf32>
    %121 = vector.broadcast %119 : vector<1x256xf32> to vector<3x256xf32>
    %122 = arith.mulf %120, %121 : vector<3x256xf32>
    %123 = arith.addf %117, %122 : vector<3x256xf32>
    %cst_23 = arith.constant 0.000000e+00 : f32
    %124 = vector.broadcast %cst_23 : f32 to vector<3x256xf32>
    %125 = arith.maximumf %123, %124 : vector<3x256xf32>
    %c8 = arith.constant 8 : index
    %c0_24 = arith.constant 0 : index
    %126 = vector.load %arg8[%c8, %c0_24] : memref<32x256xf32, #tpu.memory_space<vmem>>, vector<3x256xf32>
    tpu.vector_store %arg8[%c8, %c0_24], %125 {strides = array<i32>} : memref<32x256xf32, #tpu.memory_space<vmem>>, vector<3x256xf32>,
    %127 = vector.shape_cast %24 : vector<3x1xf32> to vector<3x1xf32>
    %128 = vector.broadcast %127 : vector<3x1xf32> to vector<3x256xf32>
    %129 = vector.extract_strided_slice %21 {offsets = [0, 7], sizes = [3, 1], strides = [1, 1]} : vector<3x36xf32> to vector<3x1xf32>
    %130 = vector.extract_strided_slice %27 {offsets = [0, 0], sizes = [1, 256], strides = [1, 1]} : vector<4x256xf32> to vector<1x256xf32>
    %131 = vector.broadcast %129 : vector<3x1xf32> to vector<3x256xf32>
    %132 = vector.broadcast %130 : vector<1x256xf32> to vector<3x256xf32>
    %133 = arith.mulf %131, %132 : vector<3x256xf32>
    %134 = arith.addf %128, %133 : vector<3x256xf32>
    %135 = vector.extract_strided_slice %21 {offsets = [0, 16], sizes = [3, 1], strides = [1, 1]} : vector<3x36xf32> to vector<3x1xf32>
    %136 = vector.extract_strided_slice %27 {offsets = [1, 0], sizes = [1, 256], strides = [1, 1]} : vector<4x256xf32> to vector<1x256xf32>
    %137 = vector.broadcast %135 : vector<3x1xf32> to vector<3x256xf32>
    %138 = vector.broadcast %136 : vector<1x256xf32> to vector<3x256xf32>
    %139 = arith.mulf %137, %138 : vector<3x256xf32>
    %140 = arith.addf %134, %139 : vector<3x256xf32>
    %141 = vector.extract_strided_slice %21 {offsets = [0, 25], sizes = [3, 1], strides = [1, 1]} : vector<3x36xf32> to vector<3x1xf32>
    %142 = vector.extract_strided_slice %27 {offsets = [2, 0], sizes = [1, 256], strides = [1, 1]} : vector<4x256xf32> to vector<1x256xf32>
    %143 = vector.broadcast %141 : vector<3x1xf32> to vector<3x256xf32>
    %144 = vector.broadcast %142 : vector<1x256xf32> to vector<3x256xf32>
    %145 = arith.mulf %143, %144 : vector<3x256xf32>
    %146 = arith.addf %140, %145 : vector<3x256xf32>
    %147 = vector.extract_strided_slice %21 {offsets = [0, 34], sizes = [3, 1], strides = [1, 1]} : vector<3x36xf32> to vector<3x1xf32>
    %148 = vector.extract_strided_slice %27 {offsets = [3, 0], sizes = [1, 256], strides = [1, 1]} : vector<4x256xf32> to vector<1x256xf32>
    %149 = vector.broadcast %147 : vector<3x1xf32> to vector<3x256xf32>
    %150 = vector.broadcast %148 : vector<1x256xf32> to vector<3x256xf32>
    %151 = arith.mulf %149, %150 : vector<3x256xf32>
    %152 = arith.addf %146, %151 : vector<3x256xf32>
    %153 = vector.extract_strided_slice %21 {offsets = [0, 1], sizes = [3, 1], strides = [1, 1]} : vector<3x36xf32> to vector<3x1xf32>
    %154 = vector.extract_strided_slice %37 {offsets = [0, 0], sizes = [1, 256], strides = [1, 1]} : vector<4x256xf32> to vector<1x256xf32>
    %155 = vector.broadcast %153 : vector<3x1xf32> to vector<3x256xf32>
    %156 = vector.broadcast %154 : vector<1x256xf32> to vector<3x256xf32>
    %157 = arith.mulf %155, %156 : vector<3x256xf32>
    %158 = arith.addf %152, %157 : vector<3x256xf32>
    %159 = vector.extract_strided_slice %21 {offsets = [0, 10], sizes = [3, 1], strides = [1, 1]} : vector<3x36xf32> to vector<3x1xf32>
    %160 = vector.extract_strided_slice %37 {offsets = [1, 0], sizes = [1, 256], strides = [1, 1]} : vector<4x256xf32> to vector<1x256xf32>
    %161 = vector.broadcast %159 : vector<3x1xf32> to vector<3x256xf32>
    %162 = vector.broadcast %160 : vector<1x256xf32> to vector<3x256xf32>
    %163 = arith.mulf %161, %162 : vector<3x256xf32>
    %164 = arith.addf %158, %163 : vector<3x256xf32>
    %165 = vector.extract_strided_slice %21 {offsets = [0, 19], sizes = [3, 1], strides = [1, 1]} : vector<3x36xf32> to vector<3x1xf32>
    %166 = vector.extract_strided_slice %37 {offsets = [2, 0], sizes = [1, 256], strides = [1, 1]} : vector<4x256xf32> to vector<1x256xf32>
    %167 = vector.broadcast %165 : vector<3x1xf32> to vector<3x256xf32>
    %168 = vector.broadcast %166 : vector<1x256xf32> to vector<3x256xf32>
    %169 = arith.mulf %167, %168 : vector<3x256xf32>
    %170 = arith.addf %164, %169 : vector<3x256xf32>
    %171 = vector.extract_strided_slice %21 {offsets = [0, 28], sizes = [3, 1], strides = [1, 1]} : vector<3x36xf32> to vector<3x1xf32>
    %172 = vector.extract_strided_slice %37 {offsets = [3, 0], sizes = [1, 256], strides = [1, 1]} : vector<4x256xf32> to vector<1x256xf32>
    %173 = vector.broadcast %171 : vector<3x1xf32> to vector<3x256xf32>
    %174 = vector.broadcast %172 : vector<1x256xf32> to vector<3x256xf32>
    %175 = arith.mulf %173, %174 : vector<3x256xf32>
    %176 = arith.addf %170, %175 : vector<3x256xf32>
    %cst_25 = arith.constant 0.000000e+00 : f32
    %177 = vector.broadcast %cst_25 : f32 to vector<3x256xf32>
    %178 = arith.maximumf %176, %177 : vector<3x256xf32>
    %c16 = arith.constant 16 : index
    %c0_26 = arith.constant 0 : index
    %179 = vector.load %arg8[%c16, %c0_26] : memref<32x256xf32, #tpu.memory_space<vmem>>, vector<3x256xf32>
    tpu.vector_store %arg8[%c16, %c0_26], %178 {strides = array<i32>} : memref<32x256xf32, #tpu.memory_space<vmem>>, vector<3x256xf32>,
    %180 = vector.shape_cast %24 : vector<3x1xf32> to vector<3x1xf32>
    %181 = vector.broadcast %180 : vector<3x1xf32> to vector<3x256xf32>
    %182 = vector.extract_strided_slice %21 {offsets = [0, 8], sizes = [3, 1], strides = [1, 1]} : vector<3x36xf32> to vector<3x1xf32>
    %183 = vector.extract_strided_slice %27 {offsets = [0, 0], sizes = [1, 256], strides = [1, 1]} : vector<4x256xf32> to vector<1x256xf32>
    %184 = vector.broadcast %182 : vector<3x1xf32> to vector<3x256xf32>
    %185 = vector.broadcast %183 : vector<1x256xf32> to vector<3x256xf32>
    %186 = arith.mulf %184, %185 : vector<3x256xf32>
    %187 = arith.addf %181, %186 : vector<3x256xf32>
    %188 = vector.extract_strided_slice %21 {offsets = [0, 17], sizes = [3, 1], strides = [1, 1]} : vector<3x36xf32> to vector<3x1xf32>
    %189 = vector.extract_strided_slice %27 {offsets = [1, 0], sizes = [1, 256], strides = [1, 1]} : vector<4x256xf32> to vector<1x256xf32>
    %190 = vector.broadcast %188 : vector<3x1xf32> to vector<3x256xf32>
    %191 = vector.broadcast %189 : vector<1x256xf32> to vector<3x256xf32>
    %192 = arith.mulf %190, %191 : vector<3x256xf32>
    %193 = arith.addf %187, %192 : vector<3x256xf32>
    %194 = vector.extract_strided_slice %21 {offsets = [0, 26], sizes = [3, 1], strides = [1, 1]} : vector<3x36xf32> to vector<3x1xf32>
    %195 = vector.extract_strided_slice %27 {offsets = [2, 0], sizes = [1, 256], strides = [1, 1]} : vector<4x256xf32> to vector<1x256xf32>
    %196 = vector.broadcast %194 : vector<3x1xf32> to vector<3x256xf32>
    %197 = vector.broadcast %195 : vector<1x256xf32> to vector<3x256xf32>
    %198 = arith.mulf %196, %197 : vector<3x256xf32>
    %199 = arith.addf %193, %198 : vector<3x256xf32>
    %200 = vector.extract_strided_slice %21 {offsets = [0, 35], sizes = [3, 1], strides = [1, 1]} : vector<3x36xf32> to vector<3x1xf32>
    %201 = vector.extract_strided_slice %27 {offsets = [3, 0], sizes = [1, 256], strides = [1, 1]} : vector<4x256xf32> to vector<1x256xf32>
    %202 = vector.broadcast %200 : vector<3x1xf32> to vector<3x256xf32>
    %203 = vector.broadcast %201 : vector<1x256xf32> to vector<3x256xf32>
    %204 = arith.mulf %202, %203 : vector<3x256xf32>
    %205 = arith.addf %199, %204 : vector<3x256xf32>
    %206 = vector.extract_strided_slice %21 {offsets = [0, 6], sizes = [3, 1], strides = [1, 1]} : vector<3x36xf32> to vector<3x1xf32>
    %207 = vector.extract_strided_slice %34 {offsets = [0, 0], sizes = [1, 256], strides = [1, 1]} : vector<4x256xf32> to vector<1x256xf32>
    %208 = vector.broadcast %206 : vector<3x1xf32> to vector<3x256xf32>
    %209 = vector.broadcast %207 : vector<1x256xf32> to vector<3x256xf32>
    %210 = arith.mulf %208, %209 : vector<3x256xf32>
    %211 = arith.addf %205, %210 : vector<3x256xf32>
    %212 = vector.extract_strided_slice %21 {offsets = [0, 15], sizes = [3, 1], strides = [1, 1]} : vector<3x36xf32> to vector<3x1xf32>
    %213 = vector.extract_strided_slice %34 {offsets = [1, 0], sizes = [1, 256], strides = [1, 1]} : vector<4x256xf32> to vector<1x256xf32>
    %214 = vector.broadcast %212 : vector<3x1xf32> to vector<3x256xf32>
    %215 = vector.broadcast %213 : vector<1x256xf32> to vector<3x256xf32>
    %216 = arith.mulf %214, %215 : vector<3x256xf32>
    %217 = arith.addf %211, %216 : vector<3x256xf32>
    %218 = vector.extract_strided_slice %21 {offsets = [0, 24], sizes = [3, 1], strides = [1, 1]} : vector<3x36xf32> to vector<3x1xf32>
    %219 = vector.extract_strided_slice %34 {offsets = [2, 0], sizes = [1, 256], strides = [1, 1]} : vector<4x256xf32> to vector<1x256xf32>
    %220 = vector.broadcast %218 : vector<3x1xf32> to vector<3x256xf32>
    %221 = vector.broadcast %219 : vector<1x256xf32> to vector<3x256xf32>
    %222 = arith.mulf %220, %221 : vector<3x256xf32>
    %223 = arith.addf %217, %222 : vector<3x256xf32>
    %224 = vector.extract_strided_slice %21 {offsets = [0, 33], sizes = [3, 1], strides = [1, 1]} : vector<3x36xf32> to vector<3x1xf32>
    %225 = vector.extract_strided_slice %34 {offsets = [3, 0], sizes = [1, 256], strides = [1, 1]} : vector<4x256xf32> to vector<1x256xf32>
    %226 = vector.broadcast %224 : vector<3x1xf32> to vector<3x256xf32>
    %227 = vector.broadcast %225 : vector<1x256xf32> to vector<3x256xf32>
    %228 = arith.mulf %226, %227 : vector<3x256xf32>
    %229 = arith.addf %223, %228 : vector<3x256xf32>
    %230 = vector.extract_strided_slice %21 {offsets = [0, 2], sizes = [3, 1], strides = [1, 1]} : vector<3x36xf32> to vector<3x1xf32>
    %231 = vector.extract_strided_slice %37 {offsets = [0, 0], sizes = [1, 256], strides = [1, 1]} : vector<4x256xf32> to vector<1x256xf32>
    %232 = vector.broadcast %230 : vector<3x1xf32> to vector<3x256xf32>
    %233 = vector.broadcast %231 : vector<1x256xf32> to vector<3x256xf32>
    %234 = arith.mulf %232, %233 : vector<3x256xf32>
    %235 = arith.addf %229, %234 : vector<3x256xf32>
    %236 = vector.extract_strided_slice %21 {offsets = [0, 11], sizes = [3, 1], strides = [1, 1]} : vector<3x36xf32> to vector<3x1xf32>
    %237 = vector.extract_strided_slice %37 {offsets = [1, 0], sizes = [1, 256], strides = [1, 1]} : vector<4x256xf32> to vector<1x256xf32>
    %238 = vector.broadcast %236 : vector<3x1xf32> to vector<3x256xf32>
    %239 = vector.broadcast %237 : vector<1x256xf32> to vector<3x256xf32>
    %240 = arith.mulf %238, %239 : vector<3x256xf32>
    %241 = arith.addf %235, %240 : vector<3x256xf32>
    %242 = vector.extract_strided_slice %21 {offsets = [0, 20], sizes = [3, 1], strides = [1, 1]} : vector<3x36xf32> to vector<3x1xf32>
    %243 = vector.extract_strided_slice %37 {offsets = [2, 0], sizes = [1, 256], strides = [1, 1]} : vector<4x256xf32> to vector<1x256xf32>
    %244 = vector.broadcast %242 : vector<3x1xf32> to vector<3x256xf32>
    %245 = vector.broadcast %243 : vector<1x256xf32> to vector<3x256xf32>
    %246 = arith.mulf %244, %245 : vector<3x256xf32>
    %247 = arith.addf %241, %246 : vector<3x256xf32>
    %248 = vector.extract_strided_slice %21 {offsets = [0, 29], sizes = [3, 1], strides = [1, 1]} : vector<3x36xf32> to vector<3x1xf32>
    %249 = vector.extract_strided_slice %37 {offsets = [3, 0], sizes = [1, 256], strides = [1, 1]} : vector<4x256xf32> to vector<1x256xf32>
    %250 = vector.broadcast %248 : vector<3x1xf32> to vector<3x256xf32>
    %251 = vector.broadcast %249 : vector<1x256xf32> to vector<3x256xf32>
    %252 = arith.mulf %250, %251 : vector<3x256xf32>
    %253 = arith.addf %247, %252 : vector<3x256xf32>
    %254 = vector.extract_strided_slice %21 {offsets = [0, 0], sizes = [3, 1], strides = [1, 1]} : vector<3x36xf32> to vector<3x1xf32>
    %255 = vector.extract_strided_slice %44 {offsets = [0, 0], sizes = [1, 256], strides = [1, 1]} : vector<4x256xf32> to vector<1x256xf32>
    %256 = vector.broadcast %254 : vector<3x1xf32> to vector<3x256xf32>
    %257 = vector.broadcast %255 : vector<1x256xf32> to vector<3x256xf32>
    %258 = arith.mulf %256, %257 : vector<3x256xf32>
    %259 = arith.addf %253, %258 : vector<3x256xf32>
    %260 = vector.extract_strided_slice %21 {offsets = [0, 9], sizes = [3, 1], strides = [1, 1]} : vector<3x36xf32> to vector<3x1xf32>
    %261 = vector.extract_strided_slice %44 {offsets = [1, 0], sizes = [1, 256], strides = [1, 1]} : vector<4x256xf32> to vector<1x256xf32>
    %262 = vector.broadcast %260 : vector<3x1xf32> to vector<3x256xf32>
    %263 = vector.broadcast %261 : vector<1x256xf32> to vector<3x256xf32>
    %264 = arith.mulf %262, %263 : vector<3x256xf32>
    %265 = arith.addf %259, %264 : vector<3x256xf32>
    %266 = vector.extract_strided_slice %21 {offsets = [0, 18], sizes = [3, 1], strides = [1, 1]} : vector<3x36xf32> to vector<3x1xf32>
    %267 = vector.extract_strided_slice %44 {offsets = [2, 0], sizes = [1, 256], strides = [1, 1]} : vector<4x256xf32> to vector<1x256xf32>
    %268 = vector.broadcast %266 : vector<3x1xf32> to vector<3x256xf32>
    %269 = vector.broadcast %267 : vector<1x256xf32> to vector<3x256xf32>
    %270 = arith.mulf %268, %269 : vector<3x256xf32>
    %271 = arith.addf %265, %270 : vector<3x256xf32>
    %272 = vector.extract_strided_slice %21 {offsets = [0, 27], sizes = [3, 1], strides = [1, 1]} : vector<3x36xf32> to vector<3x1xf32>
    %273 = vector.extract_strided_slice %44 {offsets = [3, 0], sizes = [1, 256], strides = [1, 1]} : vector<4x256xf32> to vector<1x256xf32>
    %274 = vector.broadcast %272 : vector<3x1xf32> to vector<3x256xf32>
    %275 = vector.broadcast %273 : vector<1x256xf32> to vector<3x256xf32>
    %276 = arith.mulf %274, %275 : vector<3x256xf32>
    %277 = arith.addf %271, %276 : vector<3x256xf32>
    %cst_27 = arith.constant 0.000000e+00 : f32
    %278 = vector.broadcast %cst_27 : f32 to vector<3x256xf32>
    %279 = arith.maximumf %277, %278 : vector<3x256xf32>
    %c24 = arith.constant 24 : index
    %c0_28 = arith.constant 0 : index
    %280 = vector.load %arg8[%c24, %c0_28] : memref<32x256xf32, #tpu.memory_space<vmem>>, vector<3x256xf32>
    tpu.vector_store %arg8[%c24, %c0_28], %279 {strides = array<i32>} : memref<32x256xf32, #tpu.memory_space<vmem>>, vector<3x256xf32>,
    %281 = vector.shape_cast %25 : vector<3x1xf32> to vector<3x1xf32>
    %282 = vector.broadcast %281 : vector<3x1xf32> to vector<3x256xf32>
    %283 = vector.extract_strided_slice %23 {offsets = [0, 0], sizes = [3, 1], strides = [1, 1]} : vector<3x16xf32> to vector<3x1xf32>
    %284 = vector.extract_strided_slice %27 {offsets = [0, 0], sizes = [1, 256], strides = [1, 1]} : vector<4x256xf32> to vector<1x256xf32>
    %285 = vector.broadcast %283 : vector<3x1xf32> to vector<3x256xf32>
    %286 = vector.broadcast %284 : vector<1x256xf32> to vector<3x256xf32>
    %287 = arith.mulf %285, %286 : vector<3x256xf32>
    %288 = arith.addf %282, %287 : vector<3x256xf32>
    %289 = vector.extract_strided_slice %23 {offsets = [0, 4], sizes = [3, 1], strides = [1, 1]} : vector<3x16xf32> to vector<3x1xf32>
    %290 = vector.extract_strided_slice %27 {offsets = [1, 0], sizes = [1, 256], strides = [1, 1]} : vector<4x256xf32> to vector<1x256xf32>
    %291 = vector.broadcast %289 : vector<3x1xf32> to vector<3x256xf32>
    %292 = vector.broadcast %290 : vector<1x256xf32> to vector<3x256xf32>
    %293 = arith.mulf %291, %292 : vector<3x256xf32>
    %294 = arith.addf %288, %293 : vector<3x256xf32>
    %295 = vector.extract_strided_slice %23 {offsets = [0, 8], sizes = [3, 1], strides = [1, 1]} : vector<3x16xf32> to vector<3x1xf32>
    %296 = vector.extract_strided_slice %27 {offsets = [2, 0], sizes = [1, 256], strides = [1, 1]} : vector<4x256xf32> to vector<1x256xf32>
    %297 = vector.broadcast %295 : vector<3x1xf32> to vector<3x256xf32>
    %298 = vector.broadcast %296 : vector<1x256xf32> to vector<3x256xf32>
    %299 = arith.mulf %297, %298 : vector<3x256xf32>
    %300 = arith.addf %294, %299 : vector<3x256xf32>
    %301 = vector.extract_strided_slice %23 {offsets = [0, 12], sizes = [3, 1], strides = [1, 1]} : vector<3x16xf32> to vector<3x1xf32>
    %302 = vector.extract_strided_slice %27 {offsets = [3, 0], sizes = [1, 256], strides = [1, 1]} : vector<4x256xf32> to vector<1x256xf32>
    %303 = vector.broadcast %301 : vector<3x1xf32> to vector<3x256xf32>
    %304 = vector.broadcast %302 : vector<1x256xf32> to vector<3x256xf32>
    %305 = arith.mulf %303, %304 : vector<3x256xf32>
    %306 = arith.addf %300, %305 : vector<3x256xf32>
    %c24_29 = arith.constant 24 : index
    %c0_30 = arith.constant 0 : index
    %307 = vector.load %arg8[%c24_29, %c0_30] : memref<32x256xf32, #tpu.memory_space<vmem>>, vector<3x256xf32>
    %cst_31 = arith.constant 0.000000e+00 : f32
    %308 = vector.broadcast %cst_31 : f32 to vector<3x17xf32>
    %309 = vector.extract_strided_slice %307 {offsets = [0, 0], sizes = [3, 239], strides = [1, 1]} : vector<3x256xf32> to vector<3x239xf32>
    %310 = tpu.concatenate %308, %309 in 1 : vector<3x17xf32>, vector<3x239xf32> -> vector<3x256xf32>
    %cst_32 = arith.constant 0.000000e+00 : f32
    %311 = vector.shape_cast %18 : vector<1x256xi1> to vector<1x256xi1>
    %312 = vector.broadcast %311 : vector<1x256xi1> to vector<3x256xi1>
    %313 = vector.broadcast %cst_32 : f32 to vector<3x256xf32>
    %314 = arith.select %312, %313, %310 : vector<3x256xi1>, vector<3x256xf32>
    %315 = vector.extract_strided_slice %22 {offsets = [0, 0], sizes = [3, 1], strides = [1, 1]} : vector<3x27xf32> to vector<3x1xf32>
    %316 = vector.extract_strided_slice %314 {offsets = [0, 0], sizes = [1, 256], strides = [1, 1]} : vector<3x256xf32> to vector<1x256xf32>
    %317 = vector.broadcast %315 : vector<3x1xf32> to vector<3x256xf32>
    %318 = vector.broadcast %316 : vector<1x256xf32> to vector<3x256xf32>
    %319 = arith.mulf %317, %318 : vector<3x256xf32>
    %320 = arith.addf %306, %319 : vector<3x256xf32>
    %321 = vector.extract_strided_slice %22 {offsets = [0, 9], sizes = [3, 1], strides = [1, 1]} : vector<3x27xf32> to vector<3x1xf32>
    %322 = vector.extract_strided_slice %314 {offsets = [1, 0], sizes = [1, 256], strides = [1, 1]} : vector<3x256xf32> to vector<1x256xf32>
    %323 = vector.broadcast %321 : vector<3x1xf32> to vector<3x256xf32>
    %324 = vector.broadcast %322 : vector<1x256xf32> to vector<3x256xf32>
    %325 = arith.mulf %323, %324 : vector<3x256xf32>
    %326 = arith.addf %320, %325 : vector<3x256xf32>
    %327 = vector.extract_strided_slice %22 {offsets = [0, 18], sizes = [3, 1], strides = [1, 1]} : vector<3x27xf32> to vector<3x1xf32>
    %328 = vector.extract_strided_slice %314 {offsets = [2, 0], sizes = [1, 256], strides = [1, 1]} : vector<3x256xf32> to vector<1x256xf32>
    %329 = vector.broadcast %327 : vector<3x1xf32> to vector<3x256xf32>
    %330 = vector.broadcast %328 : vector<1x256xf32> to vector<3x256xf32>
    %331 = arith.mulf %329, %330 : vector<3x256xf32>
    %332 = arith.addf %326, %331 : vector<3x256xf32>
    %c16_33 = arith.constant 16 : index
    %c0_34 = arith.constant 0 : index
    %333 = vector.load %arg8[%c16_33, %c0_34] : memref<32x256xf32, #tpu.memory_space<vmem>>, vector<3x256xf32>
    %cst_35 = arith.constant 0.000000e+00 : f32
    %334 = vector.broadcast %cst_35 : f32 to vector<3x16xf32>
    %335 = vector.extract_strided_slice %333 {offsets = [0, 0], sizes = [3, 240], strides = [1, 1]} : vector<3x256xf32> to vector<3x240xf32>
    %336 = tpu.concatenate %334, %335 in 1 : vector<3x16xf32>, vector<3x240xf32> -> vector<3x256xf32>
    %337 = vector.extract_strided_slice %22 {offsets = [0, 1], sizes = [3, 1], strides = [1, 1]} : vector<3x27xf32> to vector<3x1xf32>
    %338 = vector.extract_strided_slice %336 {offsets = [0, 0], sizes = [1, 256], strides = [1, 1]} : vector<3x256xf32> to vector<1x256xf32>
    %339 = vector.broadcast %337 : vector<3x1xf32> to vector<3x256xf32>
    %340 = vector.broadcast %338 : vector<1x256xf32> to vector<3x256xf32>
    %341 = arith.mulf %339, %340 : vector<3x256xf32>
    %342 = arith.addf %332, %341 : vector<3x256xf32>
    %343 = vector.extract_strided_slice %22 {offsets = [0, 10], sizes = [3, 1], strides = [1, 1]} : vector<3x27xf32> to vector<3x1xf32>
    %344 = vector.extract_strided_slice %336 {offsets = [1, 0], sizes = [1, 256], strides = [1, 1]} : vector<3x256xf32> to vector<1x256xf32>
    %345 = vector.broadcast %343 : vector<3x1xf32> to vector<3x256xf32>
    %346 = vector.broadcast %344 : vector<1x256xf32> to vector<3x256xf32>
    %347 = arith.mulf %345, %346 : vector<3x256xf32>
    %348 = arith.addf %342, %347 : vector<3x256xf32>
    %349 = vector.extract_strided_slice %22 {offsets = [0, 19], sizes = [3, 1], strides = [1, 1]} : vector<3x27xf32> to vector<3x1xf32>
    %350 = vector.extract_strided_slice %336 {offsets = [2, 0], sizes = [1, 256], strides = [1, 1]} : vector<3x256xf32> to vector<1x256xf32>
    %351 = vector.broadcast %349 : vector<3x1xf32> to vector<3x256xf32>
    %352 = vector.broadcast %350 : vector<1x256xf32> to vector<3x256xf32>
    %353 = arith.mulf %351, %352 : vector<3x256xf32>
    %354 = arith.addf %348, %353 : vector<3x256xf32>
    %c24_36 = arith.constant 24 : index
    %c0_37 = arith.constant 0 : index
    %355 = vector.load %arg8[%c24_36, %c0_37] : memref<32x256xf32, #tpu.memory_space<vmem>>, vector<3x256xf32>
    %cst_38 = arith.constant 0.000000e+00 : f32
    %356 = vector.broadcast %cst_38 : f32 to vector<3x16xf32>
    %357 = vector.extract_strided_slice %355 {offsets = [0, 0], sizes = [3, 240], strides = [1, 1]} : vector<3x256xf32> to vector<3x240xf32>
    %358 = tpu.concatenate %356, %357 in 1 : vector<3x16xf32>, vector<3x240xf32> -> vector<3x256xf32>
    %359 = vector.extract_strided_slice %22 {offsets = [0, 2], sizes = [3, 1], strides = [1, 1]} : vector<3x27xf32> to vector<3x1xf32>
    %360 = vector.extract_strided_slice %358 {offsets = [0, 0], sizes = [1, 256], strides = [1, 1]} : vector<3x256xf32> to vector<1x256xf32>
    %361 = vector.broadcast %359 : vector<3x1xf32> to vector<3x256xf32>
    %362 = vector.broadcast %360 : vector<1x256xf32> to vector<3x256xf32>
    %363 = arith.mulf %361, %362 : vector<3x256xf32>
    %364 = arith.addf %354, %363 : vector<3x256xf32>
    %365 = vector.extract_strided_slice %22 {offsets = [0, 11], sizes = [3, 1], strides = [1, 1]} : vector<3x27xf32> to vector<3x1xf32>
    %366 = vector.extract_strided_slice %358 {offsets = [1, 0], sizes = [1, 256], strides = [1, 1]} : vector<3x256xf32> to vector<1x256xf32>
    %367 = vector.broadcast %365 : vector<3x1xf32> to vector<3x256xf32>
    %368 = vector.broadcast %366 : vector<1x256xf32> to vector<3x256xf32>
    %369 = arith.mulf %367, %368 : vector<3x256xf32>
    %370 = arith.addf %364, %369 : vector<3x256xf32>
    %371 = vector.extract_strided_slice %22 {offsets = [0, 20], sizes = [3, 1], strides = [1, 1]} : vector<3x27xf32> to vector<3x1xf32>
    %372 = vector.extract_strided_slice %358 {offsets = [2, 0], sizes = [1, 256], strides = [1, 1]} : vector<3x256xf32> to vector<1x256xf32>
    %373 = vector.broadcast %371 : vector<3x1xf32> to vector<3x256xf32>
    %374 = vector.broadcast %372 : vector<1x256xf32> to vector<3x256xf32>
    %375 = arith.mulf %373, %374 : vector<3x256xf32>
    %376 = arith.addf %370, %375 : vector<3x256xf32>
    %c8_39 = arith.constant 8 : index
    %c0_40 = arith.constant 0 : index
    %377 = vector.load %arg8[%c8_39, %c0_40] : memref<32x256xf32, #tpu.memory_space<vmem>>, vector<3x256xf32>
    %cst_41 = arith.constant 0.000000e+00 : f32
    %378 = vector.broadcast %cst_41 : f32 to vector<3x1xf32>
    %379 = vector.extract_strided_slice %377 {offsets = [0, 0], sizes = [3, 255], strides = [1, 1]} : vector<3x256xf32> to vector<3x255xf32>
    %380 = tpu.concatenate %378, %379 in 1 : vector<3x1xf32>, vector<3x255xf32> -> vector<3x256xf32>
    %cst_42 = arith.constant 0.000000e+00 : f32
    %381 = vector.shape_cast %18 : vector<1x256xi1> to vector<1x256xi1>
    %382 = vector.broadcast %381 : vector<1x256xi1> to vector<3x256xi1>
    %383 = vector.broadcast %cst_42 : f32 to vector<3x256xf32>
    %384 = arith.select %382, %383, %380 : vector<3x256xi1>, vector<3x256xf32>
    %385 = vector.extract_strided_slice %22 {offsets = [0, 3], sizes = [3, 1], strides = [1, 1]} : vector<3x27xf32> to vector<3x1xf32>
    %386 = vector.extract_strided_slice %384 {offsets = [0, 0], sizes = [1, 256], strides = [1, 1]} : vector<3x256xf32> to vector<1x256xf32>
    %387 = vector.broadcast %385 : vector<3x1xf32> to vector<3x256xf32>
    %388 = vector.broadcast %386 : vector<1x256xf32> to vector<3x256xf32>
    %389 = arith.mulf %387, %388 : vector<3x256xf32>
    %390 = arith.addf %376, %389 : vector<3x256xf32>
    %391 = vector.extract_strided_slice %22 {offsets = [0, 12], sizes = [3, 1], strides = [1, 1]} : vector<3x27xf32> to vector<3x1xf32>
    %392 = vector.extract_strided_slice %384 {offsets = [1, 0], sizes = [1, 256], strides = [1, 1]} : vector<3x256xf32> to vector<1x256xf32>
    %393 = vector.broadcast %391 : vector<3x1xf32> to vector<3x256xf32>
    %394 = vector.broadcast %392 : vector<1x256xf32> to vector<3x256xf32>
    %395 = arith.mulf %393, %394 : vector<3x256xf32>
    %396 = arith.addf %390, %395 : vector<3x256xf32>
    %397 = vector.extract_strided_slice %22 {offsets = [0, 21], sizes = [3, 1], strides = [1, 1]} : vector<3x27xf32> to vector<3x1xf32>
    %398 = vector.extract_strided_slice %384 {offsets = [2, 0], sizes = [1, 256], strides = [1, 1]} : vector<3x256xf32> to vector<1x256xf32>
    %399 = vector.broadcast %397 : vector<3x1xf32> to vector<3x256xf32>
    %400 = vector.broadcast %398 : vector<1x256xf32> to vector<3x256xf32>
    %401 = arith.mulf %399, %400 : vector<3x256xf32>
    %402 = arith.addf %396, %401 : vector<3x256xf32>
    %c0_43 = arith.constant 0 : index
    %c0_44 = arith.constant 0 : index
    %403 = vector.load %arg8[%c0_43, %c0_44] : memref<32x256xf32, #tpu.memory_space<vmem>>, vector<3x256xf32>
    %404 = vector.extract_strided_slice %22 {offsets = [0, 4], sizes = [3, 1], strides = [1, 1]} : vector<3x27xf32> to vector<3x1xf32>
    %405 = vector.extract_strided_slice %403 {offsets = [0, 0], sizes = [1, 256], strides = [1, 1]} : vector<3x256xf32> to vector<1x256xf32>
    %406 = vector.broadcast %404 : vector<3x1xf32> to vector<3x256xf32>
    %407 = vector.broadcast %405 : vector<1x256xf32> to vector<3x256xf32>
    %408 = arith.mulf %406, %407 : vector<3x256xf32>
    %409 = arith.addf %402, %408 : vector<3x256xf32>
    %410 = vector.extract_strided_slice %22 {offsets = [0, 13], sizes = [3, 1], strides = [1, 1]} : vector<3x27xf32> to vector<3x1xf32>
    %411 = vector.extract_strided_slice %403 {offsets = [1, 0], sizes = [1, 256], strides = [1, 1]} : vector<3x256xf32> to vector<1x256xf32>
    %412 = vector.broadcast %410 : vector<3x1xf32> to vector<3x256xf32>
    %413 = vector.broadcast %411 : vector<1x256xf32> to vector<3x256xf32>
    %414 = arith.mulf %412, %413 : vector<3x256xf32>
    %415 = arith.addf %409, %414 : vector<3x256xf32>
    %416 = vector.extract_strided_slice %22 {offsets = [0, 22], sizes = [3, 1], strides = [1, 1]} : vector<3x27xf32> to vector<3x1xf32>
    %417 = vector.extract_strided_slice %403 {offsets = [2, 0], sizes = [1, 256], strides = [1, 1]} : vector<3x256xf32> to vector<1x256xf32>
    %418 = vector.broadcast %416 : vector<3x1xf32> to vector<3x256xf32>
    %419 = vector.broadcast %417 : vector<1x256xf32> to vector<3x256xf32>
    %420 = arith.mulf %418, %419 : vector<3x256xf32>
    %421 = arith.addf %415, %420 : vector<3x256xf32>
    %c8_45 = arith.constant 8 : index
    %c0_46 = arith.constant 0 : index
    %422 = vector.load %arg8[%c8_45, %c0_46] : memref<32x256xf32, #tpu.memory_space<vmem>>, vector<3x256xf32>
    %423 = vector.extract_strided_slice %22 {offsets = [0, 5], sizes = [3, 1], strides = [1, 1]} : vector<3x27xf32> to vector<3x1xf32>
    %424 = vector.extract_strided_slice %422 {offsets = [0, 0], sizes = [1, 256], strides = [1, 1]} : vector<3x256xf32> to vector<1x256xf32>
    %425 = vector.broadcast %423 : vector<3x1xf32> to vector<3x256xf32>
    %426 = vector.broadcast %424 : vector<1x256xf32> to vector<3x256xf32>
    %427 = arith.mulf %425, %426 : vector<3x256xf32>
    %428 = arith.addf %421, %427 : vector<3x256xf32>
    %429 = vector.extract_strided_slice %22 {offsets = [0, 14], sizes = [3, 1], strides = [1, 1]} : vector<3x27xf32> to vector<3x1xf32>
    %430 = vector.extract_strided_slice %422 {offsets = [1, 0], sizes = [1, 256], strides = [1, 1]} : vector<3x256xf32> to vector<1x256xf32>
    %431 = vector.broadcast %429 : vector<3x1xf32> to vector<3x256xf32>
    %432 = vector.broadcast %430 : vector<1x256xf32> to vector<3x256xf32>
    %433 = arith.mulf %431, %432 : vector<3x256xf32>
    %434 = arith.addf %428, %433 : vector<3x256xf32>
    %435 = vector.extract_strided_slice %22 {offsets = [0, 23], sizes = [3, 1], strides = [1, 1]} : vector<3x27xf32> to vector<3x1xf32>
    %436 = vector.extract_strided_slice %422 {offsets = [2, 0], sizes = [1, 256], strides = [1, 1]} : vector<3x256xf32> to vector<1x256xf32>
    %437 = vector.broadcast %435 : vector<3x1xf32> to vector<3x256xf32>
    %438 = vector.broadcast %436 : vector<1x256xf32> to vector<3x256xf32>
    %439 = arith.mulf %437, %438 : vector<3x256xf32>
    %440 = arith.addf %434, %439 : vector<3x256xf32>
    %c24_47 = arith.constant 24 : index
    %c0_48 = arith.constant 0 : index
    %441 = vector.load %arg8[%c24_47, %c0_48] : memref<32x256xf32, #tpu.memory_space<vmem>>, vector<3x256xf32>
    %cst_49 = arith.constant 0.000000e+00 : f32
    %442 = vector.broadcast %cst_49 : f32 to vector<3x1xf32>
    %443 = vector.extract_strided_slice %441 {offsets = [0, 0], sizes = [3, 255], strides = [1, 1]} : vector<3x256xf32> to vector<3x255xf32>
    %444 = tpu.concatenate %442, %443 in 1 : vector<3x1xf32>, vector<3x255xf32> -> vector<3x256xf32>
    %cst_50 = arith.constant 0.000000e+00 : f32
    %445 = vector.shape_cast %18 : vector<1x256xi1> to vector<1x256xi1>
    %446 = vector.broadcast %445 : vector<1x256xi1> to vector<3x256xi1>
    %447 = vector.broadcast %cst_50 : f32 to vector<3x256xf32>
    %448 = arith.select %446, %447, %444 : vector<3x256xi1>, vector<3x256xf32>
    %449 = vector.extract_strided_slice %22 {offsets = [0, 6], sizes = [3, 1], strides = [1, 1]} : vector<3x27xf32> to vector<3x1xf32>
    %450 = vector.extract_strided_slice %448 {offsets = [0, 0], sizes = [1, 256], strides = [1, 1]} : vector<3x256xf32> to vector<1x256xf32>
    %451 = vector.broadcast %449 : vector<3x1xf32> to vector<3x256xf32>
    %452 = vector.broadcast %450 : vector<1x256xf32> to vector<3x256xf32>
    %453 = arith.mulf %451, %452 : vector<3x256xf32>
    %454 = arith.addf %440, %453 : vector<3x256xf32>
    %455 = vector.extract_strided_slice %22 {offsets = [0, 15], sizes = [3, 1], strides = [1, 1]} : vector<3x27xf32> to vector<3x1xf32>
    %456 = vector.extract_strided_slice %448 {offsets = [1, 0], sizes = [1, 256], strides = [1, 1]} : vector<3x256xf32> to vector<1x256xf32>
    %457 = vector.broadcast %455 : vector<3x1xf32> to vector<3x256xf32>
    %458 = vector.broadcast %456 : vector<1x256xf32> to vector<3x256xf32>
    %459 = arith.mulf %457, %458 : vector<3x256xf32>
    %460 = arith.addf %454, %459 : vector<3x256xf32>
    %461 = vector.extract_strided_slice %22 {offsets = [0, 24], sizes = [3, 1], strides = [1, 1]} : vector<3x27xf32> to vector<3x1xf32>
    %462 = vector.extract_strided_slice %448 {offsets = [2, 0], sizes = [1, 256], strides = [1, 1]} : vector<3x256xf32> to vector<1x256xf32>
    %463 = vector.broadcast %461 : vector<3x1xf32> to vector<3x256xf32>
    %464 = vector.broadcast %462 : vector<1x256xf32> to vector<3x256xf32>
    %465 = arith.mulf %463, %464 : vector<3x256xf32>
    %466 = arith.addf %460, %465 : vector<3x256xf32>
    %c16_51 = arith.constant 16 : index
    %c0_52 = arith.constant 0 : index
    %467 = vector.load %arg8[%c16_51, %c0_52] : memref<32x256xf32, #tpu.memory_space<vmem>>, vector<3x256xf32>
    %468 = vector.extract_strided_slice %22 {offsets = [0, 7], sizes = [3, 1], strides = [1, 1]} : vector<3x27xf32> to vector<3x1xf32>
    %469 = vector.extract_strided_slice %467 {offsets = [0, 0], sizes = [1, 256], strides = [1, 1]} : vector<3x256xf32> to vector<1x256xf32>
    %470 = vector.broadcast %468 : vector<3x1xf32> to vector<3x256xf32>
    %471 = vector.broadcast %469 : vector<1x256xf32> to vector<3x256xf32>
    %472 = arith.mulf %470, %471 : vector<3x256xf32>
    %473 = arith.addf %466, %472 : vector<3x256xf32>
    %474 = vector.extract_strided_slice %22 {offsets = [0, 16], sizes = [3, 1], strides = [1, 1]} : vector<3x27xf32> to vector<3x1xf32>
    %475 = vector.extract_strided_slice %467 {offsets = [1, 0], sizes = [1, 256], strides = [1, 1]} : vector<3x256xf32> to vector<1x256xf32>
    %476 = vector.broadcast %474 : vector<3x1xf32> to vector<3x256xf32>
    %477 = vector.broadcast %475 : vector<1x256xf32> to vector<3x256xf32>
    %478 = arith.mulf %476, %477 : vector<3x256xf32>
    %479 = arith.addf %473, %478 : vector<3x256xf32>
    %480 = vector.extract_strided_slice %22 {offsets = [0, 25], sizes = [3, 1], strides = [1, 1]} : vector<3x27xf32> to vector<3x1xf32>
    %481 = vector.extract_strided_slice %467 {offsets = [2, 0], sizes = [1, 256], strides = [1, 1]} : vector<3x256xf32> to vector<1x256xf32>
    %482 = vector.broadcast %480 : vector<3x1xf32> to vector<3x256xf32>
    %483 = vector.broadcast %481 : vector<1x256xf32> to vector<3x256xf32>
    %484 = arith.mulf %482, %483 : vector<3x256xf32>
    %485 = arith.addf %479, %484 : vector<3x256xf32>
    %c24_53 = arith.constant 24 : index
    %c0_54 = arith.constant 0 : index
    %486 = vector.load %arg8[%c24_53, %c0_54] : memref<32x256xf32, #tpu.memory_space<vmem>>, vector<3x256xf32>
    %487 = vector.extract_strided_slice %22 {offsets = [0, 8], sizes = [3, 1], strides = [1, 1]} : vector<3x27xf32> to vector<3x1xf32>
    %488 = vector.extract_strided_slice %486 {offsets = [0, 0], sizes = [1, 256], strides = [1, 1]} : vector<3x256xf32> to vector<1x256xf32>
    %489 = vector.broadcast %487 : vector<3x1xf32> to vector<3x256xf32>
    %490 = vector.broadcast %488 : vector<1x256xf32> to vector<3x256xf32>
    %491 = arith.mulf %489, %490 : vector<3x256xf32>
    %492 = arith.addf %485, %491 : vector<3x256xf32>
    %493 = vector.extract_strided_slice %22 {offsets = [0, 17], sizes = [3, 1], strides = [1, 1]} : vector<3x27xf32> to vector<3x1xf32>
    %494 = vector.extract_strided_slice %486 {offsets = [1, 0], sizes = [1, 256], strides = [1, 1]} : vector<3x256xf32> to vector<1x256xf32>
    %495 = vector.broadcast %493 : vector<3x1xf32> to vector<3x256xf32>
    %496 = vector.broadcast %494 : vector<1x256xf32> to vector<3x256xf32>
    %497 = arith.mulf %495, %496 : vector<3x256xf32>
    %498 = arith.addf %492, %497 : vector<3x256xf32>
    %499 = vector.extract_strided_slice %22 {offsets = [0, 26], sizes = [3, 1], strides = [1, 1]} : vector<3x27xf32> to vector<3x1xf32>
    %500 = vector.extract_strided_slice %486 {offsets = [2, 0], sizes = [1, 256], strides = [1, 1]} : vector<3x256xf32> to vector<1x256xf32>
    %501 = vector.broadcast %499 : vector<3x1xf32> to vector<3x256xf32>
    %502 = vector.broadcast %500 : vector<1x256xf32> to vector<3x256xf32>
    %503 = arith.mulf %501, %502 : vector<3x256xf32>
    %504 = arith.addf %498, %503 : vector<3x256xf32>
    %cst_55 = arith.constant 0.000000e+00 : f32
    %505 = vector.broadcast %cst_55 : f32 to vector<3x256xf32>
    %506 = arith.maximumf %504, %505 : vector<3x256xf32>
    %c0_56 = arith.constant 0 : index
    %c0_57 = arith.constant 0 : index
    %c0_58 = arith.constant 0 : index
    %507 = vector.load %arg7[%c0_56, %c0_57, %c0_58] : memref<1x12x256xf32, #tpu.memory_space<vmem>>, vector<1x3x256xf32>
    %508 = vector.shape_cast %507 : vector<1x3x256xf32> to vector<3x256xf32>
    %509 = vector.shape_cast %506 : vector<3x256xf32> to vector<1x3x256xf32>
    tpu.vector_store %arg7[%c0_56, %c0_57, %c0_58], %509 {strides = array<i32>} : memref<1x12x256xf32, #tpu.memory_space<vmem>>, vector<1x3x256xf32>,
    %510 = vector.shape_cast %25 : vector<3x1xf32> to vector<3x1xf32>
    %511 = vector.broadcast %510 : vector<3x1xf32> to vector<3x256xf32>
    %512 = vector.extract_strided_slice %23 {offsets = [0, 1], sizes = [3, 1], strides = [1, 1]} : vector<3x16xf32> to vector<3x1xf32>
    %513 = vector.extract_strided_slice %27 {offsets = [0, 0], sizes = [1, 256], strides = [1, 1]} : vector<4x256xf32> to vector<1x256xf32>
    %514 = vector.broadcast %512 : vector<3x1xf32> to vector<3x256xf32>
    %515 = vector.broadcast %513 : vector<1x256xf32> to vector<3x256xf32>
    %516 = arith.mulf %514, %515 : vector<3x256xf32>
    %517 = arith.addf %511, %516 : vector<3x256xf32>
    %518 = vector.extract_strided_slice %23 {offsets = [0, 5], sizes = [3, 1], strides = [1, 1]} : vector<3x16xf32> to vector<3x1xf32>
    %519 = vector.extract_strided_slice %27 {offsets = [1, 0], sizes = [1, 256], strides = [1, 1]} : vector<4x256xf32> to vector<1x256xf32>
    %520 = vector.broadcast %518 : vector<3x1xf32> to vector<3x256xf32>
    %521 = vector.broadcast %519 : vector<1x256xf32> to vector<3x256xf32>
    %522 = arith.mulf %520, %521 : vector<3x256xf32>
    %523 = arith.addf %517, %522 : vector<3x256xf32>
    %524 = vector.extract_strided_slice %23 {offsets = [0, 9], sizes = [3, 1], strides = [1, 1]} : vector<3x16xf32> to vector<3x1xf32>
    %525 = vector.extract_strided_slice %27 {offsets = [2, 0], sizes = [1, 256], strides = [1, 1]} : vector<4x256xf32> to vector<1x256xf32>
    %526 = vector.broadcast %524 : vector<3x1xf32> to vector<3x256xf32>
    %527 = vector.broadcast %525 : vector<1x256xf32> to vector<3x256xf32>
    %528 = arith.mulf %526, %527 : vector<3x256xf32>
    %529 = arith.addf %523, %528 : vector<3x256xf32>
    %530 = vector.extract_strided_slice %23 {offsets = [0, 13], sizes = [3, 1], strides = [1, 1]} : vector<3x16xf32> to vector<3x1xf32>
    %531 = vector.extract_strided_slice %27 {offsets = [3, 0], sizes = [1, 256], strides = [1, 1]} : vector<4x256xf32> to vector<1x256xf32>
    %532 = vector.broadcast %530 : vector<3x1xf32> to vector<3x256xf32>
    %533 = vector.broadcast %531 : vector<1x256xf32> to vector<3x256xf32>
    %534 = arith.mulf %532, %533 : vector<3x256xf32>
    %535 = arith.addf %529, %534 : vector<3x256xf32>
    %c16_59 = arith.constant 16 : index
    %c0_60 = arith.constant 0 : index
    %536 = vector.load %arg8[%c16_59, %c0_60] : memref<32x256xf32, #tpu.memory_space<vmem>>, vector<3x256xf32>
    %cst_61 = arith.constant 0.000000e+00 : f32
    %537 = vector.broadcast %cst_61 : f32 to vector<3x16xf32>
    %538 = vector.extract_strided_slice %536 {offsets = [0, 0], sizes = [3, 240], strides = [1, 1]} : vector<3x256xf32> to vector<3x240xf32>
    %539 = tpu.concatenate %537, %538 in 1 : vector<3x16xf32>, vector<3x240xf32> -> vector<3x256xf32>
    %540 = vector.extract_strided_slice %22 {offsets = [0, 0], sizes = [3, 1], strides = [1, 1]} : vector<3x27xf32> to vector<3x1xf32>
    %541 = vector.extract_strided_slice %539 {offsets = [0, 0], sizes = [1, 256], strides = [1, 1]} : vector<3x256xf32> to vector<1x256xf32>
    %542 = vector.broadcast %540 : vector<3x1xf32> to vector<3x256xf32>
    %543 = vector.broadcast %541 : vector<1x256xf32> to vector<3x256xf32>
    %544 = arith.mulf %542, %543 : vector<3x256xf32>
    %545 = arith.addf %535, %544 : vector<3x256xf32>
    %546 = vector.extract_strided_slice %22 {offsets = [0, 9], sizes = [3, 1], strides = [1, 1]} : vector<3x27xf32> to vector<3x1xf32>
    %547 = vector.extract_strided_slice %539 {offsets = [1, 0], sizes = [1, 256], strides = [1, 1]} : vector<3x256xf32> to vector<1x256xf32>
    %548 = vector.broadcast %546 : vector<3x1xf32> to vector<3x256xf32>
    %549 = vector.broadcast %547 : vector<1x256xf32> to vector<3x256xf32>
    %550 = arith.mulf %548, %549 : vector<3x256xf32>
    %551 = arith.addf %545, %550 : vector<3x256xf32>
    %552 = vector.extract_strided_slice %22 {offsets = [0, 18], sizes = [3, 1], strides = [1, 1]} : vector<3x27xf32> to vector<3x1xf32>
    %553 = vector.extract_strided_slice %539 {offsets = [2, 0], sizes = [1, 256], strides = [1, 1]} : vector<3x256xf32> to vector<1x256xf32>
    %554 = vector.broadcast %552 : vector<3x1xf32> to vector<3x256xf32>
    %555 = vector.broadcast %553 : vector<1x256xf32> to vector<3x256xf32>
    %556 = arith.mulf %554, %555 : vector<3x256xf32>
    %557 = arith.addf %551, %556 : vector<3x256xf32>
    %c24_62 = arith.constant 24 : index
    %c0_63 = arith.constant 0 : index
    %558 = vector.load %arg8[%c24_62, %c0_63] : memref<32x256xf32, #tpu.memory_space<vmem>>, vector<3x256xf32>
    %cst_64 = arith.constant 0.000000e+00 : f32
    %559 = vector.broadcast %cst_64 : f32 to vector<3x16xf32>
    %560 = vector.extract_strided_slice %558 {offsets = [0, 0], sizes = [3, 240], strides = [1, 1]} : vector<3x256xf32> to vector<3x240xf32>
    %561 = tpu.concatenate %559, %560 in 1 : vector<3x16xf32>, vector<3x240xf32> -> vector<3x256xf32>
    %562 = vector.extract_strided_slice %22 {offsets = [0, 1], sizes = [3, 1], strides = [1, 1]} : vector<3x27xf32> to vector<3x1xf32>
    %563 = vector.extract_strided_slice %561 {offsets = [0, 0], sizes = [1, 256], strides = [1, 1]} : vector<3x256xf32> to vector<1x256xf32>
    %564 = vector.broadcast %562 : vector<3x1xf32> to vector<3x256xf32>
    %565 = vector.broadcast %563 : vector<1x256xf32> to vector<3x256xf32>
    %566 = arith.mulf %564, %565 : vector<3x256xf32>
    %567 = arith.addf %557, %566 : vector<3x256xf32>
    %568 = vector.extract_strided_slice %22 {offsets = [0, 10], sizes = [3, 1], strides = [1, 1]} : vector<3x27xf32> to vector<3x1xf32>
    %569 = vector.extract_strided_slice %561 {offsets = [1, 0], sizes = [1, 256], strides = [1, 1]} : vector<3x256xf32> to vector<1x256xf32>
    %570 = vector.broadcast %568 : vector<3x1xf32> to vector<3x256xf32>
    %571 = vector.broadcast %569 : vector<1x256xf32> to vector<3x256xf32>
    %572 = arith.mulf %570, %571 : vector<3x256xf32>
    %573 = arith.addf %567, %572 : vector<3x256xf32>
    %574 = vector.extract_strided_slice %22 {offsets = [0, 19], sizes = [3, 1], strides = [1, 1]} : vector<3x27xf32> to vector<3x1xf32>
    %575 = vector.extract_strided_slice %561 {offsets = [2, 0], sizes = [1, 256], strides = [1, 1]} : vector<3x256xf32> to vector<1x256xf32>
    %576 = vector.broadcast %574 : vector<3x1xf32> to vector<3x256xf32>
    %577 = vector.broadcast %575 : vector<1x256xf32> to vector<3x256xf32>
    %578 = arith.mulf %576, %577 : vector<3x256xf32>
    %579 = arith.addf %573, %578 : vector<3x256xf32>
    %c16_65 = arith.constant 16 : index
    %c0_66 = arith.constant 0 : index
    %580 = vector.load %arg8[%c16_65, %c0_66] : memref<32x256xf32, #tpu.memory_space<vmem>>, vector<3x256xf32>
    %cst_67 = arith.constant 0.000000e+00 : f32
    %581 = vector.broadcast %cst_67 : f32 to vector<3x15xf32>
    %582 = vector.extract_strided_slice %580 {offsets = [0, 0], sizes = [3, 241], strides = [1, 1]} : vector<3x256xf32> to vector<3x241xf32>
    %583 = tpu.concatenate %581, %582 in 1 : vector<3x15xf32>, vector<3x241xf32> -> vector<3x256xf32>
    %cst_68 = arith.constant 0.000000e+00 : f32
    %584 = vector.shape_cast %20 : vector<1x256xi1> to vector<1x256xi1>
    %585 = vector.broadcast %584 : vector<1x256xi1> to vector<3x256xi1>
    %586 = vector.broadcast %cst_68 : f32 to vector<3x256xf32>
    %587 = arith.select %585, %586, %583 : vector<3x256xi1>, vector<3x256xf32>
    %588 = vector.extract_strided_slice %22 {offsets = [0, 2], sizes = [3, 1], strides = [1, 1]} : vector<3x27xf32> to vector<3x1xf32>
    %589 = vector.extract_strided_slice %587 {offsets = [0, 0], sizes = [1, 256], strides = [1, 1]} : vector<3x256xf32> to vector<1x256xf32>
    %590 = vector.broadcast %588 : vector<3x1xf32> to vector<3x256xf32>
    %591 = vector.broadcast %589 : vector<1x256xf32> to vector<3x256xf32>
    %592 = arith.mulf %590, %591 : vector<3x256xf32>
    %593 = arith.addf %579, %592 : vector<3x256xf32>
    %594 = vector.extract_strided_slice %22 {offsets = [0, 11], sizes = [3, 1], strides = [1, 1]} : vector<3x27xf32> to vector<3x1xf32>
    %595 = vector.extract_strided_slice %587 {offsets = [1, 0], sizes = [1, 256], strides = [1, 1]} : vector<3x256xf32> to vector<1x256xf32>
    %596 = vector.broadcast %594 : vector<3x1xf32> to vector<3x256xf32>
    %597 = vector.broadcast %595 : vector<1x256xf32> to vector<3x256xf32>
    %598 = arith.mulf %596, %597 : vector<3x256xf32>
    %599 = arith.addf %593, %598 : vector<3x256xf32>
    %600 = vector.extract_strided_slice %22 {offsets = [0, 20], sizes = [3, 1], strides = [1, 1]} : vector<3x27xf32> to vector<3x1xf32>
    %601 = vector.extract_strided_slice %587 {offsets = [2, 0], sizes = [1, 256], strides = [1, 1]} : vector<3x256xf32> to vector<1x256xf32>
    %602 = vector.broadcast %600 : vector<3x1xf32> to vector<3x256xf32>
    %603 = vector.broadcast %601 : vector<1x256xf32> to vector<3x256xf32>
    %604 = arith.mulf %602, %603 : vector<3x256xf32>
    %605 = arith.addf %599, %604 : vector<3x256xf32>
    %c0_69 = arith.constant 0 : index
    %c0_70 = arith.constant 0 : index
    %606 = vector.load %arg8[%c0_69, %c0_70] : memref<32x256xf32, #tpu.memory_space<vmem>>, vector<3x256xf32>
    %607 = vector.extract_strided_slice %22 {offsets = [0, 3], sizes = [3, 1], strides = [1, 1]} : vector<3x27xf32> to vector<3x1xf32>
    %608 = vector.extract_strided_slice %606 {offsets = [0, 0], sizes = [1, 256], strides = [1, 1]} : vector<3x256xf32> to vector<1x256xf32>
    %609 = vector.broadcast %607 : vector<3x1xf32> to vector<3x256xf32>
    %610 = vector.broadcast %608 : vector<1x256xf32> to vector<3x256xf32>
    %611 = arith.mulf %609, %610 : vector<3x256xf32>
    %612 = arith.addf %605, %611 : vector<3x256xf32>
    %613 = vector.extract_strided_slice %22 {offsets = [0, 12], sizes = [3, 1], strides = [1, 1]} : vector<3x27xf32> to vector<3x1xf32>
    %614 = vector.extract_strided_slice %606 {offsets = [1, 0], sizes = [1, 256], strides = [1, 1]} : vector<3x256xf32> to vector<1x256xf32>
    %615 = vector.broadcast %613 : vector<3x1xf32> to vector<3x256xf32>
    %616 = vector.broadcast %614 : vector<1x256xf32> to vector<3x256xf32>
    %617 = arith.mulf %615, %616 : vector<3x256xf32>
    %618 = arith.addf %612, %617 : vector<3x256xf32>
    %619 = vector.extract_strided_slice %22 {offsets = [0, 21], sizes = [3, 1], strides = [1, 1]} : vector<3x27xf32> to vector<3x1xf32>
    %620 = vector.extract_strided_slice %606 {offsets = [2, 0], sizes = [1, 256], strides = [1, 1]} : vector<3x256xf32> to vector<1x256xf32>
    %621 = vector.broadcast %619 : vector<3x1xf32> to vector<3x256xf32>
    %622 = vector.broadcast %620 : vector<1x256xf32> to vector<3x256xf32>
    %623 = arith.mulf %621, %622 : vector<3x256xf32>
    %624 = arith.addf %618, %623 : vector<3x256xf32>
    %c8_71 = arith.constant 8 : index
    %c0_72 = arith.constant 0 : index
    %625 = vector.load %arg8[%c8_71, %c0_72] : memref<32x256xf32, #tpu.memory_space<vmem>>, vector<3x256xf32>
    %626 = vector.extract_strided_slice %22 {offsets = [0, 4], sizes = [3, 1], strides = [1, 1]} : vector<3x27xf32> to vector<3x1xf32>
    %627 = vector.extract_strided_slice %625 {offsets = [0, 0], sizes = [1, 256], strides = [1, 1]} : vector<3x256xf32> to vector<1x256xf32>
    %628 = vector.broadcast %626 : vector<3x1xf32> to vector<3x256xf32>
    %629 = vector.broadcast %627 : vector<1x256xf32> to vector<3x256xf32>
    %630 = arith.mulf %628, %629 : vector<3x256xf32>
    %631 = arith.addf %624, %630 : vector<3x256xf32>
    %632 = vector.extract_strided_slice %22 {offsets = [0, 13], sizes = [3, 1], strides = [1, 1]} : vector<3x27xf32> to vector<3x1xf32>
    %633 = vector.extract_strided_slice %625 {offsets = [1, 0], sizes = [1, 256], strides = [1, 1]} : vector<3x256xf32> to vector<1x256xf32>
    %634 = vector.broadcast %632 : vector<3x1xf32> to vector<3x256xf32>
    %635 = vector.broadcast %633 : vector<1x256xf32> to vector<3x256xf32>
    %636 = arith.mulf %634, %635 : vector<3x256xf32>
    %637 = arith.addf %631, %636 : vector<3x256xf32>
    %638 = vector.extract_strided_slice %22 {offsets = [0, 22], sizes = [3, 1], strides = [1, 1]} : vector<3x27xf32> to vector<3x1xf32>
    %639 = vector.extract_strided_slice %625 {offsets = [2, 0], sizes = [1, 256], strides = [1, 1]} : vector<3x256xf32> to vector<1x256xf32>
    %640 = vector.broadcast %638 : vector<3x1xf32> to vector<3x256xf32>
    %641 = vector.broadcast %639 : vector<1x256xf32> to vector<3x256xf32>
    %642 = arith.mulf %640, %641 : vector<3x256xf32>
    %643 = arith.addf %637, %642 : vector<3x256xf32>
    %c0_73 = arith.constant 0 : index
    %c0_74 = arith.constant 0 : index
    %644 = vector.load %arg8[%c0_73, %c0_74] : memref<32x256xf32, #tpu.memory_space<vmem>>, vector<3x256xf32>
    %cst_75 = arith.constant 0.000000e+00 : f32
    %645 = vector.broadcast %cst_75 : f32 to vector<3x1xf32>
    %646 = vector.extract_strided_slice %644 {offsets = [0, 1], sizes = [3, 255], strides = [1, 1]} : vector<3x256xf32> to vector<3x255xf32>
    %647 = tpu.concatenate %646, %645 in 1 : vector<3x255xf32>, vector<3x1xf32> -> vector<3x256xf32>
    %cst_76 = arith.constant 0.000000e+00 : f32
    %648 = vector.shape_cast %20 : vector<1x256xi1> to vector<1x256xi1>
    %649 = vector.broadcast %648 : vector<1x256xi1> to vector<3x256xi1>
    %650 = vector.broadcast %cst_76 : f32 to vector<3x256xf32>
    %651 = arith.select %649, %650, %647 : vector<3x256xi1>, vector<3x256xf32>
    %652 = vector.extract_strided_slice %22 {offsets = [0, 5], sizes = [3, 1], strides = [1, 1]} : vector<3x27xf32> to vector<3x1xf32>
    %653 = vector.extract_strided_slice %651 {offsets = [0, 0], sizes = [1, 256], strides = [1, 1]} : vector<3x256xf32> to vector<1x256xf32>
    %654 = vector.broadcast %652 : vector<3x1xf32> to vector<3x256xf32>
    %655 = vector.broadcast %653 : vector<1x256xf32> to vector<3x256xf32>
    %656 = arith.mulf %654, %655 : vector<3x256xf32>
    %657 = arith.addf %643, %656 : vector<3x256xf32>
    %658 = vector.extract_strided_slice %22 {offsets = [0, 14], sizes = [3, 1], strides = [1, 1]} : vector<3x27xf32> to vector<3x1xf32>
    %659 = vector.extract_strided_slice %651 {offsets = [1, 0], sizes = [1, 256], strides = [1, 1]} : vector<3x256xf32> to vector<1x256xf32>
    %660 = vector.broadcast %658 : vector<3x1xf32> to vector<3x256xf32>
    %661 = vector.broadcast %659 : vector<1x256xf32> to vector<3x256xf32>
    %662 = arith.mulf %660, %661 : vector<3x256xf32>
    %663 = arith.addf %657, %662 : vector<3x256xf32>
    %664 = vector.extract_strided_slice %22 {offsets = [0, 23], sizes = [3, 1], strides = [1, 1]} : vector<3x27xf32> to vector<3x1xf32>
    %665 = vector.extract_strided_slice %651 {offsets = [2, 0], sizes = [1, 256], strides = [1, 1]} : vector<3x256xf32> to vector<1x256xf32>
    %666 = vector.broadcast %664 : vector<3x1xf32> to vector<3x256xf32>
    %667 = vector.broadcast %665 : vector<1x256xf32> to vector<3x256xf32>
    %668 = arith.mulf %666, %667 : vector<3x256xf32>
    %669 = arith.addf %663, %668 : vector<3x256xf32>
    %c16_77 = arith.constant 16 : index
    %c0_78 = arith.constant 0 : index
    %670 = vector.load %arg8[%c16_77, %c0_78] : memref<32x256xf32, #tpu.memory_space<vmem>>, vector<3x256xf32>
    %671 = vector.extract_strided_slice %22 {offsets = [0, 6], sizes = [3, 1], strides = [1, 1]} : vector<3x27xf32> to vector<3x1xf32>
    %672 = vector.extract_strided_slice %670 {offsets = [0, 0], sizes = [1, 256], strides = [1, 1]} : vector<3x256xf32> to vector<1x256xf32>
    %673 = vector.broadcast %671 : vector<3x1xf32> to vector<3x256xf32>
    %674 = vector.broadcast %672 : vector<1x256xf32> to vector<3x256xf32>
    %675 = arith.mulf %673, %674 : vector<3x256xf32>
    %676 = arith.addf %669, %675 : vector<3x256xf32>
    %677 = vector.extract_strided_slice %22 {offsets = [0, 15], sizes = [3, 1], strides = [1, 1]} : vector<3x27xf32> to vector<3x1xf32>
    %678 = vector.extract_strided_slice %670 {offsets = [1, 0], sizes = [1, 256], strides = [1, 1]} : vector<3x256xf32> to vector<1x256xf32>
    %679 = vector.broadcast %677 : vector<3x1xf32> to vector<3x256xf32>
    %680 = vector.broadcast %678 : vector<1x256xf32> to vector<3x256xf32>
    %681 = arith.mulf %679, %680 : vector<3x256xf32>
    %682 = arith.addf %676, %681 : vector<3x256xf32>
    %683 = vector.extract_strided_slice %22 {offsets = [0, 24], sizes = [3, 1], strides = [1, 1]} : vector<3x27xf32> to vector<3x1xf32>
    %684 = vector.extract_strided_slice %670 {offsets = [2, 0], sizes = [1, 256], strides = [1, 1]} : vector<3x256xf32> to vector<1x256xf32>
    %685 = vector.broadcast %683 : vector<3x1xf32> to vector<3x256xf32>
    %686 = vector.broadcast %684 : vector<1x256xf32> to vector<3x256xf32>
    %687 = arith.mulf %685, %686 : vector<3x256xf32>
    %688 = arith.addf %682, %687 : vector<3x256xf32>
    %c24_79 = arith.constant 24 : index
    %c0_80 = arith.constant 0 : index
    %689 = vector.load %arg8[%c24_79, %c0_80] : memref<32x256xf32, #tpu.memory_space<vmem>>, vector<3x256xf32>
    %690 = vector.extract_strided_slice %22 {offsets = [0, 7], sizes = [3, 1], strides = [1, 1]} : vector<3x27xf32> to vector<3x1xf32>
    %691 = vector.extract_strided_slice %689 {offsets = [0, 0], sizes = [1, 256], strides = [1, 1]} : vector<3x256xf32> to vector<1x256xf32>
    %692 = vector.broadcast %690 : vector<3x1xf32> to vector<3x256xf32>
    %693 = vector.broadcast %691 : vector<1x256xf32> to vector<3x256xf32>
    %694 = arith.mulf %692, %693 : vector<3x256xf32>
    %695 = arith.addf %688, %694 : vector<3x256xf32>
    %696 = vector.extract_strided_slice %22 {offsets = [0, 16], sizes = [3, 1], strides = [1, 1]} : vector<3x27xf32> to vector<3x1xf32>
    %697 = vector.extract_strided_slice %689 {offsets = [1, 0], sizes = [1, 256], strides = [1, 1]} : vector<3x256xf32> to vector<1x256xf32>
    %698 = vector.broadcast %696 : vector<3x1xf32> to vector<3x256xf32>
    %699 = vector.broadcast %697 : vector<1x256xf32> to vector<3x256xf32>
    %700 = arith.mulf %698, %699 : vector<3x256xf32>
    %701 = arith.addf %695, %700 : vector<3x256xf32>
    %702 = vector.extract_strided_slice %22 {offsets = [0, 25], sizes = [3, 1], strides = [1, 1]} : vector<3x27xf32> to vector<3x1xf32>
    %703 = vector.extract_strided_slice %689 {offsets = [2, 0], sizes = [1, 256], strides = [1, 1]} : vector<3x256xf32> to vector<1x256xf32>
    %704 = vector.broadcast %702 : vector<3x1xf32> to vector<3x256xf32>
    %705 = vector.broadcast %703 : vector<1x256xf32> to vector<3x256xf32>
    %706 = arith.mulf %704, %705 : vector<3x256xf32>
    %707 = arith.addf %701, %706 : vector<3x256xf32>
    %c16_81 = arith.constant 16 : index
    %c0_82 = arith.constant 0 : index
    %708 = vector.load %arg8[%c16_81, %c0_82] : memref<32x256xf32, #tpu.memory_space<vmem>>, vector<3x256xf32>
    %cst_83 = arith.constant 0.000000e+00 : f32
    %709 = vector.broadcast %cst_83 : f32 to vector<3x1xf32>
    %710 = vector.extract_strided_slice %708 {offsets = [0, 1], sizes = [3, 255], strides = [1, 1]} : vector<3x256xf32> to vector<3x255xf32>
    %711 = tpu.concatenate %710, %709 in 1 : vector<3x255xf32>, vector<3x1xf32> -> vector<3x256xf32>
    %cst_84 = arith.constant 0.000000e+00 : f32
    %712 = vector.shape_cast %20 : vector<1x256xi1> to vector<1x256xi1>
    %713 = vector.broadcast %712 : vector<1x256xi1> to vector<3x256xi1>
    %714 = vector.broadcast %cst_84 : f32 to vector<3x256xf32>
    %715 = arith.select %713, %714, %711 : vector<3x256xi1>, vector<3x256xf32>
    %716 = vector.extract_strided_slice %22 {offsets = [0, 8], sizes = [3, 1], strides = [1, 1]} : vector<3x27xf32> to vector<3x1xf32>
    %717 = vector.extract_strided_slice %715 {offsets = [0, 0], sizes = [1, 256], strides = [1, 1]} : vector<3x256xf32> to vector<1x256xf32>
    %718 = vector.broadcast %716 : vector<3x1xf32> to vector<3x256xf32>
    %719 = vector.broadcast %717 : vector<1x256xf32> to vector<3x256xf32>
    %720 = arith.mulf %718, %719 : vector<3x256xf32>
    %721 = arith.addf %707, %720 : vector<3x256xf32>
    %722 = vector.extract_strided_slice %22 {offsets = [0, 17], sizes = [3, 1], strides = [1, 1]} : vector<3x27xf32> to vector<3x1xf32>
    %723 = vector.extract_strided_slice %715 {offsets = [1, 0], sizes = [1, 256], strides = [1, 1]} : vector<3x256xf32> to vector<1x256xf32>
    %724 = vector.broadcast %722 : vector<3x1xf32> to vector<3x256xf32>
    %725 = vector.broadcast %723 : vector<1x256xf32> to vector<3x256xf32>
    %726 = arith.mulf %724, %725 : vector<3x256xf32>
    %727 = arith.addf %721, %726 : vector<3x256xf32>
    %728 = vector.extract_strided_slice %22 {offsets = [0, 26], sizes = [3, 1], strides = [1, 1]} : vector<3x27xf32> to vector<3x1xf32>
    %729 = vector.extract_strided_slice %715 {offsets = [2, 0], sizes = [1, 256], strides = [1, 1]} : vector<3x256xf32> to vector<1x256xf32>
    %730 = vector.broadcast %728 : vector<3x1xf32> to vector<3x256xf32>
    %731 = vector.broadcast %729 : vector<1x256xf32> to vector<3x256xf32>
    %732 = arith.mulf %730, %731 : vector<3x256xf32>
    %733 = arith.addf %727, %732 : vector<3x256xf32>
    %cst_85 = arith.constant 0.000000e+00 : f32
    %734 = vector.broadcast %cst_85 : f32 to vector<3x256xf32>
    %735 = arith.maximumf %733, %734 : vector<3x256xf32>
    %c0_86 = arith.constant 0 : index
    %c3 = arith.constant 3 : index
    %c0_87 = arith.constant 0 : index
    %736 = vector.load %arg7[%c0_86, %c3, %c0_87] : memref<1x12x256xf32, #tpu.memory_space<vmem>>, vector<1x3x256xf32>
    %737 = vector.shape_cast %736 : vector<1x3x256xf32> to vector<3x256xf32>
    %738 = vector.shape_cast %735 : vector<3x256xf32> to vector<1x3x256xf32>
    tpu.vector_store %arg7[%c0_86, %c3, %c0_87], %738 {strides = array<i32>} : memref<1x12x256xf32, #tpu.memory_space<vmem>>, vector<1x3x256xf32>,
    %739 = vector.shape_cast %25 : vector<3x1xf32> to vector<3x1xf32>
    %740 = vector.broadcast %739 : vector<3x1xf32> to vector<3x256xf32>
    %741 = vector.extract_strided_slice %23 {offsets = [0, 2], sizes = [3, 1], strides = [1, 1]} : vector<3x16xf32> to vector<3x1xf32>
    %742 = vector.extract_strided_slice %27 {offsets = [0, 0], sizes = [1, 256], strides = [1, 1]} : vector<4x256xf32> to vector<1x256xf32>
    %743 = vector.broadcast %741 : vector<3x1xf32> to vector<3x256xf32>
    %744 = vector.broadcast %742 : vector<1x256xf32> to vector<3x256xf32>
    %745 = arith.mulf %743, %744 : vector<3x256xf32>
    %746 = arith.addf %740, %745 : vector<3x256xf32>
    %747 = vector.extract_strided_slice %23 {offsets = [0, 6], sizes = [3, 1], strides = [1, 1]} : vector<3x16xf32> to vector<3x1xf32>
    %748 = vector.extract_strided_slice %27 {offsets = [1, 0], sizes = [1, 256], strides = [1, 1]} : vector<4x256xf32> to vector<1x256xf32>
    %749 = vector.broadcast %747 : vector<3x1xf32> to vector<3x256xf32>
    %750 = vector.broadcast %748 : vector<1x256xf32> to vector<3x256xf32>
    %751 = arith.mulf %749, %750 : vector<3x256xf32>
    %752 = arith.addf %746, %751 : vector<3x256xf32>
    %753 = vector.extract_strided_slice %23 {offsets = [0, 10], sizes = [3, 1], strides = [1, 1]} : vector<3x16xf32> to vector<3x1xf32>
    %754 = vector.extract_strided_slice %27 {offsets = [2, 0], sizes = [1, 256], strides = [1, 1]} : vector<4x256xf32> to vector<1x256xf32>
    %755 = vector.broadcast %753 : vector<3x1xf32> to vector<3x256xf32>
    %756 = vector.broadcast %754 : vector<1x256xf32> to vector<3x256xf32>
    %757 = arith.mulf %755, %756 : vector<3x256xf32>
    %758 = arith.addf %752, %757 : vector<3x256xf32>
    %759 = vector.extract_strided_slice %23 {offsets = [0, 14], sizes = [3, 1], strides = [1, 1]} : vector<3x16xf32> to vector<3x1xf32>
    %760 = vector.extract_strided_slice %27 {offsets = [3, 0], sizes = [1, 256], strides = [1, 1]} : vector<4x256xf32> to vector<1x256xf32>
    %761 = vector.broadcast %759 : vector<3x1xf32> to vector<3x256xf32>
    %762 = vector.broadcast %760 : vector<1x256xf32> to vector<3x256xf32>
    %763 = arith.mulf %761, %762 : vector<3x256xf32>
    %764 = arith.addf %758, %763 : vector<3x256xf32>
    %c8_88 = arith.constant 8 : index
    %c0_89 = arith.constant 0 : index
    %765 = vector.load %arg8[%c8_88, %c0_89] : memref<32x256xf32, #tpu.memory_space<vmem>>, vector<3x256xf32>
    %cst_90 = arith.constant 0.000000e+00 : f32
    %766 = vector.broadcast %cst_90 : f32 to vector<3x1xf32>
    %767 = vector.extract_strided_slice %765 {offsets = [0, 0], sizes = [3, 255], strides = [1, 1]} : vector<3x256xf32> to vector<3x255xf32>
    %768 = tpu.concatenate %766, %767 in 1 : vector<3x1xf32>, vector<3x255xf32> -> vector<3x256xf32>
    %cst_91 = arith.constant 0.000000e+00 : f32
    %769 = vector.shape_cast %18 : vector<1x256xi1> to vector<1x256xi1>
    %770 = vector.broadcast %769 : vector<1x256xi1> to vector<3x256xi1>
    %771 = vector.broadcast %cst_91 : f32 to vector<3x256xf32>
    %772 = arith.select %770, %771, %768 : vector<3x256xi1>, vector<3x256xf32>
    %773 = vector.extract_strided_slice %22 {offsets = [0, 0], sizes = [3, 1], strides = [1, 1]} : vector<3x27xf32> to vector<3x1xf32>
    %774 = vector.extract_strided_slice %772 {offsets = [0, 0], sizes = [1, 256], strides = [1, 1]} : vector<3x256xf32> to vector<1x256xf32>
    %775 = vector.broadcast %773 : vector<3x1xf32> to vector<3x256xf32>
    %776 = vector.broadcast %774 : vector<1x256xf32> to vector<3x256xf32>
    %777 = arith.mulf %775, %776 : vector<3x256xf32>
    %778 = arith.addf %764, %777 : vector<3x256xf32>
    %779 = vector.extract_strided_slice %22 {offsets = [0, 9], sizes = [3, 1], strides = [1, 1]} : vector<3x27xf32> to vector<3x1xf32>
    %780 = vector.extract_strided_slice %772 {offsets = [1, 0], sizes = [1, 256], strides = [1, 1]} : vector<3x256xf32> to vector<1x256xf32>
    %781 = vector.broadcast %779 : vector<3x1xf32> to vector<3x256xf32>
    %782 = vector.broadcast %780 : vector<1x256xf32> to vector<3x256xf32>
    %783 = arith.mulf %781, %782 : vector<3x256xf32>
    %784 = arith.addf %778, %783 : vector<3x256xf32>
    %785 = vector.extract_strided_slice %22 {offsets = [0, 18], sizes = [3, 1], strides = [1, 1]} : vector<3x27xf32> to vector<3x1xf32>
    %786 = vector.extract_strided_slice %772 {offsets = [2, 0], sizes = [1, 256], strides = [1, 1]} : vector<3x256xf32> to vector<1x256xf32>
    %787 = vector.broadcast %785 : vector<3x1xf32> to vector<3x256xf32>
    %788 = vector.broadcast %786 : vector<1x256xf32> to vector<3x256xf32>
    %789 = arith.mulf %787, %788 : vector<3x256xf32>
    %790 = arith.addf %784, %789 : vector<3x256xf32>
    %c0_92 = arith.constant 0 : index
    %c0_93 = arith.constant 0 : index
    %791 = vector.load %arg8[%c0_92, %c0_93] : memref<32x256xf32, #tpu.memory_space<vmem>>, vector<3x256xf32>
    %792 = vector.extract_strided_slice %22 {offsets = [0, 1], sizes = [3, 1], strides = [1, 1]} : vector<3x27xf32> to vector<3x1xf32>
    %793 = vector.extract_strided_slice %791 {offsets = [0, 0], sizes = [1, 256], strides = [1, 1]} : vector<3x256xf32> to vector<1x256xf32>
    %794 = vector.broadcast %792 : vector<3x1xf32> to vector<3x256xf32>
    %795 = vector.broadcast %793 : vector<1x256xf32> to vector<3x256xf32>
    %796 = arith.mulf %794, %795 : vector<3x256xf32>
    %797 = arith.addf %790, %796 : vector<3x256xf32>
    %798 = vector.extract_strided_slice %22 {offsets = [0, 10], sizes = [3, 1], strides = [1, 1]} : vector<3x27xf32> to vector<3x1xf32>
    %799 = vector.extract_strided_slice %791 {offsets = [1, 0], sizes = [1, 256], strides = [1, 1]} : vector<3x256xf32> to vector<1x256xf32>
    %800 = vector.broadcast %798 : vector<3x1xf32> to vector<3x256xf32>
    %801 = vector.broadcast %799 : vector<1x256xf32> to vector<3x256xf32>
    %802 = arith.mulf %800, %801 : vector<3x256xf32>
    %803 = arith.addf %797, %802 : vector<3x256xf32>
    %804 = vector.extract_strided_slice %22 {offsets = [0, 19], sizes = [3, 1], strides = [1, 1]} : vector<3x27xf32> to vector<3x1xf32>
    %805 = vector.extract_strided_slice %791 {offsets = [2, 0], sizes = [1, 256], strides = [1, 1]} : vector<3x256xf32> to vector<1x256xf32>
    %806 = vector.broadcast %804 : vector<3x1xf32> to vector<3x256xf32>
    %807 = vector.broadcast %805 : vector<1x256xf32> to vector<3x256xf32>
    %808 = arith.mulf %806, %807 : vector<3x256xf32>
    %809 = arith.addf %803, %808 : vector<3x256xf32>
    %c8_94 = arith.constant 8 : index
    %c0_95 = arith.constant 0 : index
    %810 = vector.load %arg8[%c8_94, %c0_95] : memref<32x256xf32, #tpu.memory_space<vmem>>, vector<3x256xf32>
    %811 = vector.extract_strided_slice %22 {offsets = [0, 2], sizes = [3, 1], strides = [1, 1]} : vector<3x27xf32> to vector<3x1xf32>
    %812 = vector.extract_strided_slice %810 {offsets = [0, 0], sizes = [1, 256], strides = [1, 1]} : vector<3x256xf32> to vector<1x256xf32>
    %813 = vector.broadcast %811 : vector<3x1xf32> to vector<3x256xf32>
    %814 = vector.broadcast %812 : vector<1x256xf32> to vector<3x256xf32>
    %815 = arith.mulf %813, %814 : vector<3x256xf32>
    %816 = arith.addf %809, %815 : vector<3x256xf32>
    %817 = vector.extract_strided_slice %22 {offsets = [0, 11], sizes = [3, 1], strides = [1, 1]} : vector<3x27xf32> to vector<3x1xf32>
    %818 = vector.extract_strided_slice %810 {offsets = [1, 0], sizes = [1, 256], strides = [1, 1]} : vector<3x256xf32> to vector<1x256xf32>
    %819 = vector.broadcast %817 : vector<3x1xf32> to vector<3x256xf32>
    %820 = vector.broadcast %818 : vector<1x256xf32> to vector<3x256xf32>
    %821 = arith.mulf %819, %820 : vector<3x256xf32>
    %822 = arith.addf %816, %821 : vector<3x256xf32>
    %823 = vector.extract_strided_slice %22 {offsets = [0, 20], sizes = [3, 1], strides = [1, 1]} : vector<3x27xf32> to vector<3x1xf32>
    %824 = vector.extract_strided_slice %810 {offsets = [2, 0], sizes = [1, 256], strides = [1, 1]} : vector<3x256xf32> to vector<1x256xf32>
    %825 = vector.broadcast %823 : vector<3x1xf32> to vector<3x256xf32>
    %826 = vector.broadcast %824 : vector<1x256xf32> to vector<3x256xf32>
    %827 = arith.mulf %825, %826 : vector<3x256xf32>
    %828 = arith.addf %822, %827 : vector<3x256xf32>
    %c24_96 = arith.constant 24 : index
    %c0_97 = arith.constant 0 : index
    %829 = vector.load %arg8[%c24_96, %c0_97] : memref<32x256xf32, #tpu.memory_space<vmem>>, vector<3x256xf32>
    %cst_98 = arith.constant 0.000000e+00 : f32
    %830 = vector.broadcast %cst_98 : f32 to vector<3x1xf32>
    %831 = vector.extract_strided_slice %829 {offsets = [0, 0], sizes = [3, 255], strides = [1, 1]} : vector<3x256xf32> to vector<3x255xf32>
    %832 = tpu.concatenate %830, %831 in 1 : vector<3x1xf32>, vector<3x255xf32> -> vector<3x256xf32>
    %cst_99 = arith.constant 0.000000e+00 : f32
    %833 = vector.shape_cast %18 : vector<1x256xi1> to vector<1x256xi1>
    %834 = vector.broadcast %833 : vector<1x256xi1> to vector<3x256xi1>
    %835 = vector.broadcast %cst_99 : f32 to vector<3x256xf32>
    %836 = arith.select %834, %835, %832 : vector<3x256xi1>, vector<3x256xf32>
    %837 = vector.extract_strided_slice %22 {offsets = [0, 3], sizes = [3, 1], strides = [1, 1]} : vector<3x27xf32> to vector<3x1xf32>
    %838 = vector.extract_strided_slice %836 {offsets = [0, 0], sizes = [1, 256], strides = [1, 1]} : vector<3x256xf32> to vector<1x256xf32>
    %839 = vector.broadcast %837 : vector<3x1xf32> to vector<3x256xf32>
    %840 = vector.broadcast %838 : vector<1x256xf32> to vector<3x256xf32>
    %841 = arith.mulf %839, %840 : vector<3x256xf32>
    %842 = arith.addf %828, %841 : vector<3x256xf32>
    %843 = vector.extract_strided_slice %22 {offsets = [0, 12], sizes = [3, 1], strides = [1, 1]} : vector<3x27xf32> to vector<3x1xf32>
    %844 = vector.extract_strided_slice %836 {offsets = [1, 0], sizes = [1, 256], strides = [1, 1]} : vector<3x256xf32> to vector<1x256xf32>
    %845 = vector.broadcast %843 : vector<3x1xf32> to vector<3x256xf32>
    %846 = vector.broadcast %844 : vector<1x256xf32> to vector<3x256xf32>
    %847 = arith.mulf %845, %846 : vector<3x256xf32>
    %848 = arith.addf %842, %847 : vector<3x256xf32>
    %849 = vector.extract_strided_slice %22 {offsets = [0, 21], sizes = [3, 1], strides = [1, 1]} : vector<3x27xf32> to vector<3x1xf32>
    %850 = vector.extract_strided_slice %836 {offsets = [2, 0], sizes = [1, 256], strides = [1, 1]} : vector<3x256xf32> to vector<1x256xf32>
    %851 = vector.broadcast %849 : vector<3x1xf32> to vector<3x256xf32>
    %852 = vector.broadcast %850 : vector<1x256xf32> to vector<3x256xf32>
    %853 = arith.mulf %851, %852 : vector<3x256xf32>
    %854 = arith.addf %848, %853 : vector<3x256xf32>
    %c16_100 = arith.constant 16 : index
    %c0_101 = arith.constant 0 : index
    %855 = vector.load %arg8[%c16_100, %c0_101] : memref<32x256xf32, #tpu.memory_space<vmem>>, vector<3x256xf32>
    %856 = vector.extract_strided_slice %22 {offsets = [0, 4], sizes = [3, 1], strides = [1, 1]} : vector<3x27xf32> to vector<3x1xf32>
    %857 = vector.extract_strided_slice %855 {offsets = [0, 0], sizes = [1, 256], strides = [1, 1]} : vector<3x256xf32> to vector<1x256xf32>
    %858 = vector.broadcast %856 : vector<3x1xf32> to vector<3x256xf32>
    %859 = vector.broadcast %857 : vector<1x256xf32> to vector<3x256xf32>
    %860 = arith.mulf %858, %859 : vector<3x256xf32>
    %861 = arith.addf %854, %860 : vector<3x256xf32>
    %862 = vector.extract_strided_slice %22 {offsets = [0, 13], sizes = [3, 1], strides = [1, 1]} : vector<3x27xf32> to vector<3x1xf32>
    %863 = vector.extract_strided_slice %855 {offsets = [1, 0], sizes = [1, 256], strides = [1, 1]} : vector<3x256xf32> to vector<1x256xf32>
    %864 = vector.broadcast %862 : vector<3x1xf32> to vector<3x256xf32>
    %865 = vector.broadcast %863 : vector<1x256xf32> to vector<3x256xf32>
    %866 = arith.mulf %864, %865 : vector<3x256xf32>
    %867 = arith.addf %861, %866 : vector<3x256xf32>
    %868 = vector.extract_strided_slice %22 {offsets = [0, 22], sizes = [3, 1], strides = [1, 1]} : vector<3x27xf32> to vector<3x1xf32>
    %869 = vector.extract_strided_slice %855 {offsets = [2, 0], sizes = [1, 256], strides = [1, 1]} : vector<3x256xf32> to vector<1x256xf32>
    %870 = vector.broadcast %868 : vector<3x1xf32> to vector<3x256xf32>
    %871 = vector.broadcast %869 : vector<1x256xf32> to vector<3x256xf32>
    %872 = arith.mulf %870, %871 : vector<3x256xf32>
    %873 = arith.addf %867, %872 : vector<3x256xf32>
    %c24_102 = arith.constant 24 : index
    %c0_103 = arith.constant 0 : index
    %874 = vector.load %arg8[%c24_102, %c0_103] : memref<32x256xf32, #tpu.memory_space<vmem>>, vector<3x256xf32>
    %875 = vector.extract_strided_slice %22 {offsets = [0, 5], sizes = [3, 1], strides = [1, 1]} : vector<3x27xf32> to vector<3x1xf32>
    %876 = vector.extract_strided_slice %874 {offsets = [0, 0], sizes = [1, 256], strides = [1, 1]} : vector<3x256xf32> to vector<1x256xf32>
    %877 = vector.broadcast %875 : vector<3x1xf32> to vector<3x256xf32>
    %878 = vector.broadcast %876 : vector<1x256xf32> to vector<3x256xf32>
    %879 = arith.mulf %877, %878 : vector<3x256xf32>
    %880 = arith.addf %873, %879 : vector<3x256xf32>
    %881 = vector.extract_strided_slice %22 {offsets = [0, 14], sizes = [3, 1], strides = [1, 1]} : vector<3x27xf32> to vector<3x1xf32>
    %882 = vector.extract_strided_slice %874 {offsets = [1, 0], sizes = [1, 256], strides = [1, 1]} : vector<3x256xf32> to vector<1x256xf32>
    %883 = vector.broadcast %881 : vector<3x1xf32> to vector<3x256xf32>
    %884 = vector.broadcast %882 : vector<1x256xf32> to vector<3x256xf32>
    %885 = arith.mulf %883, %884 : vector<3x256xf32>
    %886 = arith.addf %880, %885 : vector<3x256xf32>
    %887 = vector.extract_strided_slice %22 {offsets = [0, 23], sizes = [3, 1], strides = [1, 1]} : vector<3x27xf32> to vector<3x1xf32>
    %888 = vector.extract_strided_slice %874 {offsets = [2, 0], sizes = [1, 256], strides = [1, 1]} : vector<3x256xf32> to vector<1x256xf32>
    %889 = vector.broadcast %887 : vector<3x1xf32> to vector<3x256xf32>
    %890 = vector.broadcast %888 : vector<1x256xf32> to vector<3x256xf32>
    %891 = arith.mulf %889, %890 : vector<3x256xf32>
    %892 = arith.addf %886, %891 : vector<3x256xf32>
    %c8_104 = arith.constant 8 : index
    %c0_105 = arith.constant 0 : index
    %893 = vector.load %arg8[%c8_104, %c0_105] : memref<32x256xf32, #tpu.memory_space<vmem>>, vector<3x256xf32>
    %cst_106 = arith.constant 0.000000e+00 : f32
    %894 = vector.broadcast %cst_106 : f32 to vector<3x15xf32>
    %895 = vector.extract_strided_slice %893 {offsets = [0, 15], sizes = [3, 241], strides = [1, 1]} : vector<3x256xf32> to vector<3x241xf32>
    %896 = tpu.concatenate %895, %894 in 1 : vector<3x241xf32>, vector<3x15xf32> -> vector<3x256xf32>
    %cst_107 = arith.constant 0.000000e+00 : f32
    %897 = vector.shape_cast %18 : vector<1x256xi1> to vector<1x256xi1>
    %898 = vector.broadcast %897 : vector<1x256xi1> to vector<3x256xi1>
    %899 = vector.broadcast %cst_107 : f32 to vector<3x256xf32>
    %900 = arith.select %898, %899, %896 : vector<3x256xi1>, vector<3x256xf32>
    %901 = vector.extract_strided_slice %22 {offsets = [0, 6], sizes = [3, 1], strides = [1, 1]} : vector<3x27xf32> to vector<3x1xf32>
    %902 = vector.extract_strided_slice %900 {offsets = [0, 0], sizes = [1, 256], strides = [1, 1]} : vector<3x256xf32> to vector<1x256xf32>
    %903 = vector.broadcast %901 : vector<3x1xf32> to vector<3x256xf32>
    %904 = vector.broadcast %902 : vector<1x256xf32> to vector<3x256xf32>
    %905 = arith.mulf %903, %904 : vector<3x256xf32>
    %906 = arith.addf %892, %905 : vector<3x256xf32>
    %907 = vector.extract_strided_slice %22 {offsets = [0, 15], sizes = [3, 1], strides = [1, 1]} : vector<3x27xf32> to vector<3x1xf32>
    %908 = vector.extract_strided_slice %900 {offsets = [1, 0], sizes = [1, 256], strides = [1, 1]} : vector<3x256xf32> to vector<1x256xf32>
    %909 = vector.broadcast %907 : vector<3x1xf32> to vector<3x256xf32>
    %910 = vector.broadcast %908 : vector<1x256xf32> to vector<3x256xf32>
    %911 = arith.mulf %909, %910 : vector<3x256xf32>
    %912 = arith.addf %906, %911 : vector<3x256xf32>
    %913 = vector.extract_strided_slice %22 {offsets = [0, 24], sizes = [3, 1], strides = [1, 1]} : vector<3x27xf32> to vector<3x1xf32>
    %914 = vector.extract_strided_slice %900 {offsets = [2, 0], sizes = [1, 256], strides = [1, 1]} : vector<3x256xf32> to vector<1x256xf32>
    %915 = vector.broadcast %913 : vector<3x1xf32> to vector<3x256xf32>
    %916 = vector.broadcast %914 : vector<1x256xf32> to vector<3x256xf32>
    %917 = arith.mulf %915, %916 : vector<3x256xf32>
    %918 = arith.addf %912, %917 : vector<3x256xf32>
    %c0_108 = arith.constant 0 : index
    %c0_109 = arith.constant 0 : index
    %919 = vector.load %arg8[%c0_108, %c0_109] : memref<32x256xf32, #tpu.memory_space<vmem>>, vector<3x256xf32>
    %cst_110 = arith.constant 0.000000e+00 : f32
    %920 = vector.broadcast %cst_110 : f32 to vector<3x16xf32>
    %921 = vector.extract_strided_slice %919 {offsets = [0, 16], sizes = [3, 240], strides = [1, 1]} : vector<3x256xf32> to vector<3x240xf32>
    %922 = tpu.concatenate %921, %920 in 1 : vector<3x240xf32>, vector<3x16xf32> -> vector<3x256xf32>
    %923 = vector.extract_strided_slice %22 {offsets = [0, 7], sizes = [3, 1], strides = [1, 1]} : vector<3x27xf32> to vector<3x1xf32>
    %924 = vector.extract_strided_slice %922 {offsets = [0, 0], sizes = [1, 256], strides = [1, 1]} : vector<3x256xf32> to vector<1x256xf32>
    %925 = vector.broadcast %923 : vector<3x1xf32> to vector<3x256xf32>
    %926 = vector.broadcast %924 : vector<1x256xf32> to vector<3x256xf32>
    %927 = arith.mulf %925, %926 : vector<3x256xf32>
    %928 = arith.addf %918, %927 : vector<3x256xf32>
    %929 = vector.extract_strided_slice %22 {offsets = [0, 16], sizes = [3, 1], strides = [1, 1]} : vector<3x27xf32> to vector<3x1xf32>
    %930 = vector.extract_strided_slice %922 {offsets = [1, 0], sizes = [1, 256], strides = [1, 1]} : vector<3x256xf32> to vector<1x256xf32>
    %931 = vector.broadcast %929 : vector<3x1xf32> to vector<3x256xf32>
    %932 = vector.broadcast %930 : vector<1x256xf32> to vector<3x256xf32>
    %933 = arith.mulf %931, %932 : vector<3x256xf32>
    %934 = arith.addf %928, %933 : vector<3x256xf32>
    %935 = vector.extract_strided_slice %22 {offsets = [0, 25], sizes = [3, 1], strides = [1, 1]} : vector<3x27xf32> to vector<3x1xf32>
    %936 = vector.extract_strided_slice %922 {offsets = [2, 0], sizes = [1, 256], strides = [1, 1]} : vector<3x256xf32> to vector<1x256xf32>
    %937 = vector.broadcast %935 : vector<3x1xf32> to vector<3x256xf32>
    %938 = vector.broadcast %936 : vector<1x256xf32> to vector<3x256xf32>
    %939 = arith.mulf %937, %938 : vector<3x256xf32>
    %940 = arith.addf %934, %939 : vector<3x256xf32>
    %c8_111 = arith.constant 8 : index
    %c0_112 = arith.constant 0 : index
    %941 = vector.load %arg8[%c8_111, %c0_112] : memref<32x256xf32, #tpu.memory_space<vmem>>, vector<3x256xf32>
    %cst_113 = arith.constant 0.000000e+00 : f32
    %942 = vector.broadcast %cst_113 : f32 to vector<3x16xf32>
    %943 = vector.extract_strided_slice %941 {offsets = [0, 16], sizes = [3, 240], strides = [1, 1]} : vector<3x256xf32> to vector<3x240xf32>
    %944 = tpu.concatenate %943, %942 in 1 : vector<3x240xf32>, vector<3x16xf32> -> vector<3x256xf32>
    %945 = vector.extract_strided_slice %22 {offsets = [0, 8], sizes = [3, 1], strides = [1, 1]} : vector<3x27xf32> to vector<3x1xf32>
    %946 = vector.extract_strided_slice %944 {offsets = [0, 0], sizes = [1, 256], strides = [1, 1]} : vector<3x256xf32> to vector<1x256xf32>
    %947 = vector.broadcast %945 : vector<3x1xf32> to vector<3x256xf32>
    %948 = vector.broadcast %946 : vector<1x256xf32> to vector<3x256xf32>
    %949 = arith.mulf %947, %948 : vector<3x256xf32>
    %950 = arith.addf %940, %949 : vector<3x256xf32>
    %951 = vector.extract_strided_slice %22 {offsets = [0, 17], sizes = [3, 1], strides = [1, 1]} : vector<3x27xf32> to vector<3x1xf32>
    %952 = vector.extract_strided_slice %944 {offsets = [1, 0], sizes = [1, 256], strides = [1, 1]} : vector<3x256xf32> to vector<1x256xf32>
    %953 = vector.broadcast %951 : vector<3x1xf32> to vector<3x256xf32>
    %954 = vector.broadcast %952 : vector<1x256xf32> to vector<3x256xf32>
    %955 = arith.mulf %953, %954 : vector<3x256xf32>
    %956 = arith.addf %950, %955 : vector<3x256xf32>
    %957 = vector.extract_strided_slice %22 {offsets = [0, 26], sizes = [3, 1], strides = [1, 1]} : vector<3x27xf32> to vector<3x1xf32>
    %958 = vector.extract_strided_slice %944 {offsets = [2, 0], sizes = [1, 256], strides = [1, 1]} : vector<3x256xf32> to vector<1x256xf32>
    %959 = vector.broadcast %957 : vector<3x1xf32> to vector<3x256xf32>
    %960 = vector.broadcast %958 : vector<1x256xf32> to vector<3x256xf32>
    %961 = arith.mulf %959, %960 : vector<3x256xf32>
    %962 = arith.addf %956, %961 : vector<3x256xf32>
    %cst_114 = arith.constant 0.000000e+00 : f32
    %963 = vector.broadcast %cst_114 : f32 to vector<3x256xf32>
    %964 = arith.maximumf %962, %963 : vector<3x256xf32>
    %c0_115 = arith.constant 0 : index
    %c6 = arith.constant 6 : index
    %c0_116 = arith.constant 0 : index
    %965 = vector.load %arg7[%c0_115, %c6, %c0_116] : memref<1x12x256xf32, #tpu.memory_space<vmem>>, vector<1x3x256xf32>
    %966 = vector.shape_cast %965 : vector<1x3x256xf32> to vector<3x256xf32>
    %967 = vector.shape_cast %964 : vector<3x256xf32> to vector<1x3x256xf32>
    tpu.vector_store %arg7[%c0_115, %c6, %c0_116], %967 {strides = array<i32>} : memref<1x12x256xf32, #tpu.memory_space<vmem>>, vector<1x3x256xf32>,
    %968 = vector.shape_cast %25 : vector<3x1xf32> to vector<3x1xf32>
    %969 = vector.broadcast %968 : vector<3x1xf32> to vector<3x256xf32>
    %970 = vector.extract_strided_slice %23 {offsets = [0, 3], sizes = [3, 1], strides = [1, 1]} : vector<3x16xf32> to vector<3x1xf32>
    %971 = vector.extract_strided_slice %27 {offsets = [0, 0], sizes = [1, 256], strides = [1, 1]} : vector<4x256xf32> to vector<1x256xf32>
    %972 = vector.broadcast %970 : vector<3x1xf32> to vector<3x256xf32>
    %973 = vector.broadcast %971 : vector<1x256xf32> to vector<3x256xf32>
    %974 = arith.mulf %972, %973 : vector<3x256xf32>
    %975 = arith.addf %969, %974 : vector<3x256xf32>
    %976 = vector.extract_strided_slice %23 {offsets = [0, 7], sizes = [3, 1], strides = [1, 1]} : vector<3x16xf32> to vector<3x1xf32>
    %977 = vector.extract_strided_slice %27 {offsets = [1, 0], sizes = [1, 256], strides = [1, 1]} : vector<4x256xf32> to vector<1x256xf32>
    %978 = vector.broadcast %976 : vector<3x1xf32> to vector<3x256xf32>
    %979 = vector.broadcast %977 : vector<1x256xf32> to vector<3x256xf32>
    %980 = arith.mulf %978, %979 : vector<3x256xf32>
    %981 = arith.addf %975, %980 : vector<3x256xf32>
    %982 = vector.extract_strided_slice %23 {offsets = [0, 11], sizes = [3, 1], strides = [1, 1]} : vector<3x16xf32> to vector<3x1xf32>
    %983 = vector.extract_strided_slice %27 {offsets = [2, 0], sizes = [1, 256], strides = [1, 1]} : vector<4x256xf32> to vector<1x256xf32>
    %984 = vector.broadcast %982 : vector<3x1xf32> to vector<3x256xf32>
    %985 = vector.broadcast %983 : vector<1x256xf32> to vector<3x256xf32>
    %986 = arith.mulf %984, %985 : vector<3x256xf32>
    %987 = arith.addf %981, %986 : vector<3x256xf32>
    %988 = vector.extract_strided_slice %23 {offsets = [0, 15], sizes = [3, 1], strides = [1, 1]} : vector<3x16xf32> to vector<3x1xf32>
    %989 = vector.extract_strided_slice %27 {offsets = [3, 0], sizes = [1, 256], strides = [1, 1]} : vector<4x256xf32> to vector<1x256xf32>
    %990 = vector.broadcast %988 : vector<3x1xf32> to vector<3x256xf32>
    %991 = vector.broadcast %989 : vector<1x256xf32> to vector<3x256xf32>
    %992 = arith.mulf %990, %991 : vector<3x256xf32>
    %993 = arith.addf %987, %992 : vector<3x256xf32>
    %c0_117 = arith.constant 0 : index
    %c0_118 = arith.constant 0 : index
    %994 = vector.load %arg8[%c0_117, %c0_118] : memref<32x256xf32, #tpu.memory_space<vmem>>, vector<3x256xf32>
    %995 = vector.extract_strided_slice %22 {offsets = [0, 0], sizes = [3, 1], strides = [1, 1]} : vector<3x27xf32> to vector<3x1xf32>
    %996 = vector.extract_strided_slice %994 {offsets = [0, 0], sizes = [1, 256], strides = [1, 1]} : vector<3x256xf32> to vector<1x256xf32>
    %997 = vector.broadcast %995 : vector<3x1xf32> to vector<3x256xf32>
    %998 = vector.broadcast %996 : vector<1x256xf32> to vector<3x256xf32>
    %999 = arith.mulf %997, %998 : vector<3x256xf32>
    %1000 = arith.addf %993, %999 : vector<3x256xf32>
    %1001 = vector.extract_strided_slice %22 {offsets = [0, 9], sizes = [3, 1], strides = [1, 1]} : vector<3x27xf32> to vector<3x1xf32>
    %1002 = vector.extract_strided_slice %994 {offsets = [1, 0], sizes = [1, 256], strides = [1, 1]} : vector<3x256xf32> to vector<1x256xf32>
    %1003 = vector.broadcast %1001 : vector<3x1xf32> to vector<3x256xf32>
    %1004 = vector.broadcast %1002 : vector<1x256xf32> to vector<3x256xf32>
    %1005 = arith.mulf %1003, %1004 : vector<3x256xf32>
    %1006 = arith.addf %1000, %1005 : vector<3x256xf32>
    %1007 = vector.extract_strided_slice %22 {offsets = [0, 18], sizes = [3, 1], strides = [1, 1]} : vector<3x27xf32> to vector<3x1xf32>
    %1008 = vector.extract_strided_slice %994 {offsets = [2, 0], sizes = [1, 256], strides = [1, 1]} : vector<3x256xf32> to vector<1x256xf32>
    %1009 = vector.broadcast %1007 : vector<3x1xf32> to vector<3x256xf32>
    %1010 = vector.broadcast %1008 : vector<1x256xf32> to vector<3x256xf32>
    %1011 = arith.mulf %1009, %1010 : vector<3x256xf32>
    %1012 = arith.addf %1006, %1011 : vector<3x256xf32>
    %c8_119 = arith.constant 8 : index
    %c0_120 = arith.constant 0 : index
    %1013 = vector.load %arg8[%c8_119, %c0_120] : memref<32x256xf32, #tpu.memory_space<vmem>>, vector<3x256xf32>
    %1014 = vector.extract_strided_slice %22 {offsets = [0, 1], sizes = [3, 1], strides = [1, 1]} : vector<3x27xf32> to vector<3x1xf32>
    %1015 = vector.extract_strided_slice %1013 {offsets = [0, 0], sizes = [1, 256], strides = [1, 1]} : vector<3x256xf32> to vector<1x256xf32>
    %1016 = vector.broadcast %1014 : vector<3x1xf32> to vector<3x256xf32>
    %1017 = vector.broadcast %1015 : vector<1x256xf32> to vector<3x256xf32>
    %1018 = arith.mulf %1016, %1017 : vector<3x256xf32>
    %1019 = arith.addf %1012, %1018 : vector<3x256xf32>
    %1020 = vector.extract_strided_slice %22 {offsets = [0, 10], sizes = [3, 1], strides = [1, 1]} : vector<3x27xf32> to vector<3x1xf32>
    %1021 = vector.extract_strided_slice %1013 {offsets = [1, 0], sizes = [1, 256], strides = [1, 1]} : vector<3x256xf32> to vector<1x256xf32>
    %1022 = vector.broadcast %1020 : vector<3x1xf32> to vector<3x256xf32>
    %1023 = vector.broadcast %1021 : vector<1x256xf32> to vector<3x256xf32>
    %1024 = arith.mulf %1022, %1023 : vector<3x256xf32>
    %1025 = arith.addf %1019, %1024 : vector<3x256xf32>
    %1026 = vector.extract_strided_slice %22 {offsets = [0, 19], sizes = [3, 1], strides = [1, 1]} : vector<3x27xf32> to vector<3x1xf32>
    %1027 = vector.extract_strided_slice %1013 {offsets = [2, 0], sizes = [1, 256], strides = [1, 1]} : vector<3x256xf32> to vector<1x256xf32>
    %1028 = vector.broadcast %1026 : vector<3x1xf32> to vector<3x256xf32>
    %1029 = vector.broadcast %1027 : vector<1x256xf32> to vector<3x256xf32>
    %1030 = arith.mulf %1028, %1029 : vector<3x256xf32>
    %1031 = arith.addf %1025, %1030 : vector<3x256xf32>
    %c0_121 = arith.constant 0 : index
    %c0_122 = arith.constant 0 : index
    %1032 = vector.load %arg8[%c0_121, %c0_122] : memref<32x256xf32, #tpu.memory_space<vmem>>, vector<3x256xf32>
    %cst_123 = arith.constant 0.000000e+00 : f32
    %1033 = vector.broadcast %cst_123 : f32 to vector<3x1xf32>
    %1034 = vector.extract_strided_slice %1032 {offsets = [0, 1], sizes = [3, 255], strides = [1, 1]} : vector<3x256xf32> to vector<3x255xf32>
    %1035 = tpu.concatenate %1034, %1033 in 1 : vector<3x255xf32>, vector<3x1xf32> -> vector<3x256xf32>
    %cst_124 = arith.constant 0.000000e+00 : f32
    %1036 = vector.shape_cast %20 : vector<1x256xi1> to vector<1x256xi1>
    %1037 = vector.broadcast %1036 : vector<1x256xi1> to vector<3x256xi1>
    %1038 = vector.broadcast %cst_124 : f32 to vector<3x256xf32>
    %1039 = arith.select %1037, %1038, %1035 : vector<3x256xi1>, vector<3x256xf32>
    %1040 = vector.extract_strided_slice %22 {offsets = [0, 2], sizes = [3, 1], strides = [1, 1]} : vector<3x27xf32> to vector<3x1xf32>
    %1041 = vector.extract_strided_slice %1039 {offsets = [0, 0], sizes = [1, 256], strides = [1, 1]} : vector<3x256xf32> to vector<1x256xf32>
    %1042 = vector.broadcast %1040 : vector<3x1xf32> to vector<3x256xf32>
    %1043 = vector.broadcast %1041 : vector<1x256xf32> to vector<3x256xf32>
    %1044 = arith.mulf %1042, %1043 : vector<3x256xf32>
    %1045 = arith.addf %1031, %1044 : vector<3x256xf32>
    %1046 = vector.extract_strided_slice %22 {offsets = [0, 11], sizes = [3, 1], strides = [1, 1]} : vector<3x27xf32> to vector<3x1xf32>
    %1047 = vector.extract_strided_slice %1039 {offsets = [1, 0], sizes = [1, 256], strides = [1, 1]} : vector<3x256xf32> to vector<1x256xf32>
    %1048 = vector.broadcast %1046 : vector<3x1xf32> to vector<3x256xf32>
    %1049 = vector.broadcast %1047 : vector<1x256xf32> to vector<3x256xf32>
    %1050 = arith.mulf %1048, %1049 : vector<3x256xf32>
    %1051 = arith.addf %1045, %1050 : vector<3x256xf32>
    %1052 = vector.extract_strided_slice %22 {offsets = [0, 20], sizes = [3, 1], strides = [1, 1]} : vector<3x27xf32> to vector<3x1xf32>
    %1053 = vector.extract_strided_slice %1039 {offsets = [2, 0], sizes = [1, 256], strides = [1, 1]} : vector<3x256xf32> to vector<1x256xf32>
    %1054 = vector.broadcast %1052 : vector<3x1xf32> to vector<3x256xf32>
    %1055 = vector.broadcast %1053 : vector<1x256xf32> to vector<3x256xf32>
    %1056 = arith.mulf %1054, %1055 : vector<3x256xf32>
    %1057 = arith.addf %1051, %1056 : vector<3x256xf32>
    %c16_125 = arith.constant 16 : index
    %c0_126 = arith.constant 0 : index
    %1058 = vector.load %arg8[%c16_125, %c0_126] : memref<32x256xf32, #tpu.memory_space<vmem>>, vector<3x256xf32>
    %1059 = vector.extract_strided_slice %22 {offsets = [0, 3], sizes = [3, 1], strides = [1, 1]} : vector<3x27xf32> to vector<3x1xf32>
    %1060 = vector.extract_strided_slice %1058 {offsets = [0, 0], sizes = [1, 256], strides = [1, 1]} : vector<3x256xf32> to vector<1x256xf32>
    %1061 = vector.broadcast %1059 : vector<3x1xf32> to vector<3x256xf32>
    %1062 = vector.broadcast %1060 : vector<1x256xf32> to vector<3x256xf32>
    %1063 = arith.mulf %1061, %1062 : vector<3x256xf32>
    %1064 = arith.addf %1057, %1063 : vector<3x256xf32>
    %1065 = vector.extract_strided_slice %22 {offsets = [0, 12], sizes = [3, 1], strides = [1, 1]} : vector<3x27xf32> to vector<3x1xf32>
    %1066 = vector.extract_strided_slice %1058 {offsets = [1, 0], sizes = [1, 256], strides = [1, 1]} : vector<3x256xf32> to vector<1x256xf32>
    %1067 = vector.broadcast %1065 : vector<3x1xf32> to vector<3x256xf32>
    %1068 = vector.broadcast %1066 : vector<1x256xf32> to vector<3x256xf32>
    %1069 = arith.mulf %1067, %1068 : vector<3x256xf32>
    %1070 = arith.addf %1064, %1069 : vector<3x256xf32>
    %1071 = vector.extract_strided_slice %22 {offsets = [0, 21], sizes = [3, 1], strides = [1, 1]} : vector<3x27xf32> to vector<3x1xf32>
    %1072 = vector.extract_strided_slice %1058 {offsets = [2, 0], sizes = [1, 256], strides = [1, 1]} : vector<3x256xf32> to vector<1x256xf32>
    %1073 = vector.broadcast %1071 : vector<3x1xf32> to vector<3x256xf32>
    %1074 = vector.broadcast %1072 : vector<1x256xf32> to vector<3x256xf32>
    %1075 = arith.mulf %1073, %1074 : vector<3x256xf32>
    %1076 = arith.addf %1070, %1075 : vector<3x256xf32>
    %c24_127 = arith.constant 24 : index
    %c0_128 = arith.constant 0 : index
    %1077 = vector.load %arg8[%c24_127, %c0_128] : memref<32x256xf32, #tpu.memory_space<vmem>>, vector<3x256xf32>
    %1078 = vector.extract_strided_slice %22 {offsets = [0, 4], sizes = [3, 1], strides = [1, 1]} : vector<3x27xf32> to vector<3x1xf32>
    %1079 = vector.extract_strided_slice %1077 {offsets = [0, 0], sizes = [1, 256], strides = [1, 1]} : vector<3x256xf32> to vector<1x256xf32>
    %1080 = vector.broadcast %1078 : vector<3x1xf32> to vector<3x256xf32>
    %1081 = vector.broadcast %1079 : vector<1x256xf32> to vector<3x256xf32>
    %1082 = arith.mulf %1080, %1081 : vector<3x256xf32>
    %1083 = arith.addf %1076, %1082 : vector<3x256xf32>
    %1084 = vector.extract_strided_slice %22 {offsets = [0, 13], sizes = [3, 1], strides = [1, 1]} : vector<3x27xf32> to vector<3x1xf32>
    %1085 = vector.extract_strided_slice %1077 {offsets = [1, 0], sizes = [1, 256], strides = [1, 1]} : vector<3x256xf32> to vector<1x256xf32>
    %1086 = vector.broadcast %1084 : vector<3x1xf32> to vector<3x256xf32>
    %1087 = vector.broadcast %1085 : vector<1x256xf32> to vector<3x256xf32>
    %1088 = arith.mulf %1086, %1087 : vector<3x256xf32>
    %1089 = arith.addf %1083, %1088 : vector<3x256xf32>
    %1090 = vector.extract_strided_slice %22 {offsets = [0, 22], sizes = [3, 1], strides = [1, 1]} : vector<3x27xf32> to vector<3x1xf32>
    %1091 = vector.extract_strided_slice %1077 {offsets = [2, 0], sizes = [1, 256], strides = [1, 1]} : vector<3x256xf32> to vector<1x256xf32>
    %1092 = vector.broadcast %1090 : vector<3x1xf32> to vector<3x256xf32>
    %1093 = vector.broadcast %1091 : vector<1x256xf32> to vector<3x256xf32>
    %1094 = arith.mulf %1092, %1093 : vector<3x256xf32>
    %1095 = arith.addf %1089, %1094 : vector<3x256xf32>
    %c16_129 = arith.constant 16 : index
    %c0_130 = arith.constant 0 : index
    %1096 = vector.load %arg8[%c16_129, %c0_130] : memref<32x256xf32, #tpu.memory_space<vmem>>, vector<3x256xf32>
    %cst_131 = arith.constant 0.000000e+00 : f32
    %1097 = vector.broadcast %cst_131 : f32 to vector<3x1xf32>
    %1098 = vector.extract_strided_slice %1096 {offsets = [0, 1], sizes = [3, 255], strides = [1, 1]} : vector<3x256xf32> to vector<3x255xf32>
    %1099 = tpu.concatenate %1098, %1097 in 1 : vector<3x255xf32>, vector<3x1xf32> -> vector<3x256xf32>
    %cst_132 = arith.constant 0.000000e+00 : f32
    %1100 = vector.shape_cast %20 : vector<1x256xi1> to vector<1x256xi1>
    %1101 = vector.broadcast %1100 : vector<1x256xi1> to vector<3x256xi1>
    %1102 = vector.broadcast %cst_132 : f32 to vector<3x256xf32>
    %1103 = arith.select %1101, %1102, %1099 : vector<3x256xi1>, vector<3x256xf32>
    %1104 = vector.extract_strided_slice %22 {offsets = [0, 5], sizes = [3, 1], strides = [1, 1]} : vector<3x27xf32> to vector<3x1xf32>
    %1105 = vector.extract_strided_slice %1103 {offsets = [0, 0], sizes = [1, 256], strides = [1, 1]} : vector<3x256xf32> to vector<1x256xf32>
    %1106 = vector.broadcast %1104 : vector<3x1xf32> to vector<3x256xf32>
    %1107 = vector.broadcast %1105 : vector<1x256xf32> to vector<3x256xf32>
    %1108 = arith.mulf %1106, %1107 : vector<3x256xf32>
    %1109 = arith.addf %1095, %1108 : vector<3x256xf32>
    %1110 = vector.extract_strided_slice %22 {offsets = [0, 14], sizes = [3, 1], strides = [1, 1]} : vector<3x27xf32> to vector<3x1xf32>
    %1111 = vector.extract_strided_slice %1103 {offsets = [1, 0], sizes = [1, 256], strides = [1, 1]} : vector<3x256xf32> to vector<1x256xf32>
    %1112 = vector.broadcast %1110 : vector<3x1xf32> to vector<3x256xf32>
    %1113 = vector.broadcast %1111 : vector<1x256xf32> to vector<3x256xf32>
    %1114 = arith.mulf %1112, %1113 : vector<3x256xf32>
    %1115 = arith.addf %1109, %1114 : vector<3x256xf32>
    %1116 = vector.extract_strided_slice %22 {offsets = [0, 23], sizes = [3, 1], strides = [1, 1]} : vector<3x27xf32> to vector<3x1xf32>
    %1117 = vector.extract_strided_slice %1103 {offsets = [2, 0], sizes = [1, 256], strides = [1, 1]} : vector<3x256xf32> to vector<1x256xf32>
    %1118 = vector.broadcast %1116 : vector<3x1xf32> to vector<3x256xf32>
    %1119 = vector.broadcast %1117 : vector<1x256xf32> to vector<3x256xf32>
    %1120 = arith.mulf %1118, %1119 : vector<3x256xf32>
    %1121 = arith.addf %1115, %1120 : vector<3x256xf32>
    %c0_133 = arith.constant 0 : index
    %c0_134 = arith.constant 0 : index
    %1122 = vector.load %arg8[%c0_133, %c0_134] : memref<32x256xf32, #tpu.memory_space<vmem>>, vector<3x256xf32>
    %cst_135 = arith.constant 0.000000e+00 : f32
    %1123 = vector.broadcast %cst_135 : f32 to vector<3x16xf32>
    %1124 = vector.extract_strided_slice %1122 {offsets = [0, 16], sizes = [3, 240], strides = [1, 1]} : vector<3x256xf32> to vector<3x240xf32>
    %1125 = tpu.concatenate %1124, %1123 in 1 : vector<3x240xf32>, vector<3x16xf32> -> vector<3x256xf32>
    %1126 = vector.extract_strided_slice %22 {offsets = [0, 6], sizes = [3, 1], strides = [1, 1]} : vector<3x27xf32> to vector<3x1xf32>
    %1127 = vector.extract_strided_slice %1125 {offsets = [0, 0], sizes = [1, 256], strides = [1, 1]} : vector<3x256xf32> to vector<1x256xf32>
    %1128 = vector.broadcast %1126 : vector<3x1xf32> to vector<3x256xf32>
    %1129 = vector.broadcast %1127 : vector<1x256xf32> to vector<3x256xf32>
    %1130 = arith.mulf %1128, %1129 : vector<3x256xf32>
    %1131 = arith.addf %1121, %1130 : vector<3x256xf32>
    %1132 = vector.extract_strided_slice %22 {offsets = [0, 15], sizes = [3, 1], strides = [1, 1]} : vector<3x27xf32> to vector<3x1xf32>
    %1133 = vector.extract_strided_slice %1125 {offsets = [1, 0], sizes = [1, 256], strides = [1, 1]} : vector<3x256xf32> to vector<1x256xf32>
    %1134 = vector.broadcast %1132 : vector<3x1xf32> to vector<3x256xf32>
    %1135 = vector.broadcast %1133 : vector<1x256xf32> to vector<3x256xf32>
    %1136 = arith.mulf %1134, %1135 : vector<3x256xf32>
    %1137 = arith.addf %1131, %1136 : vector<3x256xf32>
    %1138 = vector.extract_strided_slice %22 {offsets = [0, 24], sizes = [3, 1], strides = [1, 1]} : vector<3x27xf32> to vector<3x1xf32>
    %1139 = vector.extract_strided_slice %1125 {offsets = [2, 0], sizes = [1, 256], strides = [1, 1]} : vector<3x256xf32> to vector<1x256xf32>
    %1140 = vector.broadcast %1138 : vector<3x1xf32> to vector<3x256xf32>
    %1141 = vector.broadcast %1139 : vector<1x256xf32> to vector<3x256xf32>
    %1142 = arith.mulf %1140, %1141 : vector<3x256xf32>
    %1143 = arith.addf %1137, %1142 : vector<3x256xf32>
    %c8_136 = arith.constant 8 : index
    %c0_137 = arith.constant 0 : index
    %1144 = vector.load %arg8[%c8_136, %c0_137] : memref<32x256xf32, #tpu.memory_space<vmem>>, vector<3x256xf32>
    %cst_138 = arith.constant 0.000000e+00 : f32
    %1145 = vector.broadcast %cst_138 : f32 to vector<3x16xf32>
    %1146 = vector.extract_strided_slice %1144 {offsets = [0, 16], sizes = [3, 240], strides = [1, 1]} : vector<3x256xf32> to vector<3x240xf32>
    %1147 = tpu.concatenate %1146, %1145 in 1 : vector<3x240xf32>, vector<3x16xf32> -> vector<3x256xf32>
    %1148 = vector.extract_strided_slice %22 {offsets = [0, 7], sizes = [3, 1], strides = [1, 1]} : vector<3x27xf32> to vector<3x1xf32>
    %1149 = vector.extract_strided_slice %1147 {offsets = [0, 0], sizes = [1, 256], strides = [1, 1]} : vector<3x256xf32> to vector<1x256xf32>
    %1150 = vector.broadcast %1148 : vector<3x1xf32> to vector<3x256xf32>
    %1151 = vector.broadcast %1149 : vector<1x256xf32> to vector<3x256xf32>
    %1152 = arith.mulf %1150, %1151 : vector<3x256xf32>
    %1153 = arith.addf %1143, %1152 : vector<3x256xf32>
    %1154 = vector.extract_strided_slice %22 {offsets = [0, 16], sizes = [3, 1], strides = [1, 1]} : vector<3x27xf32> to vector<3x1xf32>
    %1155 = vector.extract_strided_slice %1147 {offsets = [1, 0], sizes = [1, 256], strides = [1, 1]} : vector<3x256xf32> to vector<1x256xf32>
    %1156 = vector.broadcast %1154 : vector<3x1xf32> to vector<3x256xf32>
    %1157 = vector.broadcast %1155 : vector<1x256xf32> to vector<3x256xf32>
    %1158 = arith.mulf %1156, %1157 : vector<3x256xf32>
    %1159 = arith.addf %1153, %1158 : vector<3x256xf32>
    %1160 = vector.extract_strided_slice %22 {offsets = [0, 25], sizes = [3, 1], strides = [1, 1]} : vector<3x27xf32> to vector<3x1xf32>
    %1161 = vector.extract_strided_slice %1147 {offsets = [2, 0], sizes = [1, 256], strides = [1, 1]} : vector<3x256xf32> to vector<1x256xf32>
    %1162 = vector.broadcast %1160 : vector<3x1xf32> to vector<3x256xf32>
    %1163 = vector.broadcast %1161 : vector<1x256xf32> to vector<3x256xf32>
    %1164 = arith.mulf %1162, %1163 : vector<3x256xf32>
    %1165 = arith.addf %1159, %1164 : vector<3x256xf32>
    %c0_139 = arith.constant 0 : index
    %c0_140 = arith.constant 0 : index
    %1166 = vector.load %arg8[%c0_139, %c0_140] : memref<32x256xf32, #tpu.memory_space<vmem>>, vector<3x256xf32>
    %cst_141 = arith.constant 0.000000e+00 : f32
    %1167 = vector.broadcast %cst_141 : f32 to vector<3x17xf32>
    %1168 = vector.extract_strided_slice %1166 {offsets = [0, 17], sizes = [3, 239], strides = [1, 1]} : vector<3x256xf32> to vector<3x239xf32>
    %1169 = tpu.concatenate %1168, %1167 in 1 : vector<3x239xf32>, vector<3x17xf32> -> vector<3x256xf32>
    %cst_142 = arith.constant 0.000000e+00 : f32
    %1170 = vector.shape_cast %20 : vector<1x256xi1> to vector<1x256xi1>
    %1171 = vector.broadcast %1170 : vector<1x256xi1> to vector<3x256xi1>
    %1172 = vector.broadcast %cst_142 : f32 to vector<3x256xf32>
    %1173 = arith.select %1171, %1172, %1169 : vector<3x256xi1>, vector<3x256xf32>
    %1174 = vector.extract_strided_slice %22 {offsets = [0, 8], sizes = [3, 1], strides = [1, 1]} : vector<3x27xf32> to vector<3x1xf32>
    %1175 = vector.extract_strided_slice %1173 {offsets = [0, 0], sizes = [1, 256], strides = [1, 1]} : vector<3x256xf32> to vector<1x256xf32>
    %1176 = vector.broadcast %1174 : vector<3x1xf32> to vector<3x256xf32>
    %1177 = vector.broadcast %1175 : vector<1x256xf32> to vector<3x256xf32>
    %1178 = arith.mulf %1176, %1177 : vector<3x256xf32>
    %1179 = arith.addf %1165, %1178 : vector<3x256xf32>
    %1180 = vector.extract_strided_slice %22 {offsets = [0, 17], sizes = [3, 1], strides = [1, 1]} : vector<3x27xf32> to vector<3x1xf32>
    %1181 = vector.extract_strided_slice %1173 {offsets = [1, 0], sizes = [1, 256], strides = [1, 1]} : vector<3x256xf32> to vector<1x256xf32>
    %1182 = vector.broadcast %1180 : vector<3x1xf32> to vector<3x256xf32>
    %1183 = vector.broadcast %1181 : vector<1x256xf32> to vector<3x256xf32>
    %1184 = arith.mulf %1182, %1183 : vector<3x256xf32>
    %1185 = arith.addf %1179, %1184 : vector<3x256xf32>
    %1186 = vector.extract_strided_slice %22 {offsets = [0, 26], sizes = [3, 1], strides = [1, 1]} : vector<3x27xf32> to vector<3x1xf32>
    %1187 = vector.extract_strided_slice %1173 {offsets = [2, 0], sizes = [1, 256], strides = [1, 1]} : vector<3x256xf32> to vector<1x256xf32>
    %1188 = vector.broadcast %1186 : vector<3x1xf32> to vector<3x256xf32>
    %1189 = vector.broadcast %1187 : vector<1x256xf32> to vector<3x256xf32>
    %1190 = arith.mulf %1188, %1189 : vector<3x256xf32>
    %1191 = arith.addf %1185, %1190 : vector<3x256xf32>
    %cst_143 = arith.constant 0.000000e+00 : f32
    %1192 = vector.broadcast %cst_143 : f32 to vector<3x256xf32>
    %1193 = arith.maximumf %1191, %1192 : vector<3x256xf32>
    %c0_144 = arith.constant 0 : index
    %c9 = arith.constant 9 : index
    %c0_145 = arith.constant 0 : index
    %1194 = vector.load %arg7[%c0_144, %c9, %c0_145] : memref<1x12x256xf32, #tpu.memory_space<vmem>>, vector<1x3x256xf32>
    %1195 = vector.shape_cast %1194 : vector<1x3x256xf32> to vector<3x256xf32>
    %1196 = vector.shape_cast %1193 : vector<3x256xf32> to vector<1x3x256xf32>
    tpu.vector_store %arg7[%c0_144, %c9, %c0_145], %1196 {strides = array<i32>} : memref<1x12x256xf32, #tpu.memory_space<vmem>>, vector<1x3x256xf32>,
    return
  }
  func.func @transform_0(%arg0: i32) -> (i32, i32, i32) {
    %c0_i32 = arith.constant 0 : i32
    %c0_i32_0 = arith.constant 0 : i32
    %c0_i32_1 = arith.constant 0 : i32
    return %arg0, %c0_i32, %c0_i32_0 : i32, i32, i32
  }
  func.func @transform_1(%arg0: i32) -> (i32, i32) {
    %c0_i32 = arith.constant 0 : i32
    %c0_i32_0 = arith.constant 0 : i32
    %c0_i32_1 = arith.constant 0 : i32
    return %c0_i32, %c0_i32_0 : i32, i32
  }
  func.func @transform_2(%arg0: i32) -> (i32, i32) {
    %c0_i32 = arith.constant 0 : i32
    %c0_i32_0 = arith.constant 0 : i32
    %c0_i32_1 = arith.constant 0 : i32
    return %c0_i32, %c0_i32_0 : i32, i32
  }
  func.func @transform_3(%arg0: i32) -> (i32, i32) {
    %c0_i32 = arith.constant 0 : i32
    %c0_i32_0 = arith.constant 0 : i32
    %c0_i32_1 = arith.constant 0 : i32
    return %c0_i32, %c0_i32_0 : i32, i32
  }
  func.func @transform_4(%arg0: i32) -> (i32, i32) {
    %c0_i32 = arith.constant 0 : i32
    %c0_i32_0 = arith.constant 0 : i32
    %c0_i32_1 = arith.constant 0 : i32
    return %c0_i32, %c0_i32_0 : i32, i32
  }
  func.func @transform_5(%arg0: i32) -> (i32, i32) {
    %c0_i32 = arith.constant 0 : i32
    %c0_i32_0 = arith.constant 0 : i32
    %c0_i32_1 = arith.constant 0 : i32
    return %c0_i32, %c0_i32_0 : i32, i32
  }
  func.func @transform_6(%arg0: i32) -> (i32, i32, i32) {
    %c0_i32 = arith.constant 0 : i32
    %c0_i32_0 = arith.constant 0 : i32
    %c0_i32_1 = arith.constant 0 : i32
    return %arg0, %c0_i32, %c0_i32_0 : i32, i32, i32
  }
}

</mosaic_0001>

<bundles_post_ra>
// kernel: tpu_custom_call.1
= control target key start
LH: loop header
LB: loop body
LE: loop exit
PB: predicated region body
PF: predicated region fallthrough
CT: control target
= control target key end

     0   :  { %11 = vsyncpa [#allocation4], 0  ;;  %s5158_s0 = inlined_call_operand.hbm [shape: f32[2,4,256], index: 0, kind: input, shape index: {}]   ;;  %s5159_s1 = inlined_call_operand.vmem [shape: f32[3,36], index: 1, kind: input, shape index: {}]   ;;  %s5160_s2 = inlined_call_operand.vmem [shape: f32[3,1], index: 2, kind: input, shape index: {}]   ;;  %s5161_s3 = inlined_call_operand.vmem [shape: f32[3,27], index: 3, kind: input, shape index: {}]   ;;  %s5162_s4 = inlined_call_operand.vmem [shape: f32[3,1], index: 4, kind: input, shape index: {}]   ;;  %s5163_s5 = inlined_call_operand.vmem [shape: f32[3,16], index: 5, kind: input, shape index: {}]   ;;  %s5164_s6 = inlined_call_operand.vmem [shape: f32[2,12,256], index: 6, kind: output, shape index: {}]  }
   0x1   :  { %13 = vsyncpa [#allocation4 + $0x1], 0  ;;  %s3032_s21 = smov 0   ;;  %s3034_s22 = smov 0  }
   0x2   :  { %s3036_s23 = smov 0   ;;  %s3038_s24 = smov 0  }
   0x3 LB: > { %s3051_s25 = sadd.s32 4294967295, %s2950_s24   ;;  %s3054_s26 = sadd.s32 1, %s2950_s24   ;;  %s2950_s24 = sphi %s3038_s24, %s5687_s24   ;;  %s2946_s23 = sphi %s3036_s23, %s5686_s23   ;;  %s2942_s22 = sphi %s3034_s22, %s5685_s22   ;;  %s2938_s21 = sphi %s3032_s21, %s5684_s21  }
   0x4   : > { %s23_s27 = ssub.s32 %s2950_s24, %s3054_s26  ;;  %s26_s28 = sadd.s32 1, %s2946_s23 }
   0x5   : > { %p24_p0 = scmp.eq.s32.totalorder %s23_s27, 0  ;;  %p33_p1 = scmp.ne.s32.totalorder %s2946_s23, %s2942_s22 }
   0x6   : > { %p34_p2 = scmp.eq.s32.totalorder %s2950_s24, 0  ;;  %p39_p3 = scmp.ne.s32.totalorder %s2942_s22, %s2938_s21 }
   0x7   : > { %s3064_s29 = scalar_select %p24_p0, %s2946_s23, %s26_s28  }
   0x8   : > { %p35_p4 = por %p34_p2, %p33_p1  ;;  %p40_p5 = scmp.eq.s32.totalorder %s3051_s25, 0 }
   0x9   : > { %p2733_p6 = scmp.lt.s32.totalorder %s2950_s24, 2  ;;  %s209_s7 = sand.u32 1, %s2946_s23  }
   0xa   : > { %p3068_p7 = por %p40_p5, %p39_p3  ;;  %s2716_s8 = sshll.u32 %s209_s7, 3 }
   0xb   : > { %s2725_s9 = sshll.u32 %s2950_s24, 7  ;;  %s213_s13 = scalar_lea.vmem [#allocation3], %s2716_s8 }
   0xc   : > { %s5306_s30 = scalar_select %p3068_p7, 1, 0 }
   0xd   : > { %s3077_s12 = scalar_lea.hbm %s5158_s0, %s2725_s9  ;;  %s221_s14 = sshll.u32 %s213_s13, 4  ;;  %s3079_s14 = int_to_ptr.vmem [resolvable:$true] %s221_s14 }
   0xe   : > { %p3081_p8 = pnand %p2733_p6, %p35_p4  ;;  %s210_s16 = scalar_lea.sflag [#allocation4], %s209_s7 }
   0xf   : > { %s2888_s17 = scalar_lea.hbm %s3077_s12, 128  ;;  %s2893_s20 = scalar_lea.hbm %s5158_s0, 256 }
  0x10   : > { %p2889_p11 = scmp.ne.s32.totalorder %s3077_s12, %s2888_s17  ;;  %p2890_p12 = pneg %p3081_p8 }
  0x11   : > { %p2894_p1 = scmp.lt.s32.totalorder %s3077_s12, %s5158_s0  ;;  %p2895_p2 = scmp.lt.s32.totalorder %s2893_s20, %s2888_s17 }
  0x12   : > { %p2891_p13 = pnand %p2890_p12, %p2889_p11 }
  0x13   : > { %p2896_p3 = por %p2895_p2, %p2894_p1 }
  0x14   : > { %p2892_p0 = pneg %p2891_p13 }
  0x16   : > { %p2897_p4 = pnand %p2896_p3, %p2892_p0 }
  0x18   : > { %2900 = shalt.err (!%p2897_p4)
}
  0x19   : > { %s2901_s28 = scalar_lea.vmem %s3079_s14, 128  ;;  %s2952_s7 = smov [#allocation3]  }
  0x1a   : > { %p2902_p5 = scmp.ne.s32.totalorder %s3079_s14, %s2901_s28  ;;  %s2906_s8 = sshll.u32 %s2952_s7, 4  ;;  %s2907_s8 = int_to_ptr.vmem [resolvable:$false] %s2906_s8 }
  0x1b   : > { %s2908_s9 = scalar_lea.vmem %s2907_s8, 256  ;;  %p2909_p13 = scmp.lt.s32.totalorder %s3079_s14, %s2907_s8 }
  0x1c   : > { %p2904_p6 = pnand %p2902_p5, %p2890_p12  ;;  %p2910_p9 = scmp.lt.s32.totalorder %s2908_s9, %s2901_s28 }
  0x1e   : > { %p2905_p11 = pneg %p2904_p6  ;;  %p2911_p10 = por %p2910_p9, %p2909_p13 }
  0x20   : > { %p2912_p7 = pnand %p2911_p10, %p2905_p11 }
  0x22   : > { %2915 = shalt.err (!%p2912_p7)
}
  0x23   : > { %2732 = dma.hbm_to_vmem [thread:$0]  (!%p3081_p8), %s3077_s12, 128, %s3079_s14, %s210_s16  }
  0x24   : > { %p5308_p0 = scmp.lt.s32.totalorder %s2950_s24, 3  ;;  %p5309_p1 = scmp.ge.s32.totalorder %s2950_s24, 1 }
  0x26   : > { %p227_p12 = pnand %p5309_p1, %p5308_p0 }
  0x28   : > { %230 = sbr.rel (%p227_p12) target bundleno = 641 (0x281), region = 44 }
  0x2d   : > { %s232_s10 = sand.u32 1, %s2942_s22   ;;  %p5310_p9 = scmp.ne.s32.totalorder %s5306_s30, 0 }
  0x2e   : > { %s2720_s11 = sshll.u32 %s232_s10, 3  ;;  %s233_s13 = scalar_lea.sflag [#allocation4], %s232_s10 }
  0x2f   : > { %s236_s17 = scalar_lea.vmem [#allocation3], %s2720_s11 }
  0x30   : > { %2933 = dma.done.wait (%p5310_p9), %s233_s13, 128  }
  0x31   : > { %2935 = vsyncadd (%p5310_p9), %s233_s13, 4294967168  ;;  %v5189_v0 = vmov 22   ;;  %v2954_v1 = vmov 4   ;;  %v3116_v2 = vld [vmem:[%s236_s17] sm:$0xff]  ;;  %s2955_s24 = smov 112   ;;  %s2956_s12 = smov 127   ;;  %v270_v59 = vlaneseq }
  0x32   : > { %2812 = vset.pattern.permute.xlu0 %v5189_v0  ;;  %2810 = vset.pattern.permute.xlu1 %v2954_v1  ;;  %v308_v3 = vcombine.high %v3116_v2, %v3116_v2  ;;  %s2957_s30 = smov 111   ;;  %v3132_v4 = vld [vmem:[%s5159_s1] sm:$0x7]  ;;  %v5185_v5 = vmov 14   ;;  %v5190_v6 = vmov 13   ;;  %v5183_v7 = vmov 3  }
  0x33   : > { %324 = vrot.lane.b32.xlu1 %v3116_v2, %s2955_s24  ;;  %309 = vrot.lane.b32.xlu0 %v3116_v2, %s2956_s12  ;;  %v2961_v8 = vmov 31   ;;  %v2962_v9 = vmov 30   ;;  %v5175_v10 = vmov 5   ;;  %v5168_v11 = vmov 25   ;;  %v304_v25 = vld [vmem:[%s5160_s2] sm:$0x7] }
  0x34   : > { %v5184_v12 = vmov 23   ;;  %v5170_v13 = vmov 10   ;;  %v2967_v14 = vmov 32   ;;  %v5169_v15 = vmov 8   ;;  %v3181_v29 = vld [vmem:[%s5161_s3] sm:$0x7] }
  0x35   : > { %v2969_v16 = vmov 12   ;;  %v2970_v17 = vmov 35   ;;  %v2971_v18 = vmov 21   ;;  %v5180_v19 = vmov 24   ;;  %5311 = vst [vmem:[#allocation6_spill] sm:$0xff] %v3181_v29  ;;  %s2992_s8 = smov 16  }
  0x36   : > { %v5179_v20 = vmov 7   ;;  %v5177_v21 = vmov 11   ;;  %v5174_v22 = vmov 16   ;;  %v2976_v23 = vmov 27   ;;  %v3196_v34 = vld [vmem:[%s5163_s5] sm:$0x7] }
  0x37   : > { %333 = vrot.lane.b32.xlu0 %v3116_v2, %s2957_s30  ;;  %326 = vrot.lane.b32.xlu1 %v308_v3, %s2955_s24  ;;  %v2977_v24 = vmov 34   ;;  %v2978_v26 = vmov 0   ;;  %v5178_v27 = vmov 1   ;;  %v2980_v28 = vmov 19   ;;  %5312 = vst [vmem:[#allocation7_spill] sm:$0xff] %v3196_v34  ;;  %s2993_s9 = smov 1  }
  0x38   : > { %v2981_v30 = vmov 28   ;;  %v5166_v31 = vmov 17   ;;  %v5176_v32 = vmov 2   ;;  %v5167_v33 = vmov 26   ;;  %v305_v46 = vld [vmem:[%s5162_s4] sm:$0x7] }
  0x39   : > { %v5187_v35 = vmov 6   ;;  %v5181_v36 = vmov 15   ;;  %v2987_v37 = vmov 33   ;;  %v2988_v38 = vmov 20   ;;  %s2994_s10 = smov 17   ;;  %s2995_s11 = smov 15  }
  0x3a   : > { %v2989_v39 = vmov 29   ;;  %v5172_v42 = vmov 9   ;;  %v2991_v45 = vmov 18   ;;  %v3264_v62 = vand.u32 127, %v270_v59  ;;  %s2996_s13 = smov 113   ;;  %p265_p7 = scmp.lt.s32.totalorder %s3051_s25, 1 }
  0x3b   : > { %335 = vrot.lane.b32.xlu1 %v308_v3, %s2957_s30  ;;  %311 = vrot.lane.b32.xlu0 %v308_v3, %s2956_s12  ;;  %v355_v3 = vshrl.u32 %v270_v59, 7  ;;  %vm328_vm0 = vcmask 916480   ;;  %vm337_vm1 = vcmask 908288   ;;  %vm313_vm2 = vcmask 1039360  }
  0x3c   : > { %5314 = vst [vmem:[#allocation9_spill] sm:$0xff] %v3264_v62  ;;  %vm936_vm5 = vcmask 130048   ;;  %vm1053_vm6 = vcmask 7168   ;;  %vm868_vm9 = vcmask 138240   ;;  %vm1496_vm10 = vcmask 121856   ;;  %s5689_s25 = smov (!%p265_p7, %s3051_s25), 1 }
  0x3d   : > { %vm2075_vm11 = vcmask 924672  }
  0x3f   : > { %403 = vperm.xlu0 %2812, %v3132_v4   ;;  %351 = vperm.xlu1 %2810, %v3132_v4  }
  0x43   : > { %2815 = vset.pattern.permute.xlu0 %v5185_v5  ;;  %2811 = vset.pattern.permute.xlu1 %v5190_v6 }
  0x44   : > { %467 = vperm.xlu0 %2815, %v3132_v4   ;;  %377 = vperm.xlu1 %2811, %v3132_v4  }
  0x48   : > { %2818 = vset.pattern.permute.xlu0 %v5183_v7  ;;  %2813 = vset.pattern.permute.xlu1 %v2961_v8  ;;  %v360_v8 = vsub.s32 4, %v355_v3 }
  0x49   : > { %491 = vperm.xlu0 %2818, %v3132_v4   ;;  %429 = vperm.xlu1 %2813, %v3132_v4  }
  0x4d   : > { %2821 = vset.pattern.permute.xlu0 %v2962_v9  ;;  %2814 = vset.pattern.permute.xlu1 %v5175_v10 }
  0x4e   : > { %539 = vperm.xlu0 %2821, %v3132_v4   ;;  %459 = vperm.xlu1 %2814, %v3132_v4  }
  0x52   : > { %2824 = vset.pattern.permute.xlu0 %v5168_v11  ;;  %2816 = vset.pattern.permute.xlu1 %v5184_v12 }
  0x53   : > { %575 = vperm.xlu0 %2824, %v3132_v4   ;;  %475 = vperm.xlu1 %2816, %v3132_v4  }
  0x57   : > { %2827 = vset.pattern.permute.xlu0 %v5170_v13  ;;  %2817 = vset.pattern.permute.xlu1 %v2967_v14 }
  0x58   : > { %607 = vperm.xlu0 %2827, %v3132_v4   ;;  %483 = vperm.xlu1 %2817, %v3132_v4  }
  0x5c   : > { %2830 = vset.pattern.permute.xlu0 %v5169_v15  ;;  %2819 = vset.pattern.permute.xlu1 %v2969_v16 }
  0x5d   : > { %659 = vperm.xlu0 %2830, %v3132_v4   ;;  %507 = vperm.xlu1 %2819, %v3132_v4  }
  0x61   : > { %2833 = vset.pattern.permute.xlu0 %v2970_v17  ;;  %2820 = vset.pattern.permute.xlu1 %v2971_v18  ;;  %v3280_v17 = vsub.s32 0, %v355_v3 }
  0x62   : > { %683 = vperm.xlu0 %2833, %v3132_v4   ;;  %523 = vperm.xlu1 %2820, %v3132_v4  }
  0x63   : > { %5317 = vst [vmem:[#allocation12_spill] sm:$0xff] %v3280_v17 }
  0x66   : > { %2836 = vset.pattern.permute.xlu0 %v5180_v19  ;;  %2822 = vset.pattern.permute.xlu1 %v5179_v20 }
  0x67   : > { %707 = vperm.xlu0 %2836, %v3132_v4   ;;  %559 = vperm.xlu1 %2822, %v3132_v4  }
  0x6b   : > { %2839 = vset.pattern.permute.xlu0 %v5177_v21  ;;  %2823 = vset.pattern.permute.xlu1 %v5174_v22 }
  0x6c   : > { %731 = vperm.xlu0 %2839, %v3132_v4   ;;  %567 = vperm.xlu1 %2823, %v3132_v4  }
  0x70   : > { %2844 = vset.pattern.permute.xlu0 %v2976_v23  ;;  %2825 = vset.pattern.permute.xlu1 %v2977_v24  ;;  %v412_v23 = vsub.s32 6, %v355_v3  ;;  %v386_v24 = vsub.s32 5, %v355_v3 }
  0x71   : > { %803 = vperm.xlu0 %2844, %v3132_v4   ;;  %583 = vperm.xlu1 %2825, %v3132_v4  }
  0x72   : > { %v387_v11 = vrot.slane %v3116_v2, %v386_v24 }
  0x75   : > { %2845 = vset.pattern.permute.xlu0 %v2978_v26  ;;  %2826 = vset.pattern.permute.xlu1 %v5178_v27 }
  0x76   : > { %346 = vperm.xlu0 %2845, %v304_v25   ;;  %591 = vperm.xlu1 %2826, %v3132_v4   ;;  %v5171_v25 = vand.u32 15, %v3264_v62 }
  0x78   : > { %vm3309_vm3 = vcmp.eq.s32.totalorder %v5171_v25, 15 }
  0x7a   : > { %755 = vperm.xlu0 %2845, %v3132_v4   ;;  %2828 = vset.pattern.permute.xlu1 %v2980_v28 }
  0x7b   : > { %623 = vperm.xlu1 %2828, %v3132_v4  }
  0x7e   : > { %881 = vperm.xlu0 %2845, %v3181_v29  }
  0x7f   : > { %2829 = vset.pattern.permute.xlu1 %v2981_v30  ;;  %v438_v30 = vsub.s32 7, %v355_v3 }
  0x80   : > { %639 = vperm.xlu1 %2829, %v3132_v4  }
  0x81   : > { %v439_v24 = vrot.slane %v3116_v2, %v438_v30 }
  0x82   : > { %2851 = vset.pattern.permute.xlu0 %v5178_v27 }
  0x83   : > { %942 = vperm.xlu0 %2851, %v3181_v29  }
  0x84   : > { %2831 = vset.pattern.permute.xlu1 %v5166_v31  ;;  %v413_v31 = vrot.slane %v3116_v2, %v412_v23  ;;  %v5325_v23 = vmov 0 }
  0x85   : > { %667 = vperm.xlu1 %2831, %v3132_v4  }
  0x87   : > { %2854 = vset.pattern.permute.xlu0 %v5176_v32 }
  0x88   : > { %998 = vperm.xlu0 %2854, %v3181_v29  }
  0x89   : > { %2832 = vset.pattern.permute.xlu1 %v5167_v33 }
  0x8a   : > { %675 = vperm.xlu1 %2832, %v3132_v4  }
  0x8c   : > { %2855 = vset.pattern.permute.xlu0 %v2954_v1 }
  0x8d   : > { %837 = vperm.xlu0 %2855, %v3196_v34  }
  0x8e   : > { %2834 = vset.pattern.permute.xlu1 %v5187_v35 }
  0x8f   : > { %691 = vperm.xlu1 %2834, %v3132_v4  }
  0x91   : > { %1111 = vperm.xlu0 %2855, %v3181_v29  }
  0x93   : > { %2835 = vset.pattern.permute.xlu1 %v5181_v36 }
  0x94   : > { %699 = vperm.xlu1 %2835, %v3132_v4  }
  0x95   : > { %2862 = vset.pattern.permute.xlu0 %v5175_v10 }
  0x98   : > { %2837 = vset.pattern.permute.xlu1 %v2987_v37  ;;  %v357_v37 = vrot.slane %v3116_v2, %v3280_v17 }
  0x99   : > { %715 = vperm.xlu1 %2837, %v3132_v4  }
  0x9d   : > { %2838 = vset.pattern.permute.xlu1 %v5176_v32 }
  0x9e   : > { %723 = vperm.xlu1 %2838, %v3132_v4  }
  0xa2   : > { %2840 = vset.pattern.permute.xlu1 %v2988_v38 }
  0xa3   : > { %739 = vperm.xlu1 %2840, %v3132_v4  }
  0xa5   : > { %v3212_v40 = vpop.permute.xlu1 %324  ;;  %v3214_v41 = vpop.permute.xlu0 %309 }
  0xa7   : > { %2841 = vset.pattern.permute.xlu1 %v2989_v39  ;;  %v3289_v39 = vsub.s32 1, %v355_v3 }
  0xa8   : > { %747 = vperm.xlu1 %2841, %v3132_v4  }
  0xa9   : > { %v3218_v43 = vpop.permute.xlu1 %326  ;;  %v3220_v44 = vpop.permute.xlu0 %333  ;;  %5319 = vst [vmem:[#allocation14_spill] sm:$0xff] %v3289_v39  ;;  %v383_v33 = vrot.slane %v3116_v2, %v3289_v39 }
  0xaa   : > { %v332_v22 = vsel %vm328_vm0, %v3218_v43, 0.0 }
  0xac   : > { %2842 = vset.pattern.permute.xlu1 %v5172_v42 }
  0xad   : > { %771 = vperm.xlu1 %2842, %v3132_v4   ;;  %v3226_v47 = vpop.permute.xlu0 %311  ;;  %v3228_v48 = vpop.permute.xlu1 %335 }
  0xae   : > { %5313 = vst [vmem:[#allocation8_spill] sm:$0xff] %v3228_v48  ;;  %v314_v25 = vsel %vm313_vm2, %v3214_v41, %v3226_v47 }
  0xb1   : > { %2843 = vset.pattern.permute.xlu1 %v2991_v45 }
  0xb2   : > { %787 = vperm.xlu1 %2843, %v3132_v4   ;;  %v3273_v4 = vadd.s32 128, %v3264_v62 }
  0xb4   : > { %5315 = vst [vmem:[#allocation10_spill] sm:$0xff] %v3273_v4 }
  0xb6   : > { %2846 = vset.pattern.permute.xlu1 %v2978_v26  ;;  %v5173_v26 = vand.u32 15, %v3273_v4 }
  0xb7   : > { %824 = vperm.xlu1 %2846, %v305_v46   ;;  %v361_v46 = vrot.slane %v3116_v2, %v360_v8  ;;  %v5322_v8 = vmov 0 }
  0xb8   : > { %v5323_v8 = vsel %vm3309_vm3, 4294967295, %v5322_v8  ;;  %vm3315_vm4 = vcmp.eq.s32.totalorder %v5173_v26, 15  ;;  %v3330_v26 = vrot.slane %v357_v37, %v3280_v17  ;;  %v3350_v37 = vrot.slane %v387_v11, %v3289_v39 }
  0xb9   : > { %5324 = vst [vmem:[#allocation17_spill] sm:$0xff] %v5323_v8  ;;  %v5326_v23 = vsel %vm3315_vm4, 4294967295, %v5325_v23  ;;  %v3338_v30 = vrot.slane %v361_v46, %v3280_v17 }
  0xba   : > { %v3230_v49 = vpop.permute.xlu1 %351  ;;  %v3232_v50 = vpop.permute.xlu0 %403  ;;  %5327 = vst [vmem:[#allocation18_spill] sm:$0xff] %v5326_v23  ;;  %5328 = vst [vmem:[#allocation19_spill] sm:$0xff] %v3330_v26  ;;  %v5342_v23 = vmov 13  }
  0xbb   : > { %829 = vperm.xlu1 %2846, %v3196_v34   ;;  %5329 = vst [vmem:[#allocation20_spill] sm:$0xff] %v3338_v30  ;;  %5333 = vst [vmem:[#allocation24_spill] sm:$0xff] %v3350_v37  ;;  %v372_v12 = vmul.f32 %v3330_v26, %v3230_v49  ;;  %v373_v5 = vmul.f32 %v3338_v30, %v3230_v49 }
  0xbf   : > { %2847 = vset.pattern.permute.xlu1 %v5169_v15  ;;  %v3236_v51 = vpop.permute.xlu1 %377  ;;  %v3238_v52 = vpop.permute.xlu0 %467 }
  0xc0   : > { %845 = vperm.xlu1 %2847, %v3196_v34   ;;  %v399_v49 = vmul.f32 %v3350_v37, %v3236_v51 }
  0xc4   : > { %2848 = vset.pattern.permute.xlu1 %v2969_v16  ;;  %v3242_v53 = vpop.permute.xlu1 %429  ;;  %v3244_v54 = vpop.permute.xlu0 %491 }
  0xc5   : > { %853 = vperm.xlu1 %2848, %v3196_v34  }
  0xc9   : > { %2849 = vset.pattern.permute.xlu1 %v5172_v42  ;;  %v3248_v55 = vpop.permute.xlu1 %459  ;;  %v3250_v56 = vpop.permute.xlu0 %539  ;;  %v317_v42 = vsel %vm313_vm2, %v3226_v47, 0.0  ;;  %v3347_v47 = vrot.slane %v383_v33, %v3289_v39 }
  0xca   : > { %897 = vperm.xlu1 %2849, %v3181_v29   ;;  %v323_v46 = vsel %vm3315_vm4, 0.0, %v317_v42 }
  0xcb   : > { %5332 = vst [vmem:[#allocation23_spill] sm:$0xff] %v3347_v47  ;;  %v3398_v27 = vrot.slane %v323_v46, %v3280_v17  ;;  %v398_v4 = vmul.f32 %v3347_v47, %v3236_v51 }
  0xcd   : > { %5339 = vst [vmem:[#allocation30_spill] sm:$0xff] %v3398_v27 }
  0xce   : > { %2850 = vset.pattern.permute.xlu1 %v2991_v45  ;;  %v3253_v57 = vpop.permute.xlu1 %475  ;;  %v3255_v58 = vpop.permute.xlu0 %575  ;;  %v3291_v45 = vsub.s32 3, %v355_v3 }
  0xcf   : > { %913 = vperm.xlu1 %2850, %v3181_v29  }
  0xd0   : > { %5320 = vst [vmem:[#allocation15_spill] sm:$0xff] %v3291_v45  ;;  %v435_v15 = vrot.slane %v3116_v2, %v3291_v45  ;;  %v3392_v32 = vrot.slane %v332_v22, %v3291_v45  ;;  %v3404_v19 = vrot.slane %v323_v46, %v3291_v45 }
  0xd3   : > { %2852 = vset.pattern.permute.xlu1 %v5170_v13  ;;  %v3259_v60 = vpop.permute.xlu1 %483  ;;  %v3261_v61 = vpop.permute.xlu0 %607 }
  0xd4   : > { %958 = vperm.xlu1 %2852, %v3181_v29  }
  0xd8   : > { %2853 = vset.pattern.permute.xlu1 %v2980_v28  ;;  %v3267_v63 = vpop.permute.xlu1 %507  ;;  %v3269_v1 = vpop.permute.xlu0 %659  ;;  %v3285_v28 = vsub.s32 2, %v355_v3 }
  0xd9   : > { %974 = vperm.xlu1 %2853, %v3181_v29  }
  0xda   : > { %5318 = vst [vmem:[#allocation13_spill] sm:$0xff] %v3285_v28  ;;  %v409_v59 = vrot.slane %v3116_v2, %v3285_v28  ;;  %v338_v2 = vsel %vm337_vm1, %v3220_v44, %v3228_v48  ;;  %v3344_v41 = vrot.slane %v413_v31, %v3285_v28  ;;  %v322_v44 = vsel %vm3309_vm3, 0.0, %v314_v25 }
  0xdb   : > { %v3373_v25 = vrot.slane %v332_v22, %v3289_v39  ;;  %v3401_v20 = vrot.slane %v322_v44, %v3291_v45  ;;  %v3407_v36 = vrot.slane %v322_v44, %v3289_v39  ;;  %v3424_v0 = vrot.slane %v323_v46, %v3285_v28 }
  0xdc   : > { %5331 = vst [vmem:[#allocation22_spill] sm:$0xff] %v3344_v41  ;;  %v425_v8 = vmul.f32 %v3344_v41, %v3232_v50 }
  0xdd   : > { %2856 = vset.pattern.permute.xlu1 %v5177_v21  ;;  %v3276_v9 = vpop.permute.xlu1 %523  ;;  %v3278_v14 = vpop.permute.xlu0 %683  ;;  %v3395_v21 = vrot.slane %v322_v44, %v3280_v17 }
  0xde   : > { %5316 = vst [vmem:[#allocation11_spill] sm:$0xff] %v3278_v14  ;;  %1014 = vperm.xlu1 %2856, %v3181_v29  }
  0xdf   : > { %5338 = vst [vmem:[#allocation29_spill] sm:$0xff] %v3395_v21  ;;  %v502_v51 = vmul.f32 %v3395_v21, %v3244_v54 }
  0xe2   : > { %v3302_v13 = vpop.permute.xlu0 %707  ;;  %2857 = vset.pattern.permute.xlu1 %v2988_v38  ;;  %v3305_v3 = vpop.permute.xlu1 %559  ;;  %v329_v38 = vsel %vm328_vm0, %v3212_v40, %v3218_v43  ;;  %v3341_v40 = vrot.slane %v409_v59, %v3285_v28  ;;  %v3353_v43 = vrot.slane %v435_v15, %v3291_v45  ;;  %v3360_v59 = vrot.slane %v439_v24, %v3291_v45 }
  0xe3   : > { %5321 = vst [vmem:[#allocation16_spill] sm:$0xff] %v3302_v13  ;;  %1030 = vperm.xlu1 %2857, %v3181_v29   ;;  %v3363_v31 = vrot.slane %v329_v38, %v3289_v39  ;;  %v3370_v15 = vsel %vm3309_vm3, 0.0, %v338_v2  ;;  %v3377_v42 = vrot.slane %v329_v38, %v3280_v17  ;;  %v3380_v24 = vrot.slane %v332_v22, %v3280_v17 }
  0xe4   : > { %5330 = vst [vmem:[#allocation21_spill] sm:$0xff] %v3341_v40  ;;  %5334 = vst [vmem:[#allocation25_spill] sm:$0xff] %v3353_v43  ;;  %v3383_v10 = vrot.slane %v329_v38, %v3285_v28  ;;  %v3389_v2 = vrot.slane %v329_v38, %v3291_v45  ;;  %v3410_v38 = vrot.slane %v323_v46, %v3289_v39 }
  0xe5   : > { %5335 = vst [vmem:[#allocation26_spill] sm:$0xff] %v3360_v59  ;;  %5337 = vst [vmem:[#allocation28_spill] sm:$0xff] %v3370_v15  ;;  %v809_v7 = vrot.slane %v3370_v15, %v3291_v45  ;;  %v424_v35 = vmul.f32 %v3341_v40, %v3232_v50  ;;  %v470_v46 = vmul.f32 %v3238_v52, %v3347_v47 }
  0xe6   : > { %v450_v50 = vmul.f32 %v3353_v43, %v3242_v53  ;;  %v451_v34 = vmul.f32 %v3360_v59, %v3242_v53  ;;  %v479_v45 = vmul.f32 %v3253_v57, %v3344_v41  ;;  %v578_v53 = vmul.f32 %v3255_v58, %v3341_v40 }
  0xe7   : > { %v3365_v33 = vpop.permute.xlu0 %731  ;;  %2858 = vset.pattern.permute.xlu1 %v2969_v16  ;;  %v568_v11 = vpop.permute.xlu1 %567  ;;  %v3386_v16 = vrot.slane %v332_v22, %v3285_v28  ;;  %v3413_v22 = vrot.slane %v322_v44, %v3285_v28  ;;  %v579_v28 = vmul.f32 %v3255_v58, %v3344_v41  ;;  %v487_v39 = vmul.f32 %v3259_v60, %v3360_v59 }
  0xe8   : > { %5336 = vst [vmem:[#allocation27_spill] sm:$0xff] %v3365_v33  ;;  %1077 = vperm.xlu1 %2858, %v3181_v29   ;;  %v563_v15 = vmul.f32 %v3305_v3, %v3338_v30  ;;  %v571_v13 = vmul.f32 %v568_v11, %v3350_v37 }
  0xec   : > { %v3426_v6 = vpop.permute.xlu0 %803  ;;  %2859 = vset.pattern.permute.xlu1 %v2971_v18  ;;  %v584_v44 = vpop.permute.xlu1 %583  ;;  %v471_v18 = vmul.f32 %v3238_v52, %v3350_v37  ;;  %v478_v52 = vmul.f32 %v3253_v57, %v3341_v40 }
  0xed   : > { %5340 = vst [vmem:[#allocation31_spill] sm:$0xff] %v3426_v6  ;;  %v3436_v62 = vmul.f32 %v809_v7, %v3426_v6  ;;  %1093 = vperm.xlu1 %2859, %v3181_v29   ;;  %v503_v7 = vmul.f32 %v3398_v27, %v3244_v54  ;;  %v463_v6 = vmul.f32 %v3248_v55, %v3338_v30 }
  0xee   : > { %v486_v54 = vmul.f32 %v3259_v60, %v3353_v43  ;;  %v570_v60 = vmul.f32 %v568_v11, %v3347_v47 }
  0xef   : > { %5341 = vst [vmem:[#allocation32_spill] sm:$0xff] %v3436_v62  ;;  %v462_v62 = vmul.f32 %v3248_v55, %v3330_v26  ;;  %v562_v55 = vmul.f32 %v3305_v3, %v3330_v26 }
  0xf1   : > { %v3471_v17 = vpop.permute.xlu0 %346  ;;  %v592_v57 = vpop.permute.xlu1 %591  ;;  %2860 = vset.pattern.permute.xlu1 %v5342_v23 }
  0xf2   : > { %v374_v48 = vadd.f32 %v372_v12, %v3471_v17  ;;  %v375_v58 = vadd.f32 %v373_v5, %v3471_v17  ;;  %v464_v33 = vadd.f32 %v462_v62, %v3471_v17  ;;  %v465_v29 = vadd.f32 %v463_v6, %v3471_v17 }
  0xf3   : > { %v564_v27 = vadd.f32 %v562_v55, %v3471_v17  ;;  %v565_v3 = vadd.f32 %v563_v15, %v3471_v17  ;;  %v518_v12 = vmul.f32 %v3407_v36, %v3267_v63  ;;  %v519_v5 = vmul.f32 %v3410_v38, %v3267_v63 }
  0xf4   : > { %v400_v21 = vadd.f32 %v398_v4, %v374_v48  ;;  %v401_v14 = vadd.f32 %v399_v49, %v375_v58  ;;  %v472_v41 = vadd.f32 %v470_v46, %v464_v33  ;;  %v473_v23 = vadd.f32 %v471_v18, %v465_v29 }
  0xf5   : > { %v572_v62 = vadd.f32 %v570_v60, %v564_v27  ;;  %v573_v6 = vadd.f32 %v571_v13, %v565_v3  ;;  %v586_v55 = vmul.f32 %v584_v44, %v3353_v43  ;;  %v587_v48 = vmul.f32 %v584_v44, %v3360_v59 }
  0xf6   : > { %v426_v40 = vadd.f32 %v424_v35, %v400_v21  ;;  %v427_v47 = vadd.f32 %v425_v8, %v401_v14  ;;  %v480_v30 = vadd.f32 %v478_v52, %v472_v41  ;;  %v481_v11 = vadd.f32 %v479_v45, %v473_v23  ;;  %v624_v37 = vpop.permute.xlu1 %623 }
  0xf7   : > { %v580_v4 = vadd.f32 %v578_v53, %v572_v62  ;;  %v581_v33 = vadd.f32 %v579_v28, %v573_v6  ;;  %v602_v27 = vmul.f32 %v3377_v42, %v592_v57  ;;  %v603_v13 = vmul.f32 %v3380_v24, %v592_v57 }
  0xf8   : > { %v452_v29 = vadd.f32 %v450_v50, %v426_v40  ;;  %v453_v15 = vadd.f32 %v451_v34, %v427_v47  ;;  %v488_v49 = vadd.f32 %v486_v54, %v480_v30  ;;  %v489_v46 = vadd.f32 %v487_v39, %v481_v11 }
  0xf9   : > { %v588_v18 = vadd.f32 %v586_v55, %v580_v4  ;;  %v589_v58 = vadd.f32 %v587_v48, %v581_v33  ;;  %v618_v45 = vmul.f32 %v3363_v31, %v3261_v61  ;;  %v619_v28 = vmul.f32 %v3373_v25, %v3261_v61  ;;  %v5344_v4 = vld [vmem:[#allocation23_spill] sm:$0xff] }
  0xfa   : > { %v454_v21 = vmax.f32 %v452_v29, 0.0  ;;  %v455_v35 = vmax.f32 %v453_v15, 0.0  ;;  %v504_v63 = vadd.f32 %v502_v51, %v488_v49  ;;  %v505_v14 = vadd.f32 %v503_v7, %v489_v46  ;;  %v5345_v29 = vld [vmem:[#allocation24_spill] sm:$0xff] }
  0xfb   : > { %v604_v8 = vadd.f32 %v602_v27, %v588_v18  ;;  %v605_v34 = vadd.f32 %v603_v13, %v589_v58  ;;  %v640_v23 = vpop.permute.xlu1 %639  ;;  %v534_v39 = vmul.f32 %v3413_v22, %v3276_v9  ;;  %v535_v30 = vmul.f32 %v3424_v0, %v3276_v9 }
  0xfc   : > { %456 = vst [vmem:[#allocation2 + $0x30] sm:$0x7] %v454_v21  ;;  %457 = vst [vmem:[#allocation2] sm:$0x7] %v455_v35  ;;  %v520_v40 = vadd.f32 %v518_v12, %v504_v63  ;;  %v521_v41 = vadd.f32 %v519_v5, %v505_v14  ;;  %v634_v50 = vmul.f32 %v3383_v10, %v624_v37  ;;  %v5343_v12 = vld [vmem:[#allocation20_spill] sm:$0xff]  ;;  %v5346_v21 = vld [vmem:[#allocation21_spill] sm:$0xff] }
  0xfd   : > { %v620_v47 = vadd.f32 %v618_v45, %v604_v8  ;;  %v621_v44 = vadd.f32 %v619_v28, %v605_v34  ;;  %v635_v51 = vmul.f32 %v3386_v16, %v624_v37  ;;  %v550_v61 = vmul.f32 %v3401_v20, %v3250_v56  ;;  %v5347_v63 = vld [vmem:[#allocation22_spill] sm:$0xff]  ;;  %v5348_v8 = vld [vmem:[#allocation11_spill] sm:$0xff] }
  0xfe   : > { %v551_v7 = vmul.f32 %v3404_v19, %v3250_v56  ;;  %v536_v52 = vadd.f32 %v534_v39, %v520_v40  ;;  %v537_v53 = vadd.f32 %v535_v30, %v521_v41  ;;  %v650_v57 = vmul.f32 %v3389_v2, %v640_v23  ;;  %v5349_v40 = vld [vmem:[#allocation29_spill] sm:$0xff] }
  0xff   : > { %v636_v54 = vadd.f32 %v634_v50, %v620_v47  ;;  %v637_v9 = vadd.f32 %v635_v51, %v621_v44  ;;  %v651_v60 = vmul.f32 %v3392_v32, %v640_v23  ;;  %v662_v3 = vmul.f32 %v3269_v1, %v3330_v26  ;;  %v5350_v47 = vld [vmem:[#allocation30_spill] sm:$0xff] }
 0x100   : > { %v663_v37 = vmul.f32 %v3269_v1, %v5343_v12  ;;  %v552_v5 = vadd.f32 %v550_v61, %v536_v52  ;;  %v553_v62 = vadd.f32 %v551_v7, %v537_v53  ;;  %v668_v6 = vpop.permute.xlu1 %667  ;;  %v686_v34 = vmul.f32 %v5348_v8, %v3353_v43 }
 0x101   : > { %v652_v11 = vadd.f32 %v650_v57, %v636_v54  ;;  %v653_v55 = vadd.f32 %v651_v60, %v637_v9  ;;  %v670_v33 = vmul.f32 %v668_v6, %v5344_v4  ;;  %v671_v15 = vmul.f32 %v668_v6, %v5345_v29 }
 0x102   : > { %v554_v56 = vmax.f32 %v552_v5, 0.0  ;;  %v555_v48 = vmax.f32 %v553_v62, 0.0  ;;  %v664_v18 = vadd.f32 %v662_v3, %v3471_v17  ;;  %v665_v58 = vadd.f32 %v663_v37, %v3471_v17  ;;  %v5354_v37 = vld [vmem:[#allocation16_spill] sm:$0xff]  ;;  %v5355_v62 = vld [vmem:[#allocation6_spill] sm:$0xff] }
 0x103   : > { %v654_v49 = vmax.f32 %v652_v11, 0.0  ;;  %v655_v46 = vmax.f32 %v653_v55, 0.0  ;;  %v687_v23 = vmul.f32 %v5348_v8, %v3360_v59  ;;  %v710_v5 = vmul.f32 %v5354_v37, %v3413_v22 }
 0x104   : > { %556 = vst [vmem:[#allocation2 + $0x18] sm:$0x7] %v554_v56  ;;  %557 = vst [vmem:[#allocation2 + $0x10] sm:$0x7] %v555_v48  ;;  %v672_v27 = vadd.f32 %v670_v33, %v664_v18  ;;  %v673_v13 = vadd.f32 %v671_v15, %v665_v58  ;;  %v5356_v33 = vmov 22   ;;  %v5358_v58 = vld [vmem:[#allocation27_spill] sm:$0xff] }
 0x105   : > { %656 = vst [vmem:[#allocation2 + $0x8] sm:$0x7] %v654_v49  ;;  %657 = vst [vmem:[#allocation2 + $0x20] sm:$0x7] %v655_v46  ;;  %v676_v1 = vpop.permute.xlu1 %675  ;;  %v5357_v46 = vmov 6  }
 0x106   : > { %v678_v35 = vmul.f32 %v676_v1, %v5346_v21  ;;  %v679_v14 = vmul.f32 %v676_v1, %v5347_v63  ;;  %v734_v1 = vmul.f32 %v5358_v58, %v3363_v31 }
 0x108   : > { %v680_v45 = vadd.f32 %v678_v35, %v672_v27  ;;  %v681_v28 = vadd.f32 %v679_v14, %v673_v13  ;;  %v5359_v13 = vmov 14   ;;  %v5360_v35 = vld [vmem:[#allocation8_spill] sm:$0xff] }
 0x109   : > { %v341_v14 = vsel %vm337_vm1, %v5360_v35, 0.0 }
 0x10a   : > { %v692_v39 = vpop.permute.xlu1 %691  ;;  %v688_v30 = vadd.f32 %v686_v34, %v680_v45  ;;  %v689_v17 = vadd.f32 %v687_v23, %v681_v28  ;;  %v756_v45 = vpop.permute.xlu0 %755  ;;  %v343_v23 = vsel %vm3315_vm4, 0.0, %v341_v14 }
 0x10b   : > { %v694_v41 = vmul.f32 %v692_v39, %v5349_v40  ;;  %v695_v44 = vmul.f32 %v692_v39, %v5350_v47  ;;  %v3532_v9 = vld [vmem:[#allocation2 + $0x10] sm:$0x7]  ;;  %v3536_v57 = vld [vmem:[#allocation2 + $0x18] sm:$0x7]  ;;  %v5364_v47 = vld [vmem:[#allocation28_spill] sm:$0xff] }
 0x10c   : > { %v3522_v50 = vld [vmem:[#allocation2 + $0x20] sm:$0x7]  ;;  %v3524_v51 = vld [vmem:[#allocation2 + $0x8] sm:$0x7]  ;;  %5353 = vst [vmem:[#allocation30_spill] sm:$0xff] %v3532_v9 }
 0x10d   : > { %5351 = vst [vmem:[#allocation11_spill] sm:$0xff] %v3522_v50  ;;  %5352 = vst [vmem:[#allocation29_spill] sm:$0xff] %v3524_v51  ;;  %934 = vrot.lane.b32.xlu1 %v3522_v50, %s2992_s8  ;;  %932 = vrot.lane.b32.xlu0 %v3524_v51, %s2992_s8  ;;  %v696_v7 = vadd.f32 %v694_v41, %v688_v30  ;;  %v697_v52 = vadd.f32 %v695_v44, %v689_v17  ;;  %v5363_v41 = vld [vmem:[#allocation12_spill] sm:$0xff]  ;;  %v5414_v50 = vmov 0 }
 0x10e   : > { %v3564_v39 = vpop.permute.xlu0 %881  ;;  %v761_v44 = vrot.slane %v5364_v47, %v5363_v41 }
 0x10f   : > { %v700_v61 = vpop.permute.xlu1 %699  ;;  %5362 = vst [vmem:[#allocation16_spill] sm:$0xff] %v3564_v39 }
 0x110   : > { %v702_v53 = vmul.f32 %v700_v61, %v3407_v36  ;;  %v703_v54 = vmul.f32 %v700_v61, %v3410_v38  ;;  %v711_v36 = vmul.f32 %v5354_v37, %v3424_v0  ;;  %v765_v61 = vrot.slane %v343_v23, %v5363_v41 }
 0x111   : > { %1051 = vrot.lane.b32.xlu1 %v3532_v9, %s2993_s9  ;;  %1049 = vrot.lane.b32.xlu0 %v3536_v57, %s2993_s9 }
 0x112   : > { %v704_v60 = vadd.f32 %v702_v53, %v696_v7  ;;  %v705_v3 = vadd.f32 %v703_v54, %v697_v52  ;;  %v767_v52 = vmul.f32 %v765_v61, %v756_v45  ;;  %v5365_v53 = vld [vmem:[#allocation14_spill] sm:$0xff]  ;;  %v3574_v37 = vpop.permute.xlu0 %942 }
 0x113   : > { %v777_v54 = vrot.slane %v5364_v47, %v5365_v53  ;;  %5366 = vst [vmem:[#allocation6_spill] sm:$0xff] %v3574_v37 }
 0x114   : > { %v716_v38 = vpop.permute.xlu1 %715  ;;  %v712_v6 = vadd.f32 %v710_v5, %v704_v60  ;;  %v713_v55 = vadd.f32 %v711_v36, %v705_v3  ;;  %v781_v60 = vrot.slane %v343_v23, %v5365_v53 }
 0x115   : > { %1127 = vperm.xlu1 %2860, %v5355_v62   ;;  %v718_v11 = vmul.f32 %v716_v38, %v3401_v20  ;;  %1159 = vperm.xlu0 %2862, %v5355_v62   ;;  %v719_v56 = vmul.f32 %v716_v38, %v3404_v19  ;;  %v735_v19 = vmul.f32 %v5358_v58, %v3373_v25  ;;  %v5367_v38 = vld [vmem:[#allocation13_spill] sm:$0xff] }
 0x117   : > { %v720_v48 = vadd.f32 %v718_v11, %v712_v6  ;;  %v721_v49 = vadd.f32 %v719_v56, %v713_v55  ;;  %v793_v6 = vrot.slane %v5364_v47, %v5367_v38  ;;  %v797_v11 = vrot.slane %v343_v23, %v5367_v38  ;;  %v5368_v55 = vld [vmem:[#allocation15_spill] sm:$0xff] }
 0x118   : > { %v813_v56 = vrot.slane %v343_v23, %v5368_v55 }
 0x119   : > { %2861 = vset.pattern.permute.xlu1 %v5356_v33  ;;  %v724_v15 = vpop.permute.xlu1 %723  ;;  %2865 = vset.pattern.permute.xlu0 %v5357_v46 }
 0x11a   : > { %1143 = vperm.xlu1 %2861, %v5355_v62   ;;  %v726_v0 = vmul.f32 %v724_v15, %v3377_v42  ;;  %v727_v22 = vmul.f32 %v724_v15, %v3380_v24 }
 0x11c   : > { %v728_v18 = vadd.f32 %v726_v0, %v720_v48  ;;  %v729_v20 = vadd.f32 %v727_v22, %v721_v49  ;;  %v5369_v22 = vld [vmem:[#allocation31_spill] sm:$0xff] }
 0x11e   : > { %v740_v27 = vpop.permute.xlu1 %739  ;;  %2863 = vset.pattern.permute.xlu1 %v5359_v13  ;;  %v736_v42 = vadd.f32 %v734_v1, %v728_v18  ;;  %v737_v28 = vadd.f32 %v735_v19, %v729_v20  ;;  %v815_v18 = vmul.f32 %v813_v56, %v5369_v22  ;;  %v3581_v20 = vpop.permute.xlu0 %998  ;;  %v5371_v19 = vld [vmem:[#allocation32_spill] sm:$0xff]  ;;  %v5379_v56 = vld [vmem:[#allocation7_spill] sm:$0xff]  ;;  %v5385_v22 = vmov 11  }
 0x11f   : > { %v742_v24 = vmul.f32 %v740_v27, %v3383_v10  ;;  %v743_v8 = vmul.f32 %v740_v27, %v3386_v16  ;;  %v766_v16 = vmul.f32 %v761_v44, %v756_v45  ;;  %5370 = vst [vmem:[#allocation27_spill] sm:$0xff] %v3581_v20 }
 0x121   : > { %v744_v25 = vadd.f32 %v742_v24, %v736_v42  ;;  %v745_v30 = vadd.f32 %v743_v8, %v737_v28 }
 0x122   : > { %v838_v28 = vpop.permute.xlu0 %837 }
 0x123   : > { %v748_v31 = vpop.permute.xlu1 %747  ;;  %v840_v8 = vmul.f32 %v838_v28, %v5344_v4  ;;  %v841_v23 = vmul.f32 %v838_v28, %v5345_v29  ;;  %v5391_v28 = vmov 9  }
 0x124   : > { %v750_v17 = vmul.f32 %v748_v31, %v3389_v2  ;;  %v751_v40 = vmul.f32 %v748_v31, %v3392_v32 }
 0x126   : > { %v752_v10 = vadd.f32 %v750_v17, %v744_v25  ;;  %v753_v7 = vadd.f32 %v751_v40, %v745_v30 }
 0x128   : > { %v772_v3 = vpop.permute.xlu1 %771  ;;  %v768_v2 = vadd.f32 %v766_v16, %v752_v10  ;;  %v769_v5 = vadd.f32 %v767_v52, %v753_v7 }
 0x129   : > { %v782_v32 = vmul.f32 %v777_v54, %v772_v3  ;;  %v783_v36 = vmul.f32 %v781_v60, %v772_v3 }
 0x12b   : > { %v784_v33 = vadd.f32 %v782_v32, %v768_v2  ;;  %v785_v15 = vadd.f32 %v783_v36, %v769_v5  ;;  %v5375_v36 = vmov 23  }
 0x12d   : > { %v788_v48 = vpop.permute.xlu1 %787 }
 0x12e   : > { %v798_v49 = vmul.f32 %v793_v6, %v788_v48  ;;  %v799_v0 = vmul.f32 %v797_v11, %v788_v48  ;;  %v5376_v6 = vmov 3   ;;  %v5377_v11 = vmov 15  }
 0x130   : > { %v800_v58 = vadd.f32 %v798_v49, %v784_v33  ;;  %v801_v1 = vadd.f32 %v799_v0, %v785_v15  ;;  %v5381_v33 = vmov 24   ;;  %v5382_v15 = vmov 7  }
 0x131   : > { %v5383_v49 = vmov 1  }
 0x132   : > { %v816_v27 = vadd.f32 %v5371_v19, %v800_v58  ;;  %v817_v35 = vadd.f32 %v815_v18, %v801_v1  ;;  %v3584_v14 = vpop.permute.xlu1 %824  ;;  %v5386_v18 = vmov 2   ;;  %v5388_v1 = vmov 5  }
 0x133   : > { %5372 = vst [vmem:[#allocation8_spill] sm:$0xff] %v3584_v14 }
 0x134   : > { %v818_v45 = vmax.f32 %v816_v27, 0.0  ;;  %v819_v42 = vmax.f32 %v817_v35, 0.0  ;;  %v3648_v27 = vld [vmem:[#allocation2 + $0x8] sm:$0x7]  ;;  %v5389_v35 = vmov 16  }
 0x136   : > { %820 = vst [vmem:[#allocation2 + $0x28] sm:$0x7] %v818_v45  ;;  %821 = vst [vmem:[#allocation2 + $0x38] sm:$0x7] %v819_v42  ;;  %v830_v24 = vpop.permute.xlu1 %829 }
 0x137   : > { %v832_v31 = vmul.f32 %v830_v24, %v3330_v26  ;;  %v833_v25 = vmul.f32 %v830_v24, %v5343_v12  ;;  %v5392_v24 = vmov 10  }
 0x139   : > { %v834_v30 = vadd.f32 %v832_v31, %v3584_v14  ;;  %v835_v17 = vadd.f32 %v833_v25, %v3584_v14  ;;  %v5409_v14 = vmov 0 }
 0x13b   : > { %v842_v40 = vadd.f32 %v840_v8, %v834_v30  ;;  %v843_v47 = vadd.f32 %v841_v23, %v835_v17  ;;  %v846_v44 = vpop.permute.xlu1 %845  ;;  %v3669_v8 = vld [vmem:[#allocation2 + $0x30] sm:$0x7]  ;;  %v5393_v23 = vmov 13   ;;  %v3681_v30 = vpop.permute.xlu0 %1111 }
 0x13c   : > { %v848_v61 = vmul.f32 %v846_v44, %v5346_v21  ;;  %v849_v10 = vmul.f32 %v846_v44, %v5347_v63  ;;  %v3683_v17 = vld [vmem:[#allocation2 + $0x30] sm:$0x7]  ;;  %v2257_v29 = vrot.slane %v3669_v8, %v5363_v41 }
 0x13d   : > { %v3594_v7 = vld [vmem:[#allocation2 + $0x38] sm:$0x7]  ;;  %v3596_v16 = vld [vmem:[#allocation2 + $0x28] sm:$0x7]  ;;  %5394 = vst [vmem:[#allocation7_spill] sm:$0xff] %v3683_v17 }
 0x13e   : > { %5373 = vst [vmem:[#allocation12_spill] sm:$0xff] %v3594_v7  ;;  %5374 = vst [vmem:[#allocation28_spill] sm:$0xff] %v3596_v16  ;;  %v850_v52 = vadd.f32 %v848_v61, %v842_v40  ;;  %v851_v54 = vadd.f32 %v849_v10, %v843_v47  ;;  %866 = vrot.lane.b32.xlu1 %v3594_v7, %s2994_s10  ;;  %864 = vrot.lane.b32.xlu0 %v3596_v16, %s2994_s10  ;;  %v3655_v45 = vld [vmem:[#allocation2 + $0x28] sm:$0x7] }
 0x13f   : > { %5390 = vst [vmem:[#allocation32_spill] sm:$0xff] %v3655_v45  ;;  %v3674_v31 = vld [vmem:[#allocation2 + $0x28] sm:$0x7] }
 0x140   : > { %v854_v60 = vpop.permute.xlu1 %853  ;;  %v3695_v61 = vld [vmem:[#allocation2 + $0x8] sm:$0x7] }
 0x141   : > { %v856_v3 = vmul.f32 %v854_v60, %v3353_v43  ;;  %v857_v2 = vmul.f32 %v854_v60, %v3360_v59  ;;  %5395 = vst [vmem:[#allocation33_spill] sm:$0xff] %v3695_v61  ;;  %v5397_v60 = vmov 8  }
 0x142   : > { %991 = vrot.lane.b32.xlu1 %v3594_v7, %s2992_s8  ;;  %989 = vrot.lane.b32.xlu0 %v3596_v16, %s2992_s8 }
 0x143   : > { %v3604_v5 = vadd.f32 %v856_v3, %v850_v52  ;;  %v3606_v32 = vadd.f32 %v857_v2, %v851_v54  ;;  %v3699_v52 = vld [vmem:[#allocation2 + $0x18] sm:$0x7]  ;;  %v3712_v3 = vld [vmem:[#allocation2 + $0x10] sm:$0x7]  ;;  %v3718_v2 = vld [vmem:[#allocation2 + $0x20] sm:$0x7] }
 0x144   : > { %5396 = vst [vmem:[#allocation34_spill] sm:$0xff] %v3699_v52 }
 0x145   : > { %v3621_v55 = vpop.permute.xlu1 %897 }
 0x146   : > { %1175 = vperm.xlu1 %2863, %v5355_v62   ;;  %1206 = vrot.lane.b32.xlu0 %v3596_v16, %s2993_s9  ;;  %5378 = vst [vmem:[#allocation14_spill] sm:$0xff] %v3621_v55 }
 0x14a   : > { %2864 = vset.pattern.permute.xlu1 %v5375_v36  ;;  %1217 = vperm.xlu0 %2865, %v5355_v62   ;;  %v3625_v48 = vpop.permute.xlu1 %913  ;;  %v3723_v36 = vld [vmem:[#allocation2 + $0x38] sm:$0x7] }
 0x14b   : > { %1191 = vperm.xlu1 %2864, %v5355_v62   ;;  %5380 = vst [vmem:[#allocation13_spill] sm:$0xff] %v3625_v48  ;;  %5398 = vst [vmem:[#allocation35_spill] sm:$0xff] %v3723_v36 }
 0x14e   : > { %2866 = vset.pattern.permute.xlu0 %v5376_v6  ;;  %v3727_v6 = vld [vmem:[#allocation2 + $0x18] sm:$0x7] }
 0x14f   : > { %1208 = vrot.lane.b32.xlu1 %v3594_v7, %s2993_s9  ;;  %1061 = vperm.xlu0 %2866, %v5355_v62   ;;  %v3632_v0 = vpop.permute.xlu1 %958  ;;  %5399 = vst [vmem:[#allocation36_spill] sm:$0xff] %v3727_v6 }
 0x150   : > { %2867 = vset.pattern.permute.xlu1 %v5377_v11  ;;  %5384 = vst [vmem:[#allocation15_spill] sm:$0xff] %v3632_v0 }
 0x153   : > { %1233 = vperm.xlu1 %2867, %v5355_v62   ;;  %2221 = vperm.xlu0 %2866, %v5379_v56  }
 0x154   : > { %v3640_v58 = vpop.permute.xlu1 %974 }
 0x155   : > { %5387 = vst [vmem:[#allocation31_spill] sm:$0xff] %v3640_v58 }
 0x157   : > { %2868 = vset.pattern.permute.xlu1 %v5381_v33  ;;  %2871 = vset.pattern.permute.xlu0 %v5382_v15  ;;  %v3735_v33 = vld [vmem:[#allocation2] sm:$0x7]  ;;  %v3741_v15 = vld [vmem:[#allocation2 + $0x38] sm:$0x7] }
 0x158   : > { %1249 = vperm.xlu1 %2868, %v5355_v62   ;;  %1265 = vperm.xlu0 %2871, %v5355_v62  }
 0x159   : > { %v3646_v19 = vpop.permute.xlu1 %1014 }
 0x15c   : > { %2869 = vset.pattern.permute.xlu1 %v5383_v49  ;;  %2229 = vperm.xlu0 %2871, %v5379_v56   ;;  %v5401_v49 = vmov 26  }
 0x15d   : > { %1365 = vperm.xlu1 %2869, %v5379_v56  }
 0x15e   : > { %v3657_v42 = vpop.permute.xlu1 %1030 }
 0x160   : > { %2876 = vset.pattern.permute.xlu0 %v5385_v22  ;;  %v3748_v22 = vld [vmem:[#allocation2] sm:$0x7] }
 0x161   : > { %2870 = vset.pattern.permute.xlu1 %v5386_v18  ;;  %2237 = vperm.xlu0 %2876, %v5379_v56   ;;  %5402 = vst [vmem:[#allocation37_spill] sm:$0xff] %v3748_v22  ;;  %v3750_v18 = vld [vmem:[#allocation2 + $0x30] sm:$0x7] }
 0x162   : > { %1792 = vperm.xlu1 %2870, %v5379_v56   ;;  %5403 = vst [vmem:[#allocation38_spill] sm:$0xff] %v3750_v18 }
 0x165   : > { %2879 = vset.pattern.permute.xlu0 %v5377_v11 }
 0x166   : > { %2872 = vset.pattern.permute.xlu1 %v5388_v1  ;;  %2245 = vperm.xlu0 %2879, %v5379_v56   ;;  %v3752_v1 = vld [vmem:[#allocation2 + $0x30] sm:$0x7] }
 0x167   : > { %1373 = vperm.xlu1 %2872, %v5379_v56  }
 0x16a   : > { %1400 = vrot.lane.b32.xlu0 %v3648_v27, %s2992_s8 }
 0x16b   : > { %2873 = vset.pattern.permute.xlu1 %v5357_v46  ;;  %2880 = vset.pattern.permute.xlu0 %v5389_v35  ;;  %v3665_v46 = vpop.permute.xlu1 %1077  ;;  %v3754_v35 = vld [vmem:[#allocation2] sm:$0x7] }
 0x16c   : > { %1800 = vperm.xlu1 %2873, %v5379_v56  }
 0x16e   : > { %1448 = vrot.lane.b32.xlu0 %v3655_v45, %s2992_s8 }
 0x16f   : > { %v3676_v25 = vpop.permute.xlu1 %1093 }
 0x170   : > { %2874 = vset.pattern.permute.xlu1 %v5391_v28  ;;  %v1878_v28 = vrot.slane %v3750_v18, %v5363_v41 }
 0x171   : > { %1381 = vperm.xlu1 %2874, %v5379_v56  }
 0x172   : > { %1492 = vrot.lane.b32.xlu0 %v3648_v27, %s2995_s11 }
 0x175   : > { %2875 = vset.pattern.permute.xlu1 %v5392_v24  ;;  %v1117_v24 = vrot.slane %v3752_v1, %v5363_v41 }
 0x176   : > { %1808 = vperm.xlu1 %2875, %v5379_v56   ;;  %2330 = vrot.lane.b32.xlu0 %v3669_v8, %s2956_s12 }
 0x17a   : > { %2877 = vset.pattern.permute.xlu1 %v5393_v23  ;;  %1951 = vrot.lane.b32.xlu0 %v3674_v31, %s2993_s9  ;;  %v1121_v23 = vrot.slane %v3754_v35, %v5363_v41 }
 0x17b   : > { %1389 = vperm.xlu1 %2877, %v5379_v56  }
 0x17e   : > { %1617 = vrot.lane.b32.xlu0 %v3683_v17, %s2956_s12  ;;  %v5407_v17 = vld [vmem:[#allocation9_spill] sm:$0xff] }
 0x17f   : > { %v935_v40 = vpop.permute.xlu1 %934  ;;  %2878 = vset.pattern.permute.xlu1 %v5359_v13  ;;  %v3688_v47 = vpop.permute.xlu0 %932 }
 0x180   : > { %1816 = vperm.xlu1 %2878, %v5379_v56   ;;  %v3693_v44 = vsel %vm936_vm5, %v3688_v47, %v935_v40  ;;  %v5400_v56 = vmov 25   ;;  %v3797_v40 = vmul.f32 %v1878_v28, %v3574_v37  ;;  %v5408_v28 = vand.u32 15, %v5407_v17 }
 0x182   : > { %2454 = vrot.lane.b32.xlu0 %v3695_v61, %s2956_s12  ;;  %5406 = vst [vmem:[#allocation41_spill] sm:$0xff] %v3797_v40  ;;  %v3815_v40 = vmul.f32 %v1117_v24, %v3681_v30  ;;  %vm3844_vm7 = vcmp.eq.s32.totalorder %v5408_v28, 0  ;;  %v5412_v24 = vld [vmem:[#allocation10_spill] sm:$0xff]  ;;  %v2295_v28 = vrot.slane %v3727_v6, %v5363_v41  ;;  %v2261_v61 = vrot.slane %v3735_v33, %v5363_v41 }
 0x183   : > { %v1052_v10 = vpop.permute.xlu1 %1051  ;;  %v3701_v54 = vpop.permute.xlu0 %1049  ;;  %v5410_v14 = vsel %vm3844_vm7, 4294967295, %v5409_v14  ;;  %v5413_v63 = vand.u32 15, %v5412_v24 }
 0x184   : > { %1827 = vrot.lane.b32.xlu1 %v3699_v52, %s2993_s9  ;;  %v3707_v13 = vsel %vm1053_vm6, %v3701_v54, %v1052_v10  ;;  %5411 = vst [vmem:[#allocation9_spill] sm:$0xff] %v5410_v14  ;;  %v1914_v10 = vrot.slane %v3699_v52, %v5363_v41 }
 0x185   : > { %2882 = vset.pattern.permute.xlu1 %v5397_v60  ;;  %v3770_v60 = vld [vmem:[#allocation2 + $0x20] sm:$0x7]  ;;  %vm3850_vm8 = vcmp.eq.s32.totalorder %v5413_v63, 0  ;;  %v1918_v63 = vrot.slane %v3712_v3, %v5363_v41 }
 0x186   : > { %2071 = vrot.lane.b32.xlu0 %v3699_v52, %s2996_s13  ;;  %5404 = vst [vmem:[#allocation39_spill] sm:$0xff] %v3770_v60  ;;  %v5415_v50 = vsel %vm3850_vm8, 4294967295, %v5414_v50 }
 0x187   : > { %5416 = vst [vmem:[#allocation10_spill] sm:$0xff] %v5415_v50 }
 0x188   : > { %1829 = vrot.lane.b32.xlu1 %v3712_v3, %s2993_s9 }
 0x18a   : > { %2500 = vrot.lane.b32.xlu0 %v3669_v8, %s2955_s24 }
 0x18c   : > { %1402 = vrot.lane.b32.xlu1 %v3718_v2, %s2992_s8 }
 0x18e   : > { %1281 = vperm.xlu0 %2880, %v5355_v62  }
 0x190   : > { %1450 = vrot.lane.b32.xlu1 %v3723_v36, %s2992_s8  ;;  %v3794_v21 = vpop.permute.xlu1 %1127  ;;  %v3884_v24 = vpop.permute.xlu0 %1159 }
 0x191   : > { %5419 = vst [vmem:[#allocation44_spill] sm:$0xff] %v3884_v24 }
 0x192   : > { %2546 = vrot.lane.b32.xlu0 %v3727_v6, %s2955_s24 }
 0x193   : > { %2881 = vset.pattern.permute.xlu0 %v5400_v56  ;;  %v3772_v56 = vld [vmem:[#allocation2] sm:$0x7] }
 0x194   : > { %1494 = vrot.lane.b32.xlu1 %v3718_v2, %s2995_s11  ;;  %5405 = vst [vmem:[#allocation40_spill] sm:$0xff] %v3772_v56  ;;  %v1882_v43 = vrot.slane %v3772_v56, %v5363_v41 }
 0x196   : > { %1297 = vperm.xlu0 %2881, %v5355_v62  }
 0x198   : > { %2332 = vrot.lane.b32.xlu1 %v3735_v33, %s2956_s12 }
 0x19a   : > { %1737 = vrot.lane.b32.xlu0 %v3718_v2, %s2956_s12 }
 0x19b   : > { %2884 = vset.pattern.permute.xlu0 %v5401_v49  ;;  %v3774_v49 = vld [vmem:[#allocation2 + $0x8] sm:$0x7] }
 0x19c   : > { %1953 = vrot.lane.b32.xlu1 %v3741_v15, %s2993_s9  ;;  %v2002_v34 = vrot.slane %v3774_v49, %v5363_v41 }
 0x19e   : > { %2592 = vrot.lane.b32.xlu0 %v3735_v33, %s2957_s30  ;;  %v3857_v59 = vmul.f32 %v2002_v34, %v3681_v30 }
 0x1a0   : > { %1619 = vrot.lane.b32.xlu1 %v3748_v22, %s2956_s12  ;;  %v3854_v22 = vld [vmem:[#allocation2 + $0x10] sm:$0x7]  ;;  %5418 = vst [vmem:[#allocation43_spill] sm:$0xff] %v3857_v59 }
 0x1a1   : > { %5417 = vst [vmem:[#allocation42_spill] sm:$0xff] %v3854_v22  ;;  %v2299_v34 = vrot.slane %v3854_v22, %v5363_v41 }
 0x1a2   : > { %2164 = vrot.lane.b32.xlu0 %v3699_v52, %s2955_s24  ;;  %v3897_v52 = vmul.f32 %v2295_v28, %v3574_v37  ;;  %v3910_v28 = vmul.f32 %v1882_v43, %v3574_v37 }
 0x1a4   : > { %2456 = vrot.lane.b32.xlu1 %v3770_v60, %s2956_s12  ;;  %5420 = vst [vmem:[#allocation45_spill] sm:$0xff] %v3897_v52  ;;  %5421 = vst [vmem:[#allocation46_spill] sm:$0xff] %v3910_v28  ;;  %v3915_v52 = vmul.f32 %v2299_v34, %v3574_v37  ;;  %v3932_v28 = vmul.f32 %v2257_v29, %v3564_v39  ;;  %v3948_v29 = vmul.f32 %v1914_v10, %v3581_v20 }
 0x1a5   : > { %v3951_v60 = vmul.f32 %v1918_v63, %v3581_v20  ;;  %v968_v10 = vrot.slane %v3693_v44, %v5365_v53 }
 0x1a6   : > { %1345 = vperm.xlu0 %2884, %v5355_v62   ;;  %v3826_v62 = vmul.f32 %v1121_v23, %v3681_v30  ;;  %v3874_v23 = vpop.permute.xlu1 %1143  ;;  %5422 = vst [vmem:[#allocation47_spill] sm:$0xff] %v3915_v52  ;;  %5423 = vst [vmem:[#allocation48_spill] sm:$0xff] %v3932_v28 }
 0x1a7   : > { %5425 = vst [vmem:[#allocation50_spill] sm:$0xff] %v3948_v29  ;;  %5426 = vst [vmem:[#allocation51_spill] sm:$0xff] %v3951_v60 }
 0x1a8   : > { %2073 = vrot.lane.b32.xlu1 %v3712_v3, %s2996_s13 }
 0x1aa   : > { %2885 = vset.pattern.permute.xlu0 %v5377_v11 }
 0x1ac   : > { %2502 = vrot.lane.b32.xlu1 %v3735_v33, %s2955_s24 }
 0x1b0   : > { %2120 = vrot.lane.b32.xlu1 %v3750_v18, %s2955_s24  ;;  %v867_v17 = vpop.permute.xlu1 %866  ;;  %v865_v11 = vpop.permute.xlu0 %864 }
 0x1b1   : > { %v872_v4 = vsel %vm868_vm9, 0.0, %v865_v11  ;;  %v869_v12 = vsel %vm868_vm9, %v865_v11, %v867_v17  ;;  %v940_v17 = vsel %vm936_vm5, 0.0, %v3688_v47 }
 0x1b2   : > { %v877_v34 = vsel %vm3844_vm7, 0.0, %v872_v4  ;;  %v878_v59 = vsel %vm3850_vm8, 0.0, %v869_v12  ;;  %v3945_v4 = vmul.f32 %v2261_v61, %v3564_v39  ;;  %v948_v9 = vrot.slane %v940_v17, %v5363_v41 }
 0x1b3   : > { %v887_v11 = vrot.slane %v877_v34, %v5363_v41  ;;  %v903_v43 = vrot.slane %v877_v34, %v5365_v53  ;;  %v891_v51 = vrot.slane %v878_v59, %v5363_v41  ;;  %v907_v12 = vrot.slane %v878_v59, %v5365_v53 }
 0x1b4   : > { %2122 = vrot.lane.b32.xlu1 %v3772_v56, %s2955_s24  ;;  %5424 = vst [vmem:[#allocation49_spill] sm:$0xff] %v3945_v4  ;;  %v919_v52 = vrot.slane %v877_v34, %v5367_v38  ;;  %v923_v26 = vrot.slane %v878_v59, %v5367_v38  ;;  %v3957_v56 = vld [vmem:[#allocation2 + $0x20] sm:$0x7]  ;;  %v952_v61 = vrot.slane %v3693_v44, %v5363_v41  ;;  %v990_v60 = vpop.permute.xlu0 %989  ;;  %v992_v29 = vpop.permute.xlu1 %991 }
 0x1b5   : > { %v892_v47 = vmul.f32 %v887_v11, %v3564_v39  ;;  %v893_v28 = vmul.f32 %v891_v51, %v3564_v39  ;;  %v908_v34 = vmul.f32 %v903_v43, %v3621_v55  ;;  %v909_v59 = vmul.f32 %v907_v12, %v3621_v55 }
 0x1b6   : > { %v964_v39 = vrot.slane %v940_v17, %v5365_v53  ;;  %v2006_v63 = vrot.slane %v3957_v56, %v5363_v41  ;;  %v925_v12 = vmul.f32 %v923_v26, %v3625_v48  ;;  %v980_v4 = vrot.slane %v940_v17, %v5367_v38  ;;  %v2887_v26 = vld [vmem:[%s5161_s3] sm:$0x7]  ;;  %v3995_v17 = vld [vmem:[#allocation2 + $0x10] sm:$0x7] }
 0x1b7   : > { %v894_v11 = vadd.f32 %v892_v47, %v3604_v5  ;;  %v895_v51 = vadd.f32 %v893_v28, %v3606_v32  ;;  %v924_v32 = vmul.f32 %v919_v52, %v3625_v48  ;;  %v3981_v47 = vld [vmem:[#allocation2 + $0x18] sm:$0x7]  ;;  %v3987_v18 = vsel %vm936_vm5, 0.0, %v990_v60 }
 0x1b8   : > { %2548 = vrot.lane.b32.xlu1 %v3854_v22, %s2955_s24  ;;  %v984_v22 = vrot.slane %v3693_v44, %v5367_v38  ;;  %v993_v6 = vsel %vm936_vm5, %v990_v60, %v992_v29  ;;  %v953_v5 = vmul.f32 %v948_v9, %v3574_v37  ;;  %v969_v44 = vmul.f32 %v964_v39, %v3632_v0 }
 0x1b9   : > { %v910_v43 = vadd.f32 %v908_v34, %v894_v11  ;;  %v911_v28 = vadd.f32 %v909_v59, %v895_v51  ;;  %v954_v11 = vmul.f32 %v952_v61, %v3574_v37  ;;  %v970_v51 = vmul.f32 %v968_v10, %v3632_v0 }
 0x1ba   : > { %v1582_v9 = vrot.slane %v3981_v47, %v5363_v41  ;;  %v1004_v59 = vrot.slane %v3987_v18, %v5363_v41  ;;  %v1586_v39 = vrot.slane %v3995_v17, %v5363_v41  ;;  %v5429_v10 = vmov 17  }
 0x1bb   : > { %v926_v52 = vadd.f32 %v924_v32, %v910_v43  ;;  %v927_v34 = vadd.f32 %v925_v12, %v911_v28  ;;  %v1008_v43 = vrot.slane %v993_v6, %v5363_v41  ;;  %v985_v32 = vmul.f32 %v980_v4, %v3640_v58 }
 0x1bc   : > { %1313 = vperm.xlu1 %2882, %v2887_v26   ;;  %v4008_v28 = vmul.f32 %v2006_v63, %v3681_v30  ;;  %v986_v12 = vmul.f32 %v984_v22, %v3640_v58  ;;  %v1057_v4 = vsel %vm1053_vm6, 0.0, %v3701_v54  ;;  %v1020_v63 = vrot.slane %v3987_v18, %v5365_v53 }
 0x1bd   : > { %v955_v29 = vadd.f32 %v953_v5, %v926_v52  ;;  %v956_v61 = vadd.f32 %v954_v11, %v927_v34  ;;  %v1024_v52 = vrot.slane %v993_v6, %v5365_v53  ;;  %v1040_v34 = vrot.slane %v993_v6, %v5367_v38 }
 0x1be   : > { %5427 = vst [vmem:[#allocation52_spill] sm:$0xff] %v4008_v28  ;;  %v4027_v22 = vmul.f32 %v1582_v9, %v3681_v30  ;;  %v4031_v28 = vpop.permute.xlu0 %1206  ;;  %v4034_v54 = vmul.f32 %v1586_v39, %v3681_v30  ;;  %v1058_v39 = vsel %vm3844_vm7, 0.0, %v1057_v4 }
 0x1bf   : > { %v971_v5 = vadd.f32 %v969_v44, %v955_v29  ;;  %v972_v11 = vadd.f32 %v970_v51, %v956_v61  ;;  %v1009_v51 = vmul.f32 %v1004_v59, %v3581_v20  ;;  %v1010_v61 = vmul.f32 %v1008_v43, %v3581_v20 }
 0x1c0   : > { %1735 = vrot.lane.b32.xlu1 %v3648_v27, %s2956_s12  ;;  %5430 = vst [vmem:[#allocation54_spill] sm:$0xff] %v4027_v22  ;;  %5431 = vst [vmem:[#allocation55_spill] sm:$0xff] %v4034_v54  ;;  %v1026_v59 = vmul.f32 %v1024_v52, %v3646_v19  ;;  %v1025_v52 = vmul.f32 %v1020_v63, %v3646_v19  ;;  %v1059_v63 = vsel %vm3850_vm8, 0.0, %v3707_v13 }
 0x1c1   : > { %v4023_v60 = vpop.permute.xlu1 %1175  ;;  %2883 = vset.pattern.permute.xlu1 %v5429_v10  ;;  %v987_v44 = vadd.f32 %v985_v32, %v971_v5  ;;  %v988_v29 = vadd.f32 %v986_v12, %v972_v11  ;;  %v1083_v9 = vrot.slane %v1058_v39, %v5365_v53  ;;  %v1099_v13 = vrot.slane %v1058_v39, %v5367_v38 }
 0x1c2   : > { %5428 = vst [vmem:[#allocation53_spill] sm:$0xff] %v4023_v60  ;;  %v1103_v10 = vrot.slane %v1059_v63, %v5367_v38 }
 0x1c3   : > { %v1011_v32 = vadd.f32 %v1009_v51, %v987_v44  ;;  %v1012_v5 = vadd.f32 %v1010_v61, %v988_v29  ;;  %v1036_v51 = vrot.slane %v3987_v18, %v5367_v38  ;;  %v1042_v61 = vmul.f32 %v1040_v34, %v3657_v42 }
 0x1c4   : > { %2590 = vrot.lane.b32.xlu1 %v3669_v8, %s2957_s30  ;;  %v1067_v18 = vrot.slane %v1058_v39, %v5363_v41  ;;  %v1071_v34 = vrot.slane %v1059_v63, %v5363_v41 }
 0x1c5   : > { %v1028_v29 = vadd.f32 %v1026_v59, %v1012_v5  ;;  %v4059_v43 = vpop.permute.xlu0 %1217  ;;  %v1027_v59 = vadd.f32 %v1025_v52, %v1011_v32  ;;  %v1087_v5 = vrot.slane %v1059_v63, %v5365_v53  ;;  %v1041_v32 = vmul.f32 %v1036_v51, %v3657_v42  ;;  %v4087_v52 = vld [vmem:[#allocation2 + $0x28] sm:$0x7] }
 0x1c6   : > { %5432 = vst [vmem:[#allocation56_spill] sm:$0xff] %v4059_v43  ;;  %v4061_v4 = vpop.permute.xlu1 %1191  ;;  %v2419_v63 = vrot.slane %v4087_v52, %v5363_v41 }
 0x1c7   : > { %5433 = vst [vmem:[#allocation57_spill] sm:$0xff] %v4061_v4  ;;  %v1044_v44 = vadd.f32 %v1042_v61, %v1028_v29  ;;  %v1043_v6 = vadd.f32 %v1041_v32, %v1027_v59  ;;  %v4103_v29 = vld [vmem:[#allocation2 + $0x38] sm:$0x7] }
 0x1c8   : > { %1329 = vperm.xlu1 %2883, %v2887_v26   ;;  %v2423_v37 = vrot.slane %v4103_v29, %v5363_v41 }
 0x1ca   : > { %v1209_v26 = vpop.permute.xlu1 %1208  ;;  %v4094_v11 = vpop.permute.xlu0 %1061 }
 0x1cb   : > { %v1210_v12 = vsel %vm1053_vm6, %v4031_v28, %v1209_v26  ;;  %v1072_v51 = vmul.f32 %v1067_v18, %v4094_v11  ;;  %v1073_v22 = vmul.f32 %v1071_v34, %v4094_v11  ;;  %v1088_v18 = vmul.f32 %v1083_v9, %v3665_v46 }
 0x1cc   : > { %2166 = vrot.lane.b32.xlu1 %v3712_v3, %s2955_s24  ;;  %v1089_v34 = vmul.f32 %v1087_v5, %v3665_v46  ;;  %v1104_v9 = vmul.f32 %v1099_v13, %v3676_v25  ;;  %v4136_v13 = vmul.f32 %v2419_v63, %v3681_v30  ;;  %v5442_v63 = vrot.slane %v3735_v33, %v5365_v53  ;;  %s2726_s24 = sshll.u32 %s5689_s25, 5 }
 0x1cd   : > { %v1074_v59 = vadd.f32 %v1072_v51, %v1043_v6  ;;  %v1075_v32 = vadd.f32 %v1073_v22, %v1044_v44  ;;  %v1105_v6 = vmul.f32 %v1103_v10, %v3676_v25  ;;  %v5448_v26 = vrot.slane %v3754_v35, %v5367_v38  ;;  %s5103_s30 = scalar_lea.vmem %s5164_s6, %s2726_s24 }
 0x1ce   : > { %v4115_v54 = vpop.permute.xlu1 %1233  ;;  %v2222_v20 = vpop.permute.xlu0 %2221  ;;  %5435 = vst [vmem:[#allocation59_spill] sm:$0xff] %v4136_v13  ;;  %v4173_v10 = vmul.f32 %v5442_v63, %v3621_v55 }
 0x1cf   : > { %5434 = vst [vmem:[#allocation58_spill] sm:$0xff] %v4115_v54  ;;  %v1090_v22 = vadd.f32 %v1088_v18, %v1074_v59  ;;  %v1091_v44 = vadd.f32 %v1089_v34, %v1075_v32  ;;  %v5437_v34 = vrot.slane %v3669_v8, %v5365_v53  ;;  %v4149_v32 = vmul.f32 %v2423_v37, %v3681_v30 }
 0x1d1   : > { %v1106_v61 = vadd.f32 %v1104_v9, %v1090_v22  ;;  %v1107_v45 = vadd.f32 %v1105_v6, %v1091_v44  ;;  %v4146_v59 = vmul.f32 %v5437_v34, %v3621_v55  ;;  %5438 = vst [vmem:[#allocation61_spill] sm:$0xff] %v4149_v32  ;;  %v5439_v6 = vrot.slane %v3752_v1, %v5365_v53 }
 0x1d2   : > { %v5440_v44 = vrot.slane %v3754_v35, %v5365_v53  ;;  %v1213_v9 = vsel %vm1053_vm6, 0.0, %v4031_v28  ;;  %v1215_v35 = vsel %vm3850_vm8, 0.0, %v1210_v12  ;;  %v5460_v12 = vld [vmem:[#allocation40_spill] sm:$0xff] }
 0x1d3   : > { %v4140_v18 = vpop.permute.xlu1 %1249  ;;  %v1138_v22 = vmul.f32 %v5439_v6, %v3794_v21  ;;  %v1124_v5 = vadd.f32 %v3815_v40, %v1106_v61  ;;  %v1125_v37 = vadd.f32 %v3826_v62, %v1107_v45  ;;  %v4165_v30 = vpop.permute.xlu0 %1265  ;;  %v5443_v6 = vrot.slane %v3669_v8, %v5367_v38 }
 0x1d4   : > { %5436 = vst [vmem:[#allocation60_spill] sm:$0xff] %v4140_v18  ;;  %v1139_v34 = vmul.f32 %v5440_v44, %v3794_v21  ;;  %5441 = vst [vmem:[#allocation62_spill] sm:$0xff] %v4165_v30  ;;  %v5445_v45 = vrot.slane %v3735_v33, %v5367_v38  ;;  %v5447_v62 = vrot.slane %v3752_v1, %v5367_v38  ;;  %v5450_v33 = vld [vmem:[#allocation36_spill] sm:$0xff]  ;;  %v5453_v1 = vld [vmem:[#allocation38_spill] sm:$0xff] }
 0x1d5   : > { %v4179_v44 = vmul.f32 %v5443_v6, %v3625_v48  ;;  %v1140_v61 = vadd.f32 %v1138_v22, %v1124_v5  ;;  %v1155_v8 = vmul.f32 %v5448_v26, %v3874_v23  ;;  %v5449_v6 = vrot.slane %v3536_v57, %v5363_v41 }
 0x1d6   : > { %v4185_v40 = vmul.f32 %v5445_v45, %v3625_v48  ;;  %v1154_v28 = vmul.f32 %v5447_v62, %v3874_v23  ;;  %v1141_v63 = vadd.f32 %v1139_v34, %v1125_v37  ;;  %v5451_v45 = vrot.slane %v5450_v33, %v5365_v53  ;;  %v5456_v37 = vld [vmem:[#allocation30_spill] sm:$0xff] }
 0x1d7   : > { %5444 = vst [vmem:[#allocation63_spill] sm:$0xff] %v4179_v44  ;;  %v1170_v39 = vmul.f32 %v5449_v6, %v3884_v24  ;;  %v5454_v5 = vrot.slane %v5453_v1, %v5365_v53  ;;  %v1214_v26 = vsel %vm3844_vm7, 0.0, %v1213_v9  ;;  %v5457_v62 = vrot.slane %v5456_v37, %v5363_v41  ;;  %v2230_v7 = vpop.permute.xlu0 %2229 }
 0x1d8   : > { %5446 = vst [vmem:[#allocation64_spill] sm:$0xff] %v4185_v40  ;;  %v4203_v51 = vmul.f32 %v5451_v45, %v3632_v0  ;;  %v1157_v34 = vadd.f32 %v1155_v8, %v1141_v63  ;;  %v1156_v45 = vadd.f32 %v1154_v28, %v1140_v61  ;;  %v4219_v16 = vpop.permute.xlu1 %1365  ;;  %v5461_v9 = vrot.slane %v5460_v12, %v5365_v53  ;;  %v5463_v8 = vld [vmem:[#allocation42_spill] sm:$0xff]  ;;  %v5480_v40 = vld [vmem:[#allocation8_spill] sm:$0xff] }
 0x1d9   : > { %v4209_v22 = vmul.f32 %v5454_v5, %v3632_v0  ;;  %v1171_v6 = vmul.f32 %v5457_v62, %v3884_v24  ;;  %v5458_v5 = vrot.slane %v5450_v33, %v5367_v38  ;;  %v5464_v62 = vrot.slane %v5463_v8, %v5365_v53 }
 0x1da   : > { %5452 = vst [vmem:[#allocation36_spill] sm:$0xff] %v4203_v51  ;;  %v4231_v63 = vmul.f32 %v5461_v9, %v3632_v0  ;;  %v5466_v61 = vrot.slane %v3536_v57, %v5365_v53  ;;  %v1227_v9 = vrot.slane %v1215_v35, %v5363_v41  ;;  %v5468_v50 = vrot.slane %v5453_v1, %v5367_v38 }
 0x1db   : > { %5455 = vst [vmem:[#allocation38_spill] sm:$0xff] %v4209_v22  ;;  %v4225_v32 = vmul.f32 %v5458_v5, %v3640_v58  ;;  %v4237_v28 = vmul.f32 %v5464_v62, %v3632_v0  ;;  %v1173_v33 = vadd.f32 %v1171_v6, %v1157_v34  ;;  %v5467_v5 = vrot.slane %v5456_v37, %v5365_v53 }
 0x1dc   : > { %5462 = vst [vmem:[#allocation40_spill] sm:$0xff] %v4231_v63  ;;  %v1186_v13 = vmul.f32 %v5466_v61, %v4023_v60  ;;  %v1172_v63 = vadd.f32 %v1170_v39, %v1156_v45  ;;  %v4252_v62 = vmul.f32 %v5468_v50, %v3640_v58  ;;  %v5470_v14 = vrot.slane %v5460_v12, %v5367_v38 }
 0x1dd   : > { %5459 = vst [vmem:[#allocation30_spill] sm:$0xff] %v4225_v32  ;;  %5465 = vst [vmem:[#allocation42_spill] sm:$0xff] %v4237_v28  ;;  %v1187_v22 = vmul.f32 %v5467_v5, %v4023_v60  ;;  %v1223_v34 = vrot.slane %v1214_v26, %v5363_v41  ;;  %v5472_v6 = vrot.slane %v3536_v57, %v5367_v38  ;;  %v5476_v32 = vld [vmem:[#allocation19_spill] sm:$0xff]  ;;  %v4279_v0 = vpop.permute.xlu1 %1792 }
 0x1de   : > { %5469 = vst [vmem:[#allocation65_spill] sm:$0xff] %v4252_v62  ;;  %v4258_v61 = vmul.f32 %v5470_v14, %v3640_v58  ;;  %v5473_v1 = vrot.slane %v5456_v37, %v5367_v38  ;;  %v1243_v45 = vrot.slane %v1215_v35, %v5365_v53  ;;  %v1188_v62 = vadd.f32 %v1186_v13, %v1172_v63 }
 0x1df   : > { %v1202_v5 = vmul.f32 %v5472_v6, %v4061_v4  ;;  %v1189_v39 = vadd.f32 %v1187_v22, %v1173_v33  ;;  %v5474_v14 = vrot.slane %v5463_v8, %v5367_v38  ;;  %v2224_v57 = vmul.f32 %v2222_v20, %v5476_v32  ;;  %v5477_v6 = vld [vmem:[#allocation20_spill] sm:$0xff]  ;;  %v2238_v33 = vpop.permute.xlu0 %2237 }
 0x1e0   : > { %5471 = vst [vmem:[#allocation66_spill] sm:$0xff] %v4258_v61  ;;  %v1203_v50 = vmul.f32 %v5473_v1, %v4061_v4  ;;  %v1239_v61 = vrot.slane %v1214_v26, %v5365_v53  ;;  %v2225_v22 = vmul.f32 %v2222_v20, %v5477_v6  ;;  %v1228_v37 = vmul.f32 %v1223_v34, %v4059_v43 }
 0x1e1   : > { %v4274_v12 = vmul.f32 %v5474_v14, %v3640_v58  ;;  %v1229_v13 = vmul.f32 %v1227_v9, %v4059_v43  ;;  %v1204_v63 = vadd.f32 %v1202_v5, %v1188_v62  ;;  %v1255_v28 = vrot.slane %v1214_v26, %v5367_v38  ;;  %v5478_v14 = vld [vmem:[#allocation23_spill] sm:$0xff]  ;;  %v5479_v58 = vld [vmem:[#allocation24_spill] sm:$0xff]  ;;  %v5481_v9 = vld [vmem:[#allocation21_spill] sm:$0xff] }
 0x1e2   : > { %v1205_v1 = vadd.f32 %v1203_v50, %v1189_v39  ;;  %v1259_v8 = vrot.slane %v1215_v35, %v5367_v38  ;;  %v2233_v51 = vmul.f32 %v2230_v7, %v5479_v58  ;;  %v1244_v20 = vmul.f32 %v1239_v61, %v4115_v54  ;;  %v5482_v5 = vld [vmem:[#allocation22_spill] sm:$0xff] }
 0x1e3   : > { %5475 = vst [vmem:[#allocation67_spill] sm:$0xff] %v4274_v12  ;;  %v2232_v12 = vmul.f32 %v2230_v7, %v5478_v14  ;;  %v1230_v55 = vadd.f32 %v1228_v37, %v1204_v63  ;;  %v1245_v36 = vmul.f32 %v1243_v45, %v4115_v54  ;;  %v2226_v34 = vadd.f32 %v2224_v57, %v5480_v40  ;;  %v4295_v37 = vpop.permute.xlu1 %1373  ;;  %v5483_v45 = vld [vmem:[#allocation25_spill] sm:$0xff]  ;;  %v5484_v57 = vld [vmem:[#allocation26_spill] sm:$0xff] }
 0x1e4   : > { %v1231_v48 = vadd.f32 %v1229_v13, %v1205_v1  ;;  %v2227_v39 = vadd.f32 %v2225_v22, %v5480_v40  ;;  %v2240_v62 = vmul.f32 %v2238_v33, %v5481_v9  ;;  %v2241_v26 = vmul.f32 %v2238_v33, %v5482_v5  ;;  %v2246_v1 = vpop.permute.xlu0 %2245  ;;  %v5485_v22 = vld [vmem:[#allocation29_spill] sm:$0xff] }
 0x1e5   : > { %v1246_v50 = vadd.f32 %v1244_v20, %v1230_v55  ;;  %v1260_v44 = vmul.f32 %v1255_v28, %v4140_v18  ;;  %v1261_v7 = vmul.f32 %v1259_v8, %v4140_v18  ;;  %v2234_v61 = vadd.f32 %v2232_v12, %v2226_v34  ;;  %v5487_v55 = vld [vmem:[#allocation11_spill] sm:$0xff]  ;;  %v5489_v20 = vld [vmem:[#allocation34_spill] sm:$0xff] }
 0x1e6   : > { %v1247_v35 = vadd.f32 %v1245_v36, %v1231_v48  ;;  %v2235_v13 = vadd.f32 %v2233_v51, %v2227_v39  ;;  %v2248_v63 = vmul.f32 %v2246_v1, %v5483_v45  ;;  %v2249_v58 = vmul.f32 %v2246_v1, %v5484_v57 }
 0x1e7   : > { %v5486_v9 = vrot.slane %v5485_v22, %v5363_v41  ;;  %v5488_v48 = vrot.slane %v5487_v55, %v5363_v41  ;;  %v1262_v28 = vadd.f32 %v1260_v44, %v1246_v50  ;;  %v5490_v51 = vrot.slane %v5489_v20, %v5365_v53 }
 0x1e8   : > { %v1263_v8 = vadd.f32 %v1261_v7, %v1247_v35  ;;  %v2242_v34 = vadd.f32 %v2240_v62, %v2234_v61  ;;  %v2243_v39 = vadd.f32 %v2241_v26, %v2235_v13  ;;  %v5491_v1 = vrot.slane %v3712_v3, %v5365_v53  ;;  %v4325_v50 = vpop.permute.xlu0 %1400  ;;  %v5497_v61 = vld [vmem:[#allocation7_spill] sm:$0xff] }
 0x1e9   : > { %v1276_v33 = vmul.f32 %v5486_v9, %v4165_v30  ;;  %v1277_v36 = vmul.f32 %v5488_v48, %v4165_v30  ;;  %v4311_v12 = vmul.f32 %v5490_v51, %v3646_v19  ;;  %v5493_v48 = vrot.slane %v5489_v20, %v5367_v38  ;;  %v5500_v20 = vld [vmem:[#allocation33_spill] sm:$0xff] }
 0x1ea   : > { %v4317_v9 = vmul.f32 %v5491_v1, %v3646_v19  ;;  %v5495_v62 = vrot.slane %v3712_v3, %v5367_v38  ;;  %v5498_v13 = vrot.slane %v5497_v61, %v5365_v53  ;;  %v5501_v1 = vrot.slane %v5500_v20, %v5365_v53 }
 0x1eb   : > { %v4323_v44 = vmul.f32 %v5493_v48, %v3657_v42  ;;  %v4327_v35 = vadd.f32 %v1276_v33, %v1262_v28  ;;  %v4329_v7 = vadd.f32 %v1277_v36, %v1263_v8  ;;  %v2250_v36 = vadd.f32 %v2248_v63, %v2242_v34  ;;  %v4349_v8 = vpop.permute.xlu1 %1800 }
 0x1ec   : > { %5492 = vst [vmem:[#allocation19_spill] sm:$0xff] %v4317_v9  ;;  %v4335_v26 = vmul.f32 %v5495_v62, %v3657_v42  ;;  %v4341_v51 = vmul.f32 %v5498_v13, %v3665_v46  ;;  %v4347_v33 = vmul.f32 %v5501_v1, %v3665_v46  ;;  %v2251_v28 = vadd.f32 %v2249_v58, %v2243_v39  ;;  %v5510_v58 = vld [vmem:[#allocation39_spill] sm:$0xff] }
 0x1ed   : > { %5494 = vst [vmem:[#allocation20_spill] sm:$0xff] %v4323_v44  ;;  %v5503_v3 = vrot.slane %v5497_v61, %v5367_v38  ;;  %v5505_v62 = vrot.slane %v5500_v20, %v5367_v38  ;;  %v5511_v34 = vrot.slane %v5510_v58, %v5365_v53 }
 0x1ee   : > { %5496 = vst [vmem:[#allocation23_spill] sm:$0xff] %v4335_v26  ;;  %5499 = vst [vmem:[#allocation8_spill] sm:$0xff] %v4341_v51  ;;  %v5507_v51 = vld [vmem:[#allocation37_spill] sm:$0xff] }
 0x1ef   : > { %5502 = vst [vmem:[#allocation22_spill] sm:$0xff] %v4347_v33  ;;  %v4355_v48 = vmul.f32 %v5503_v3, %v3676_v25  ;;  %v4361_v13 = vmul.f32 %v5505_v62, %v3676_v25  ;;  %v5508_v1 = vrot.slane %v5507_v51, %v5365_v53  ;;  %v4373_v39 = vmul.f32 %v5511_v34, %v3665_v46  ;;  %v5530_v26 = vld [vmem:[#allocation49_spill] sm:$0xff]  ;;  %v4439_v44 = vpop.permute.xlu1 %1381 }
 0x1f0   : > { %v5513_v3 = vrot.slane %v3774_v49, %v5365_v53  ;;  %v5515_v62 = vrot.slane %v5507_v51, %v5367_v38  ;;  %v5519_v34 = vrot.slane %v3957_v56, %v5365_v53  ;;  %v2265_v9 = vadd.f32 %v5530_v26, %v2251_v28 }
 0x1f1   : > { %5504 = vst [vmem:[#allocation25_spill] sm:$0xff] %v4355_v48  ;;  %5506 = vst [vmem:[#allocation26_spill] sm:$0xff] %v4361_v13  ;;  %v4367_v63 = vmul.f32 %v5508_v1, %v3665_v46  ;;  %v5517_v1 = vrot.slane %v5510_v58, %v5367_v38  ;;  %v5537_v26 = vrot.slane %v3981_v47, %v5367_v38 }
 0x1f2   : > { %5512 = vst [vmem:[#allocation11_spill] sm:$0xff] %v4373_v39  ;;  %v4379_v48 = vmul.f32 %v5513_v3, %v3794_v21  ;;  %v4385_v13 = vmul.f32 %v5515_v62, %v3676_v25  ;;  %v4397_v39 = vmul.f32 %v5519_v34, %v3794_v21  ;;  %v5521_v3 = vrot.slane %v3741_v15, %v5363_v41  ;;  %v4405_v62 = vpop.permute.xlu0 %1448 }
 0x1f3   : > { %5509 = vst [vmem:[#allocation29_spill] sm:$0xff] %v4367_v63  ;;  %v4391_v33 = vmul.f32 %v5517_v1, %v3676_v25  ;;  %v5523_v1 = vrot.slane %v3981_v47, %v5365_v53  ;;  %v5525_v34 = vrot.slane %v3995_v17, %v5365_v53  ;;  %v5539_v28 = vrot.slane %v3995_v17, %v5367_v38 }
 0x1f4   : > { %5514 = vst [vmem:[#allocation34_spill] sm:$0xff] %v4379_v48  ;;  %5516 = vst [vmem:[#allocation7_spill] sm:$0xff] %v4385_v13  ;;  %v4403_v48 = vmul.f32 %v5521_v3, %v3884_v24  ;;  %v5527_v3 = vrot.slane %v4087_v52, %v5365_v53  ;;  %v5529_v13 = vld [vmem:[#allocation48_spill] sm:$0xff]  ;;  %v5545_v47 = vrot.slane %v3774_v49, %v5367_v38 }
 0x1f5   : > { %5518 = vst [vmem:[#allocation33_spill] sm:$0xff] %v4391_v33  ;;  %5520 = vst [vmem:[#allocation37_spill] sm:$0xff] %v4397_v39  ;;  %v4411_v33 = vmul.f32 %v5523_v1, %v3794_v21  ;;  %v4417_v39 = vmul.f32 %v5525_v34, %v3794_v21  ;;  %v2264_v63 = vadd.f32 %v5529_v13, %v2250_v36 }
 0x1f6   : > { %5522 = vst [vmem:[#allocation39_spill] sm:$0xff] %v4403_v48  ;;  %v4423_v48 = vmul.f32 %v5527_v3, %v3794_v21  ;;  %v5531_v1 = vrot.slane %v4103_v29, %v5365_v53  ;;  %v5533_v34 = vrot.slane %v3674_v31, %v5363_v41  ;;  %v5535_v36 = vrot.slane %v3957_v56, %v5367_v38 }
 0x1f7   : > { %5524 = vst [vmem:[#allocation68_spill] sm:$0xff] %v4411_v33  ;;  %5526 = vst [vmem:[#allocation69_spill] sm:$0xff] %v4417_v39  ;;  %v4457_v3 = vmul.f32 %v5539_v28, %v3874_v23  ;;  %v5543_v56 = vrot.slane %v4103_v29, %v5367_v38  ;;  %v5547_v17 = vrot.slane %v3674_v31, %v5365_v53  ;;  %v4489_v29 = vpop.permute.xlu0 %1492 }
 0x1f8   : > { %5528 = vst [vmem:[#allocation70_spill] sm:$0xff] %v4423_v48  ;;  %v4431_v33 = vmul.f32 %v5531_v1, %v3794_v21  ;;  %v4437_v39 = vmul.f32 %v5533_v34, %v3884_v24  ;;  %v4445_v13 = vmul.f32 %v5535_v36, %v3874_v23  ;;  %v4451_v21 = vmul.f32 %v5537_v26, %v3874_v23  ;;  %v5587_v48 = vld [vmem:[#allocation16_spill] sm:$0xff] }
 0x1f9   : > { %5540 = vst [vmem:[#allocation73_spill] sm:$0xff] %v4457_v3  ;;  %v5541_v1 = vrot.slane %v4087_v52, %v5367_v38  ;;  %v4469_v36 = vmul.f32 %v5543_v56, %v3874_v23  ;;  %v4475_v26 = vmul.f32 %v5545_v47, %v3874_v23  ;;  %v4481_v28 = vmul.f32 %v5547_v17, %v4023_v60 }
 0x1fa   : > { %5532 = vst [vmem:[#allocation48_spill] sm:$0xff] %v4431_v33  ;;  %5534 = vst [vmem:[#allocation49_spill] sm:$0xff] %v4437_v39  ;;  %v5549_v52 = vrot.slane %v3741_v15, %v5365_v53  ;;  %v5551_v49 = vrot.slane %v3648_v27, %v5363_v41  ;;  %v5553_v56 = vrot.slane %v3718_v2, %v5363_v41 }
 0x1fb   : > { %5536 = vst [vmem:[#allocation71_spill] sm:$0xff] %v4445_v13  ;;  %5538 = vst [vmem:[#allocation72_spill] sm:$0xff] %v4451_v21  ;;  %v4463_v34 = vmul.f32 %v5541_v1, %v3874_v23  ;;  %v5555_v17 = vrot.slane %v3674_v31, %v5367_v38  ;;  %v2277_v31 = vadd.f32 %v4173_v10, %v2265_v9  ;;  %v1809_v9 = vpop.permute.xlu1 %1808 }
 0x1fc   : > { %5544 = vst [vmem:[#allocation75_spill] sm:$0xff] %v4469_v36  ;;  %5546 = vst [vmem:[#allocation76_spill] sm:$0xff] %v4475_v26  ;;  %v4487_v1 = vmul.f32 %v5549_v52, %v4023_v60  ;;  %v4495_v23 = vmul.f32 %v5551_v49, %v4059_v43  ;;  %v4501_v47 = vmul.f32 %v5553_v56, %v4059_v43  ;;  %v5592_v60 = vld [vmem:[#allocation42_spill] sm:$0xff] }
 0x1fd   : > { %5542 = vst [vmem:[#allocation74_spill] sm:$0xff] %v4463_v34  ;;  %5548 = vst [vmem:[#allocation77_spill] sm:$0xff] %v4481_v28  ;;  %v4507_v52 = vmul.f32 %v5555_v17, %v4061_v4  ;;  %v5557_v28 = vrot.slane %v3741_v15, %v5367_v38  ;;  %v5559_v49 = vrot.slane %v5497_v61, %v5363_v41 }
 0x1fe   : > { %5550 = vst [vmem:[#allocation78_spill] sm:$0xff] %v4487_v1  ;;  %5552 = vst [vmem:[#allocation79_spill] sm:$0xff] %v4495_v23  ;;  %v1368_v56 = vmul.f32 %v4219_v16, %v5476_v32  ;;  %v2276_v43 = vadd.f32 %v4146_v59, %v2264_v63  ;;  %v1369_v17 = vmul.f32 %v4219_v16, %v5477_v6 }
 0x1ff   : > { %5554 = vst [vmem:[#allocation80_spill] sm:$0xff] %v4501_v47  ;;  %5556 = vst [vmem:[#allocation81_spill] sm:$0xff] %v4507_v52  ;;  %v4513_v39 = vmul.f32 %v5557_v28, %v4061_v4  ;;  %v4519_v26 = vmul.f32 %v5559_v49, %v4094_v11  ;;  %v5560_v15 = vrot.slane %v5507_v51, %v5363_v41  ;;  %v5578_v47 = vld [vmem:[#allocation35_spill] sm:$0xff] }
 0x200   : > { %v5562_v61 = vrot.slane %v5500_v20, %v5363_v41  ;;  %v5564_v59 = vrot.slane %v5510_v58, %v5363_v41  ;;  %v1376_v16 = vmul.f32 %v4295_v37, %v5478_v14  ;;  %v5566_v51 = vrot.slane %v3648_v27, %v5365_v53 }
 0x201   : > { %5558 = vst [vmem:[#allocation82_spill] sm:$0xff] %v4513_v39  ;;  %v4531_v28 = vmul.f32 %v5560_v15, %v4094_v11  ;;  %v5568_v20 = vrot.slane %v3718_v2, %v5365_v53  ;;  %v5570_v58 = vrot.slane %v3648_v27, %v5367_v38  ;;  %v1796_v52 = vmul.f32 %v4279_v0, %v5477_v6  ;;  %v4571_v39 = vpop.permute.xlu0 %2330 }
 0x202   : > { %v4537_v49 = vmul.f32 %v5562_v61, %v4094_v11  ;;  %v4543_v10 = vmul.f32 %v5564_v59, %v4094_v11  ;;  %v4551_v63 = vmul.f32 %v5566_v51, %v4115_v54  ;;  %v1795_v59 = vmul.f32 %v4279_v0, %v5476_v32 }
 0x203   : > { %5561 = vst [vmem:[#allocation83_spill] sm:$0xff] %v4531_v28  ;;  %v4557_v15 = vmul.f32 %v5568_v20, %v4115_v54  ;;  %v4563_v61 = vmul.f32 %v5570_v58, %v4140_v18  ;;  %v1407_v51 = vsel %vm936_vm5, 0.0, %v4325_v50  ;;  %v5572_v20 = vrot.slane %v3718_v2, %v5367_v38  ;;  %v5574_v58 = vld [vmem:[#allocation63_spill] sm:$0xff] }
 0x204   : > { %5563 = vst [vmem:[#allocation84_spill] sm:$0xff] %v4537_v49  ;;  %5565 = vst [vmem:[#allocation85_spill] sm:$0xff] %v4543_v10  ;;  %v1370_v27 = vadd.f32 %v1368_v56, %v5480_v40  ;;  %v2288_v1 = vadd.f32 %v5574_v58, %v2276_v43  ;;  %v1371_v6 = vadd.f32 %v1369_v17, %v5480_v40  ;;  %v5581_v56 = vld [vmem:[#allocation32_spill] sm:$0xff]  ;;  %v1455_v17 = vsel %vm936_vm5, 0.0, %v4405_v62 }
 0x205   : > { %5567 = vst [vmem:[#allocation86_spill] sm:$0xff] %v4551_v63  ;;  %5569 = vst [vmem:[#allocation87_spill] sm:$0xff] %v4557_v15  ;;  %v4577_v54 = vmul.f32 %v5572_v20, %v4140_v18  ;;  %v5576_v63 = vld [vmem:[#allocation21_spill] sm:$0xff]  ;;  %v5577_v15 = vld [vmem:[#allocation24_spill] sm:$0xff]  ;;  %v5579_v2 = vrot.slane %v5578_v47, %v5363_v41  ;;  %v5582_v43 = vrot.slane %v5581_v56, %v5363_v41  ;;  %v4608_v56 = vpop.permute.xlu0 %1951 }
 0x206   : > { %5571 = vst [vmem:[#allocation88_spill] sm:$0xff] %v4563_v61  ;;  %v5575_v61 = vld [vmem:[#allocation64_spill] sm:$0xff]  ;;  %v1384_v0 = vmul.f32 %v4439_v44, %v5576_v63  ;;  %v1377_v23 = vmul.f32 %v4295_v37, %v5577_v15  ;;  %v1500_v37 = vsel %vm1496_vm10, 0.0, %v4489_v29  ;;  %v1797_v18 = vadd.f32 %v1795_v59, %v5480_v40 }
 0x207   : > { %5573 = vst [vmem:[#allocation89_spill] sm:$0xff] %v4577_v54  ;;  %v2289_v32 = vadd.f32 %v5575_v61, %v2277_v31  ;;  %v4591_v20 = vmul.f32 %v5579_v2, %v4165_v30  ;;  %v4597_v58 = vmul.f32 %v5582_v43, %v4165_v30  ;;  %v1378_v31 = vadd.f32 %v1376_v16, %v1370_v27  ;;  %v1390_v43 = vpop.permute.xlu1 %1389  ;;  %v5584_v16 = vld [vmem:[#allocation45_spill] sm:$0xff] }
 0x208   : > { %v1411_v61 = vrot.slane %v1407_v51, %v5363_v41  ;;  %v1798_v2 = vadd.f32 %v1796_v52, %v5480_v40  ;;  %v1435_v54 = vrot.slane %v1407_v51, %v5367_v38  ;;  %v2302_v27 = vadd.f32 %v5584_v16, %v2288_v1 }
 0x209   : > { %5580 = vst [vmem:[#allocation63_spill] sm:$0xff] %v4591_v20  ;;  %5583 = vst [vmem:[#allocation64_spill] sm:$0xff] %v4597_v58  ;;  %v1423_v20 = vrot.slane %v1407_v51, %v5365_v53  ;;  %v5585_v58 = vld [vmem:[#allocation47_spill] sm:$0xff]  ;;  %v1386_v36 = vadd.f32 %v1384_v0, %v1378_v31  ;;  %v1392_v34 = vmul.f32 %v1390_v43, %v5483_v45  ;;  %v1501_v51 = vsel %vm3309_vm3, 0.0, %v1500_v37  ;;  %v5588_v0 = vld [vmem:[#allocation14_spill] sm:$0xff] }
 0x20a   : > { %v2303_v30 = vadd.f32 %v5585_v58, %v2289_v32  ;;  %v1803_v33 = vmul.f32 %v4349_v8, %v5478_v14  ;;  %v1804_v40 = vmul.f32 %v4349_v8, %v5577_v15  ;;  %v1459_v52 = vrot.slane %v1455_v17, %v5363_v41  ;;  %v5589_v31 = vld [vmem:[#allocation13_spill] sm:$0xff]  ;;  %v4627_v15 = vpop.permute.xlu0 %1617 }
 0x20b   : > { %v1379_v13 = vadd.f32 %v1377_v23, %v1371_v6  ;;  %v1416_v4 = vmul.f32 %v1411_v61, %v5587_v48  ;;  %v1471_v1 = vrot.slane %v1455_v17, %v5365_v53  ;;  %v1394_v32 = vadd.f32 %v1392_v34, %v1386_v36  ;;  %5590 = vst [vmem:[#allocation21_spill] sm:$0xff] %v4627_v15  ;;  %v1817_v23 = vpop.permute.xlu1 %1816  ;;  %v5591_v6 = vld [vmem:[#allocation36_spill] sm:$0xff] }
 0x20c   : > { %v1428_v58 = vmul.f32 %v1423_v20, %v5588_v0  ;;  %v1440_v16 = vmul.f32 %v1435_v54, %v5589_v31  ;;  %v1483_v14 = vrot.slane %v1455_v17, %v5367_v38  ;;  %v1385_v8 = vmul.f32 %v4439_v44, %v5482_v5  ;;  %v5593_v20 = vld [vmem:[#allocation6_spill] sm:$0xff]  ;;  %v5594_v17 = vld [vmem:[#allocation15_spill] sm:$0xff] }
 0x20d   : > { %v1506_v21 = vrot.slane %v1501_v51, %v5363_v41  ;;  %v1418_v37 = vadd.f32 %v1416_v4, %v1394_v32  ;;  %v2314_v61 = vadd.f32 %v5591_v6, %v2302_v27  ;;  %v2315_v3 = vadd.f32 %v5592_v60, %v2303_v30  ;;  %v5595_v4 = vld [vmem:[#allocation31_spill] sm:$0xff] }
 0x20e   : > { %v1805_v34 = vadd.f32 %v1803_v33, %v1797_v18  ;;  %v1806_v36 = vadd.f32 %v1804_v40, %v1798_v2  ;;  %v1464_v24 = vmul.f32 %v1459_v52, %v5593_v20  ;;  %v1518_v54 = vrot.slane %v1501_v51, %v5365_v53  ;;  %v4641_v18 = vpop.permute.xlu0 %2454  ;;  %v5596_v30 = vld [vmem:[#allocation27_spill] sm:$0xff]  ;;  %v5597_v52 = vld [vmem:[#allocation30_spill] sm:$0xff] }
 0x20f   : > { %v1476_v10 = vmul.f32 %v1471_v1, %v5594_v17  ;;  %v1530_v44 = vrot.slane %v1501_v51, %v5367_v38  ;;  %v1958_v15 = vsel %vm1053_vm6, 0.0, %v4608_v56  ;;  %v1430_v49 = vadd.f32 %v1428_v58, %v1418_v37  ;;  %v1828_v40 = vpop.permute.xlu1 %1827  ;;  %v5598_v51 = vld [vmem:[#allocation67_spill] sm:$0xff] }
 0x210   : > { %v1488_v32 = vmul.f32 %v1483_v14, %v5595_v4  ;;  %v1387_v28 = vadd.f32 %v1385_v8, %v1379_v13  ;;  %v1811_v27 = vmul.f32 %v1809_v9, %v5576_v63  ;;  %v1812_v60 = vmul.f32 %v1809_v9, %v5482_v5 }
 0x211   : > { %v1511_v33 = vmul.f32 %v1506_v21, %v5596_v30  ;;  %v1442_v2 = vadd.f32 %v1440_v16, %v1430_v49  ;;  %v4645_v1 = vadd.f32 %v5597_v52, %v2314_v61  ;;  %v4648_v6 = vadd.f32 %v5598_v51, %v2315_v3 }
 0x212   : > { %v1523_v58 = vmul.f32 %v1518_v54, %v3646_v19  ;;  %v1959_v13 = vsel %vm3844_vm7, 0.0, %v1958_v15  ;;  %v1819_v63 = vmul.f32 %v1817_v23, %v5483_v45  ;;  %v1834_v5 = vsel %vm1053_vm6, 0.0, %v1828_v40  ;;  %v4661_v54 = vpop.permute.xlu0 %2071 }
 0x213   : > { %v1535_v9 = vmul.f32 %v1530_v44, %v3657_v42  ;;  %v1393_v21 = vmul.f32 %v1390_v43, %v5484_v57  ;;  %v1466_v49 = vadd.f32 %v1464_v24, %v1442_v2  ;;  %v1835_v16 = vsel %vm3844_vm7, 0.0, %v1834_v5  ;;  %5600 = vst [vmem:[#allocation24_spill] sm:$0xff] %v4661_v54  ;;  %v1830_v43 = vpop.permute.xlu1 %1829 }
 0x214   : > { %v1813_v8 = vadd.f32 %v1811_v27, %v1805_v34  ;;  %v1814_v3 = vadd.f32 %v1812_v60, %v1806_v36  ;;  %v1840_v37 = vrot.slane %v1835_v16, %v5363_v41  ;;  %v1852_v61 = vrot.slane %v1835_v16, %v5365_v53 }
 0x215   : > { %v1964_v45 = vrot.slane %v1959_v13, %v5363_v41  ;;  %v1976_v15 = vrot.slane %v1959_v13, %v5365_v53  ;;  %v1478_v52 = vadd.f32 %v1476_v10, %v1466_v49  ;;  %v1820_v44 = vmul.f32 %v1817_v23, %v5484_v57 }
 0x216   : > { %v1821_v24 = vadd.f32 %v1819_v63, %v1813_v8  ;;  %v1845_v2 = vmul.f32 %v1840_v37, %v5587_v48  ;;  %v1864_v34 = vrot.slane %v1835_v16, %v5367_v38  ;;  %v1831_v36 = vsel %vm1053_vm6, %v1828_v40, %v1830_v43  ;;  %v4675_v63 = vpop.permute.xlu0 %2500 }
 0x217   : > { %v1988_v27 = vrot.slane %v1959_v13, %v5367_v38  ;;  %v1395_v60 = vadd.f32 %v1393_v21, %v1387_v28  ;;  %v1490_v51 = vadd.f32 %v1488_v32, %v1478_v52  ;;  %v1836_v14 = vsel %vm3850_vm8, 0.0, %v1831_v36  ;;  %v1403_v13 = vpop.permute.xlu1 %1402 }
 0x218   : > { %v1847_v54 = vadd.f32 %v1845_v2, %v1821_v24  ;;  %v1857_v10 = vmul.f32 %v1852_v61, %v5588_v0  ;;  %v1844_v57 = vrot.slane %v1836_v14, %v5363_v41  ;;  %v1856_v23 = vrot.slane %v1836_v14, %v5365_v53 }
 0x219   : > { %v4678_v49 = vmul.f32 %v1964_v45, %v4094_v11  ;;  %v4681_v40 = vmul.f32 %v1976_v15, %v3665_v46  ;;  %v1513_v28 = vadd.f32 %v1511_v33, %v1490_v51  ;;  %v1868_v32 = vrot.slane %v1836_v14, %v5367_v38  ;;  %v5604_v51 = vld [vmem:[#allocation41_spill] sm:$0xff] }
 0x21a   : > { %v1822_v21 = vadd.f32 %v1820_v44, %v1814_v3  ;;  %v1859_v16 = vadd.f32 %v1857_v10, %v1847_v54  ;;  %v1869_v8 = vmul.f32 %v1864_v34, %v5589_v31  ;;  %v1846_v37 = vmul.f32 %v1844_v57, %v5587_v48  ;;  %v4694_v54 = vpop.permute.xlu0 %1281 }
 0x21b   : > { %v4687_v61 = vmul.f32 %v1988_v27, %v3676_v25  ;;  %v1525_v52 = vadd.f32 %v1523_v58, %v1513_v28  ;;  %v1858_v45 = vmul.f32 %v1856_v23, %v5588_v0  ;;  %v1404_v15 = vsel %vm936_vm5, %v4325_v50, %v1403_v13  ;;  %v1451_v36 = vpop.permute.xlu1 %1450 }
 0x21c   : > { %v1871_v43 = vadd.f32 %v1869_v8, %v1859_v16  ;;  %v1848_v33 = vadd.f32 %v1846_v37, %v1822_v21  ;;  %v1415_v14 = vrot.slane %v1404_v15, %v5363_v41  ;;  %v1427_v3 = vrot.slane %v1404_v15, %v5365_v53  ;;  %v5605_v16 = vld [vmem:[#allocation38_spill] sm:$0xff] }
 0x21d   : > { %v1870_v44 = vmul.f32 %v1868_v32, %v5589_v31  ;;  %v1439_v24 = vrot.slane %v1404_v15, %v5367_v38  ;;  %v5602_v58 = vrot.slane %v5485_v22, %v5365_v53  ;;  %v5603_v50 = vrot.slane %v5487_v55, %v5365_v53 }
 0x21e   : > { %v1537_v27 = vadd.f32 %v1535_v9, %v1525_v52  ;;  %v1885_v10 = vadd.f32 %v5604_v51, %v1871_v43  ;;  %v1860_v57 = vadd.f32 %v1858_v45, %v1848_v33  ;;  %v1417_v23 = vmul.f32 %v1415_v14, %v5587_v48  ;;  %v4715_v52 = vpop.permute.xlu0 %2546  ;;  %v5607_v43 = vld [vmem:[#allocation65_spill] sm:$0xff]  ;;  %v5608_v33 = vld [vmem:[#allocation46_spill] sm:$0xff]  ;;  %v5611_v51 = vld [vmem:[#allocation40_spill] sm:$0xff] }
 0x21f   : > { %v1292_v2 = vmul.f32 %v5602_v58, %v4694_v54  ;;  %v1293_v34 = vmul.f32 %v5603_v50, %v4694_v54  ;;  %v1429_v28 = vmul.f32 %v1427_v3, %v5588_v0  ;;  %v1441_v32 = vmul.f32 %v1439_v24, %v5589_v31  ;;  %v1495_v45 = vpop.permute.xlu1 %1494 }
 0x220   : > { %v1897_v8 = vadd.f32 %v5605_v16, %v1885_v10  ;;  %v1872_v37 = vadd.f32 %v1870_v44, %v1860_v57  ;;  %v1419_v15 = vadd.f32 %v1417_v23, %v1395_v60  ;;  %v1452_v9 = vsel %vm936_vm5, %v4405_v62, %v1451_v36 }
 0x221   : > { %v1294_v13 = vadd.f32 %v1292_v2, %v4327_v35  ;;  %v1295_v21 = vadd.f32 %v1293_v34, %v4329_v7  ;;  %v5606_v48 = vrot.slane %v5578_v47, %v5365_v53  ;;  %v1463_v31 = vrot.slane %v1452_v9, %v5363_v41  ;;  %v5610_v34 = vld [vmem:[#allocation50_spill] sm:$0xff] }
 0x222   : > { %v1475_v35 = vrot.slane %v1452_v9, %v5365_v53  ;;  %v1487_v7 = vrot.slane %v1452_v9, %v5367_v38  ;;  %v1909_v60 = vadd.f32 %v5607_v43, %v1897_v8  ;;  %v1886_v14 = vadd.f32 %v5608_v33, %v1872_v37  ;;  %v5614_v37 = vld [vmem:[#allocation66_spill] sm:$0xff]  ;;  %v5615_v43 = vld [vmem:[#allocation20_spill] sm:$0xff] }
 0x223   : > { %v4721_v0 = vmul.f32 %v5606_v48, %v4694_v54  ;;  %v1431_v62 = vadd.f32 %v1429_v28, %v1419_v15  ;;  %v1497_v3 = vsel %vm1496_vm10, %v4489_v29, %v1495_v45  ;;  %v1465_v44 = vmul.f32 %v1463_v31, %v5593_v20  ;;  %v4740_v28 = vpop.permute.xlu0 %1297  ;;  %v2333_v8 = vpop.permute.xlu1 %2332 }
 0x224   : > { %v1477_v24 = vmul.f32 %v1475_v35, %v5594_v17  ;;  %v1502_v2 = vsel %vm3315_vm4, 0.0, %v1497_v3  ;;  %v4735_v50 = vadd.f32 %v4519_v26, %v1537_v27  ;;  %v1921_v36 = vadd.f32 %v5610_v34, %v1909_v60 }
 0x225   : > { %v1898_v10 = vadd.f32 %v5611_v51, %v1886_v14  ;;  %v1443_v57 = vadd.f32 %v1441_v32, %v1431_v62  ;;  %v1510_v23 = vrot.slane %v1502_v2, %v5363_v41  ;;  %v1522_v29 = vrot.slane %v1502_v2, %v5365_v53 }
 0x226   : > { %v1534_v20 = vrot.slane %v1502_v2, %v5367_v38  ;;  %v5612_v17 = vrot.slane %v5485_v22, %v5367_v38  ;;  %v5613_v26 = vrot.slane %v5487_v55, %v5367_v38  ;;  %v1933_v32 = vadd.f32 %v4311_v12, %v1921_v36  ;;  %v5617_v2 = vld [vmem:[#allocation51_spill] sm:$0xff] }
 0x227   : > { %v1910_v15 = vadd.f32 %v5614_v37, %v1898_v10  ;;  %v1467_v9 = vadd.f32 %v1465_v44, %v1443_v57  ;;  %v1489_v48 = vmul.f32 %v1487_v7, %v5595_v4  ;;  %v1512_v31 = vmul.f32 %v1510_v23, %v5596_v30  ;;  %v4765_v14 = vpop.permute.xlu0 %1737  ;;  %v1954_v3 = vpop.permute.xlu1 %1953 }
 0x228   : > { %v1308_v16 = vmul.f32 %v5612_v17, %v4740_v28  ;;  %v1309_v27 = vmul.f32 %v5613_v26, %v4740_v28  ;;  %v1524_v35 = vmul.f32 %v1522_v29, %v3646_v19  ;;  %v1945_v60 = vadd.f32 %v5615_v43, %v1933_v32  ;;  %v5618_v43 = vld [vmem:[#allocation19_spill] sm:$0xff] }
 0x229   : > { %v1479_v55 = vadd.f32 %v1477_v24, %v1467_v9  ;;  %v1536_v33 = vmul.f32 %v1534_v20, %v3657_v42  ;;  %v2334_v12 = vsel %vm313_vm2, %v4571_v39, %v2333_v8  ;;  %v5616_v4 = vrot.slane %v5578_v47, %v5367_v38 }
 0x22a   : > { %v4757_v45 = vadd.f32 %v1308_v16, %v1294_v13  ;;  %v4759_v22 = vadd.f32 %v1309_v27, %v1295_v21  ;;  %v2337_v13 = vsel %vm313_vm2, %v2333_v8, 0.0  ;;  %v2338_v21 = vsel %vm3309_vm3, 0.0, %v2334_v12 }
 0x22b   : > { %v4771_v7 = vmul.f32 %v5616_v4, %v4740_v28  ;;  %v1742_v62 = vsel %vm313_vm2, %v4765_v14, 0.0  ;;  %v1491_v44 = vadd.f32 %v1489_v48, %v1479_v55  ;;  %v2339_v39 = vsel %vm3315_vm4, 0.0, %v2337_v13  ;;  %v4798_v8 = vpop.permute.xlu0 %2592  ;;  %v1620_v32 = vpop.permute.xlu1 %1619 }
 0x22c   : > { %v2343_v24 = vrot.slane %v2338_v21, %v5363_v41  ;;  %v1922_v34 = vadd.f32 %v5617_v2, %v1910_v15  ;;  %v2347_v47 = vrot.slane %v2339_v39, %v5363_v41  ;;  %v2355_v36 = vrot.slane %v2338_v21, %v5365_v53 }
 0x22d   : > { %v2359_v51 = vrot.slane %v2339_v39, %v5365_v53  ;;  %v2367_v10 = vrot.slane %v2338_v21, %v5367_v38  ;;  %v1514_v57 = vadd.f32 %v1512_v31, %v1491_v44  ;;  %v2371_v29 = vrot.slane %v2339_v39, %v5367_v38  ;;  %v5620_v39 = vld [vmem:[#allocation23_spill] sm:$0xff] }
 0x22e   : > { %v2348_v23 = vmul.f32 %v2343_v24, %v5596_v30  ;;  %v4790_v20 = vsel %vm3315_vm4, 0.0, %v1742_v62  ;;  %v4793_v17 = vadd.f32 %v4678_v49, %v1945_v60  ;;  %v2349_v16 = vmul.f32 %v2347_v47, %v5596_v30  ;;  %v5621_v47 = vld [vmem:[#allocation29_spill] sm:$0xff] }
 0x22f   : > { %v2360_v26 = vmul.f32 %v2355_v36, %v3646_v19  ;;  %v2361_v27 = vmul.f32 %v2359_v51, %v3646_v19  ;;  %v1526_v37 = vadd.f32 %v1524_v35, %v1514_v57  ;;  %v2372_v9 = vmul.f32 %v2367_v10, %v3657_v42  ;;  %v2457_v13 = vpop.permute.xlu1 %2456  ;;  %v5622_v51 = vld [vmem:[#allocation84_spill] sm:$0xff] }
 0x230   : > { %v2350_v15 = vadd.f32 %v2348_v23, %v4645_v1  ;;  %v2373_v48 = vmul.f32 %v2371_v29, %v3657_v42  ;;  %v2351_v31 = vadd.f32 %v2349_v16, %v4648_v6  ;;  %v1752_v49 = vrot.slane %v4790_v20, %v5363_v41  ;;  %v5623_v29 = vld [vmem:[#allocation85_spill] sm:$0xff] }
 0x231   : > { %v1764_v30 = vrot.slane %v4790_v20, %v5365_v53  ;;  %v1934_v19 = vadd.f32 %v5618_v43, %v1922_v34  ;;  %v1538_v60 = vadd.f32 %v1536_v33, %v1526_v37  ;;  %v1955_v35 = vsel %vm1053_vm6, %v4608_v56, %v1954_v3  ;;  %v5619_v33 = vld [vmem:[#allocation83_spill] sm:$0xff]  ;;  %v5624_v37 = vld [vmem:[#allocation8_spill] sm:$0xff]  ;;  %v5626_v43 = vld [vmem:[#allocation22_spill] sm:$0xff] }
 0x232   : > { %v2362_v55 = vadd.f32 %v2360_v26, %v2350_v15  ;;  %v2597_v1 = vsel %vm337_vm1, %v4798_v8, 0.0  ;;  %v2363_v12 = vadd.f32 %v2361_v27, %v2351_v31  ;;  %v1776_v42 = vrot.slane %v4790_v20, %v5367_v38 }
 0x233   : > { %v1960_v6 = vsel %vm3850_vm8, 0.0, %v1955_v35  ;;  %v4819_v4 = vsel %vm3315_vm4, 0.0, %v2597_v1  ;;  %v1552_v21 = vadd.f32 %v5619_v33, %v1538_v60  ;;  %v1946_v24 = vadd.f32 %v5620_v39, %v1934_v19  ;;  %v5628_v35 = vld [vmem:[#allocation11_spill] sm:$0xff] }
 0x234   : > { %v2374_v62 = vadd.f32 %v2372_v9, %v2362_v55  ;;  %v1968_v56 = vrot.slane %v1960_v6, %v5363_v41  ;;  %v1980_v3 = vrot.slane %v1960_v6, %v5365_v53  ;;  %v2375_v44 = vadd.f32 %v2373_v48, %v2363_v12  ;;  %v4838_v9 = vpop.permute.xlu1 %2073  ;;  %v5625_v48 = vld [vmem:[#allocation7_spill] sm:$0xff]  ;;  %v5629_v12 = vld [vmem:[#allocation25_spill] sm:$0xff] }
 0x235   : > { %v1992_v2 = vrot.slane %v1960_v6, %v5367_v38  ;;  %v2607_v34 = vrot.slane %v4819_v4, %v5363_v41  ;;  %v1564_v36 = vadd.f32 %v5621_v47, %v1552_v21  ;;  %v2619_v23 = vrot.slane %v4819_v4, %v5365_v53 }
 0x236   : > { %v2388_v10 = vadd.f32 %v5622_v51, %v2374_v62  ;;  %v1970_v57 = vmul.f32 %v1968_v56, %v4094_v11  ;;  %v2389_v16 = vadd.f32 %v5623_v29, %v2375_v44  ;;  %v1982_v26 = vmul.f32 %v1980_v3, %v3665_v46  ;;  %v5627_v11 = vld [vmem:[#allocation21_spill] sm:$0xff]  ;;  %v5631_v62 = vld [vmem:[#allocation55_spill] sm:$0xff] }
 0x237   : > { %v1994_v27 = vmul.f32 %v1992_v2, %v3676_v25  ;;  %v1563_v15 = vadd.f32 %v5624_v37, %v4735_v50  ;;  %v1576_v31 = vadd.f32 %v5625_v48, %v1564_v36  ;;  %v1621_v55 = vsel %vm313_vm2, %v5627_v11, %v1620_v32  ;;  %v5630_v50 = vld [vmem:[#allocation26_spill] sm:$0xff]  ;;  %v5632_v44 = vld [vmem:[#allocation33_spill] sm:$0xff] }
 0x238   : > { %v2400_v19 = vadd.f32 %v5626_v43, %v2388_v10  ;;  %v1972_v60 = vadd.f32 %v1970_v57, %v1946_v24  ;;  %v2401_v1 = vadd.f32 %v5628_v35, %v2389_v16  ;;  %v1624_v46 = vsel %vm313_vm2, %v1620_v32, 0.0  ;;  %v5633_v24 = vld [vmem:[#allocation54_spill] sm:$0xff]  ;;  %v4857_v32 = vpop.permute.xlu1 %2502  ;;  %v5634_v10 = vld [vmem:[#allocation69_spill] sm:$0xff] }
 0x239   : > { %v1575_v6 = vadd.f32 %v5629_v12, %v1563_v15  ;;  %v1625_v25 = vsel %vm3309_vm3, 0.0, %v1621_v55  ;;  %v1590_v56 = vadd.f32 %v5631_v62, %v1576_v31  ;;  %v1626_v3 = vsel %vm3315_vm4, 0.0, %v1624_v46  ;;  %v5636_v15 = vld [vmem:[#allocation44_spill] sm:$0xff]  ;;  %v5638_v11 = vld [vmem:[#allocation73_spill] sm:$0xff]  ;;  %v5642_v62 = vld [vmem:[#allocation59_spill] sm:$0xff] }
 0x23a   : > { %v2412_v33 = vadd.f32 %v5630_v50, %v2400_v19  ;;  %v1984_v21 = vadd.f32 %v1982_v26, %v1972_v60  ;;  %v2413_v39 = vadd.f32 %v5632_v44, %v2401_v1  ;;  %v1630_v47 = vrot.slane %v1625_v25, %v5363_v41  ;;  %v5635_v26 = vld [vmem:[#allocation68_spill] sm:$0xff]  ;;  %v5639_v35 = vld [vmem:[#allocation53_spill] sm:$0xff] }
 0x23b   : > { %v1589_v2 = vadd.f32 %v5633_v24, %v1575_v6  ;;  %v1634_v36 = vrot.slane %v1626_v3, %v5363_v41  ;;  %v1602_v57 = vadd.f32 %v5634_v10, %v1590_v56  ;;  %v1642_v29 = vrot.slane %v1625_v25, %v5365_v53  ;;  %v5637_v19 = vld [vmem:[#allocation52_spill] sm:$0xff]  ;;  %v5641_v50 = vld [vmem:[#allocation57_spill] sm:$0xff] }
 0x23c   : > { %v1996_v51 = vadd.f32 %v1994_v27, %v1984_v21  ;;  %v1646_v16 = vrot.slane %v1626_v3, %v5365_v53  ;;  %v1635_v48 = vmul.f32 %v1630_v47, %v5636_v15  ;;  %v1654_v43 = vrot.slane %v1625_v25, %v5367_v38  ;;  %v5640_v12 = vld [vmem:[#allocation72_spill] sm:$0xff]  ;;  %v4874_v44 = vpop.permute.xlu1 %2120  ;;  %v5643_v24 = vld [vmem:[#allocation37_spill] sm:$0xff]  ;;  %v4877_v47 = vpop.permute.xlu0 %2164 }
 0x23d   : > { %v1601_v37 = vadd.f32 %v5635_v26, %v1589_v2  ;;  %v1636_v31 = vmul.f32 %v1634_v36, %v5636_v15  ;;  %v1614_v55 = vadd.f32 %v5638_v11, %v1602_v57  ;;  %v1647_v27 = vmul.f32 %v1642_v29, %v5639_v35  ;;  %v5644_v36 = vld [vmem:[#allocation61_spill] sm:$0xff]  ;;  %v5645_v29 = vld [vmem:[#allocation70_spill] sm:$0xff]  ;;  %v5646_v26 = vld [vmem:[#allocation71_spill] sm:$0xff] }
 0x23e   : > { %v2010_v60 = vadd.f32 %v5637_v19, %v1996_v51  ;;  %v1648_v1 = vmul.f32 %v1646_v16, %v5639_v35  ;;  %v1658_v46 = vrot.slane %v1626_v3, %v5367_v38  ;;  %v1659_v21 = vmul.f32 %v1654_v43, %v5641_v50  ;;  %v5647_v19 = vld [vmem:[#allocation48_spill] sm:$0xff]  ;;  %v5648_v11 = vld [vmem:[#allocation74_spill] sm:$0xff] }
 0x23f   : > { %v1613_v6 = vadd.f32 %v5640_v12, %v1601_v37  ;;  %v2426_v56 = vadd.f32 %v5642_v62, %v2412_v33  ;;  %v1638_v2 = vadd.f32 %v1636_v31, %v1614_v55  ;;  %v2427_v51 = vadd.f32 %v5644_v36, %v2413_v39 }
 0x240   : > { %v2022_v25 = vadd.f32 %v5643_v24, %v2010_v60  ;;  %v2458_v10 = vsel %vm313_vm2, %v4641_v18, %v2457_v13  ;;  %v1660_v3 = vmul.f32 %v1658_v46, %v5641_v50  ;;  %v2461_v33 = vsel %vm313_vm2, %v2457_v13, 0.0 }
 0x241   : > { %v1637_v57 = vadd.f32 %v1635_v48, %v1613_v6  ;;  %v2438_v16 = vadd.f32 %v5645_v29, %v2426_v56  ;;  %v1650_v43 = vadd.f32 %v1648_v1, %v1638_v2  ;;  %v2439_v31 = vadd.f32 %v5647_v19, %v2427_v51  ;;  %v5649_v6 = vld [vmem:[#allocation75_spill] sm:$0xff]  ;;  %v5650_v2 = vld [vmem:[#allocation80_spill] sm:$0xff] }
 0x242   : > { %v2034_v37 = vadd.f32 %v5646_v26, %v2022_v25  ;;  %v2462_v60 = vsel %vm3309_vm3, 0.0, %v2458_v10  ;;  %v2463_v18 = vsel %vm3315_vm4, 0.0, %v2461_v33  ;;  %v4899_v25 = vpop.permute.xlu1 %2122  ;;  %v2631_v58 = vrot.slane %v4819_v4, %v5367_v38  ;;  %v5652_v26 = vld [vmem:[#allocation87_spill] sm:$0xff] }
 0x243   : > { %v1649_v39 = vadd.f32 %v1647_v27, %v1637_v57  ;;  %v2450_v55 = vadd.f32 %v5648_v11, %v2438_v16  ;;  %v2467_v48 = vrot.slane %v2462_v60, %v5363_v41  ;;  %v1662_v12 = vadd.f32 %v1660_v3, %v1650_v43  ;;  %v4906_v57 = vpop.permute.xlu0 %1345 }
 0x244   : > { %v2451_v46 = vadd.f32 %v5649_v6, %v2439_v31  ;;  %v2471_v13 = vrot.slane %v2463_v18, %v5363_v41  ;;  %v2479_v1 = vrot.slane %v2462_v60, %v5365_v53  ;;  %v2483_v24 = vrot.slane %v2463_v18, %v5365_v53 }
 0x245   : > { %v1661_v62 = vadd.f32 %v1659_v21, %v1649_v39  ;;  %v2472_v56 = vmul.f32 %v2467_v48, %v5636_v15  ;;  %v2491_v27 = vrot.slane %v2462_v60, %v5367_v38  ;;  %v1674_v36 = vadd.f32 %v5650_v2, %v1662_v12  ;;  %v5651_v21 = vld [vmem:[#allocation79_spill] sm:$0xff]  ;;  %v5653_v39 = vld [vmem:[#allocation86_spill] sm:$0xff] }
 0x246   : > { %v2473_v51 = vmul.f32 %v2471_v13, %v5636_v15  ;;  %v2495_v10 = vrot.slane %v2463_v18, %v5367_v38  ;;  %v2484_v16 = vmul.f32 %v2479_v1, %v5639_v35  ;;  %v2485_v33 = vmul.f32 %v2483_v24, %v5639_v35  ;;  %v5654_v18 = vld [vmem:[#allocation28_spill] sm:$0xff]  ;;  %v5660_v2 = vld [vmem:[#allocation39_spill] sm:$0xff] }
 0x247   : > { %v1673_v3 = vadd.f32 %v5651_v21, %v1661_v62  ;;  %v2474_v29 = vadd.f32 %v2472_v56, %v2450_v55  ;;  %v1686_v43 = vadd.f32 %v5652_v26, %v1674_v36  ;;  %v2496_v31 = vmul.f32 %v2491_v27, %v5641_v50  ;;  %v5656_v55 = vld [vmem:[#allocation12_spill] sm:$0xff]  ;;  %v4946_v21 = vpop.permute.xlu1 %2548 }
 0x248   : > { %v2475_v19 = vadd.f32 %v2473_v51, %v2451_v46  ;;  %v2497_v60 = vmul.f32 %v2495_v10, %v5641_v50  ;;  %v5655_v48 = vrot.slane %v5654_v18, %v5367_v38  ;;  %v5657_v35 = vrot.slane %v5656_v55, %v5367_v38  ;;  %v5658_v46 = vld [vmem:[#allocation89_spill] sm:$0xff]  ;;  %v5659_v56 = vld [vmem:[#allocation88_spill] sm:$0xff] }
 0x249   : > { %v1685_v15 = vadd.f32 %v5653_v39, %v1673_v3  ;;  %v2486_v11 = vadd.f32 %v2484_v16, %v2474_v29  ;;  %v1698_v13 = vadd.f32 %v5658_v46, %v1686_v43  ;;  %v4932_v50 = vmul.f32 %v1776_v42, %v4906_v57  ;;  %v5661_v51 = vld [vmem:[#allocation24_spill] sm:$0xff]  ;;  %v5662_v3 = vld [vmem:[#allocation63_spill] sm:$0xff] }
 0x24a   : > { %v4919_v12 = vmul.f32 %v5655_v48, %v4906_v57  ;;  %v4925_v6 = vmul.f32 %v5657_v35, %v4906_v57  ;;  %v2487_v1 = vadd.f32 %v2485_v33, %v2475_v19  ;;  %v1983_v62 = vadd.f32 %v4681_v40, %v4793_v17  ;;  %v5663_v33 = vld [vmem:[#allocation78_spill] sm:$0xff]  ;;  %v5665_v39 = vld [vmem:[#allocation43_spill] sm:$0xff] }
 0x24b   : > { %v4937_v24 = vadd.f32 %v5659_v56, %v1685_v15  ;;  %v4940_v27 = vmul.f32 %v2631_v58, %v4906_v57  ;;  %v2046_v36 = vadd.f32 %v5660_v2, %v2034_v37  ;;  %v2076_v10 = vsel %vm2075_vm11, %v5661_v51, %v4838_v9  ;;  %v5669_v2 = vld [vmem:[#allocation58_spill] sm:$0xff] }
 0x24c   : > { %v1710_v42 = vadd.f32 %v5662_v3, %v1698_v13  ;;  %v2498_v29 = vadd.f32 %v2496_v31, %v2486_v11  ;;  %v1995_v16 = vadd.f32 %v4687_v61, %v1983_v62  ;;  %v2079_v40 = vsel %vm2075_vm11, %v4838_v9, 0.0  ;;  %v5666_v11 = vld [vmem:[#allocation82_spill] sm:$0xff]  ;;  %v5668_v13 = vld [vmem:[#allocation56_spill] sm:$0xff]  ;;  %v4977_v3 = vpop.permute.xlu1 %1313 }
 0x24d   : > { %v2499_v17 = vadd.f32 %v2497_v60, %v2487_v1  ;;  %v2058_v58 = vadd.f32 %v5663_v33, %v2046_v36  ;;  %v2080_v37 = vsel %vm3844_vm7, 0.0, %v2076_v10  ;;  %v2081_v43 = vsel %vm3850_vm8, 0.0, %v2079_v40  ;;  %v5671_v33 = vld [vmem:[#allocation60_spill] sm:$0xff] }
 0x24e   : > { %v1722_v19 = vadd.f32 %v4721_v0, %v1710_v42  ;;  %v2009_v15 = vadd.f32 %v5665_v39, %v1995_v16  ;;  %v2085_v31 = vrot.slane %v2080_v37, %v5363_v41  ;;  %v2089_v61 = vrot.slane %v2081_v43, %v5363_v41  ;;  %v5667_v0 = vld [vmem:[#allocation34_spill] sm:$0xff]  ;;  %v5672_v39 = vld [vmem:[#allocation49_spill] sm:$0xff] }
 0x24f   : > { %v2070_v48 = vadd.f32 %v5666_v11, %v2058_v58  ;;  %v2097_v9 = vrot.slane %v2080_v37, %v5365_v53  ;;  %v2101_v60 = vrot.slane %v2081_v43, %v5365_v53  ;;  %v2504_v35 = vsel %vm328_vm0, %v4675_v63, %v4857_v32  ;;  %v5670_v63 = vld [vmem:[#allocation76_spill] sm:$0xff] }
 0x250   : > { %v4968_v5 = vadd.f32 %v4771_v7, %v1722_v19  ;;  %v2021_v46 = vadd.f32 %v5667_v0, %v2009_v15  ;;  %v2091_v1 = vmul.f32 %v2089_v61, %v5668_v13  ;;  %v2109_v62 = vrot.slane %v2080_v37, %v5367_v38 }
 0x251   : > { %v2090_v56 = vmul.f32 %v2085_v31, %v5668_v13  ;;  %v2102_v36 = vmul.f32 %v2097_v9, %v5669_v2  ;;  %v2103_v51 = vmul.f32 %v2101_v60, %v5669_v2  ;;  %v2113_v10 = vrot.slane %v2081_v43, %v5367_v38  ;;  %v5673_v60 = vld [vmem:[#allocation77_spill] sm:$0xff] }
 0x252   : > { %v2033_v42 = vadd.f32 %v5670_v63, %v2021_v46  ;;  %v2093_v7 = vadd.f32 %v2091_v1, %v2070_v48  ;;  %v2507_v16 = vsel %vm328_vm0, %v4857_v32, 0.0  ;;  %v2511_v40 = vrot.slane %v2504_v35, %v5363_v41 }
 0x253   : > { %v2115_v58 = vmul.f32 %v2113_v10, %v5671_v33  ;;  %v2515_v26 = vrot.slane %v2507_v16, %v5363_v41  ;;  %v2523_v37 = vrot.slane %v2504_v35, %v5365_v53  ;;  %v2527_v19 = vrot.slane %v2507_v16, %v5365_v53 }
 0x254   : > { %v2045_v43 = vadd.f32 %v5672_v39, %v2033_v42  ;;  %v2105_v15 = vadd.f32 %v2103_v51, %v2093_v7  ;;  %v2516_v31 = vmul.f32 %v2511_v40, %v5668_v13  ;;  %v2535_v61 = vrot.slane %v2504_v35, %v5367_v38  ;;  %v5674_v42 = vld [vmem:[#allocation81_spill] sm:$0xff] }
 0x255   : > { %v2114_v11 = vmul.f32 %v2109_v62, %v5671_v33  ;;  %v2517_v32 = vmul.f32 %v2515_v26, %v5668_v13  ;;  %v2528_v48 = vmul.f32 %v2523_v37, %v5669_v2  ;;  %v2539_v9 = vrot.slane %v2507_v16, %v5367_v38  ;;  %v1736_v62 = vpop.permute.xlu1 %1735 }
 0x256   : > { %v2057_v0 = vadd.f32 %v5673_v60, %v2045_v43  ;;  %v2117_v46 = vadd.f32 %v2115_v58, %v2105_v15  ;;  %v2518_v1 = vadd.f32 %v2516_v31, %v2498_v29  ;;  %v2529_v10 = vmul.f32 %v2527_v19, %v5669_v2  ;;  %v5675_v19 = vld [vmem:[#allocation62_spill] sm:$0xff] }
 0x257   : > { %v2519_v63 = vadd.f32 %v2517_v32, %v2499_v17  ;;  %v2540_v51 = vmul.f32 %v2535_v61, %v5671_v33  ;;  %v2124_v35 = vsel %vm328_vm0, %v4874_v44, %v4899_v25  ;;  %v2127_v13 = vsel %vm328_vm0, %v4899_v25, 0.0 }
 0x258   : > { %v2069_v7 = vadd.f32 %v5674_v42, %v2057_v0  ;;  %v2530_v16 = vadd.f32 %v2528_v48, %v2518_v1  ;;  %v2131_v40 = vrot.slane %v2124_v35, %v5363_v41  ;;  %v2135_v29 = vrot.slane %v2127_v13, %v5363_v41 }
 0x259   : > { %v2531_v58 = vadd.f32 %v2529_v10, %v2519_v63  ;;  %v2541_v17 = vmul.f32 %v2539_v9, %v5671_v33  ;;  %v2143_v2 = vrot.slane %v2124_v35, %v5365_v53  ;;  %v2147_v26 = vrot.slane %v2127_v13, %v5365_v53  ;;  %v2591_v10 = vpop.permute.xlu1 %2590 }
 0x25a   : > { %v2092_v37 = vadd.f32 %v2090_v56, %v2069_v7  ;;  %v2542_v44 = vadd.f32 %v2540_v51, %v2530_v16  ;;  %v2137_v39 = vmul.f32 %v2135_v29, %v5675_v19  ;;  %v2155_v25 = vrot.slane %v2124_v35, %v5367_v38 }
 0x25b   : > { %v2543_v43 = vadd.f32 %v2541_v17, %v2531_v58  ;;  %v2136_v15 = vmul.f32 %v2131_v40, %v5675_v19  ;;  %v2148_v31 = vmul.f32 %v2143_v2, %v4694_v54  ;;  %v2159_v61 = vrot.slane %v2127_v13, %v5367_v38 }
 0x25c   : > { %v2104_v32 = vadd.f32 %v2102_v36, %v2092_v37  ;;  %v2139_v48 = vadd.f32 %v2137_v39, %v2117_v46  ;;  %v2149_v33 = vmul.f32 %v2147_v26, %v4694_v54  ;;  %v2550_v56 = vsel %vm328_vm0, %v4715_v52, %v4946_v21 }
 0x25d   : > { %v2161_v9 = vmul.f32 %v2159_v61, %v4740_v28  ;;  %v2553_v60 = vsel %vm328_vm0, %v4946_v21, 0.0  ;;  %v2557_v0 = vrot.slane %v2550_v56, %v5363_v41  ;;  %v2569_v1 = vrot.slane %v2550_v56, %v5365_v53 }
 0x25e   : > { %v2116_v63 = vadd.f32 %v2114_v11, %v2104_v32  ;;  %v2151_v36 = vadd.f32 %v2149_v33, %v2139_v48  ;;  %v2561_v46 = vrot.slane %v2553_v60, %v5363_v41  ;;  %v2573_v51 = vrot.slane %v2553_v60, %v5365_v53  ;;  %v5678_v32 = vld [vmem:[#allocation64_spill] sm:$0xff] }
 0x25f   : > { %v2160_v35 = vmul.f32 %v2155_v25, %v4740_v28  ;;  %v2562_v52 = vmul.f32 %v2557_v0, %v5675_v19  ;;  %v2581_v13 = vrot.slane %v2550_v56, %v5367_v38  ;;  %v2585_v21 = vrot.slane %v2553_v60, %v5367_v38 }
 0x260   : > { %v2138_v42 = vadd.f32 %v2136_v15, %v2116_v63  ;;  %v5028_v7 = vadd.f32 %v2161_v9, %v2151_v36  ;;  %v2563_v16 = vmul.f32 %v2561_v46, %v5675_v19  ;;  %v2574_v11 = vmul.f32 %v2569_v1, %v4694_v54 }
 0x261   : > { %v2564_v40 = vadd.f32 %v2562_v52, %v2542_v44  ;;  %v2575_v29 = vmul.f32 %v2573_v51, %v4694_v54  ;;  %v2586_v58 = vmul.f32 %v2581_v13, %v4740_v28  ;;  %v5676_v17 = vrot.slane %v5654_v18, %v5363_v41 }
 0x262   : > { %v2150_v26 = vadd.f32 %v2148_v31, %v2138_v42  ;;  %v2565_v37 = vadd.f32 %v2563_v16, %v2543_v43  ;;  %v2587_v39 = vmul.f32 %v2585_v21, %v4740_v28  ;;  %v5677_v19 = vrot.slane %v5656_v55, %v5363_v41  ;;  %v5051_v31 = vpop.permute.xlu1 %1329 }
 0x263   : > { %v1324_v2 = vmul.f32 %v5676_v17, %v4977_v3  ;;  %v2576_v25 = vadd.f32 %v2574_v11, %v2564_v40  ;;  %v1754_v61 = vmul.f32 %v1752_v49, %v4977_v3  ;;  %v1709_v48 = vadd.f32 %v5678_v32, %v4937_v24  ;;  %v5679_v24 = vld [vmem:[#allocation32_spill] sm:$0xff] }
 0x264   : > { %v1325_v44 = vmul.f32 %v5677_v19, %v4977_v3  ;;  %v5053_v43 = vadd.f32 %v2160_v35, %v2150_v26  ;;  %v2577_v33 = vadd.f32 %v2575_v29, %v2565_v37  ;;  %v5680_v60 = vrot.slane %v5679_v24, %v5365_v53 }
 0x265   : > { %v1326_v15 = vadd.f32 %v1324_v2, %v4757_v45  ;;  %v2609_v45 = vmul.f32 %v2607_v34, %v4977_v3  ;;  %v2588_v49 = vadd.f32 %v2586_v58, %v2576_v25  ;;  %v1756_v9 = vadd.f32 %v1754_v61, %v4968_v5 }
 0x266   : > { %v1327_v56 = vadd.f32 %v1325_v44, %v4759_v22  ;;  %v1719_v0 = vmul.f32 %v5680_v60, %v4694_v54  ;;  %v1739_v22 = vsel %vm313_vm2, %v1736_v62, %v4765_v14  ;;  %v2589_v1 = vadd.f32 %v2587_v39, %v2577_v33  ;;  %v2167_v2 = vpop.permute.xlu1 %2166 }
 0x267   : > { %v1743_v63 = vsel %vm3309_vm3, 0.0, %v1739_v22  ;;  %v2594_v34 = vsel %vm337_vm1, %v2591_v10, %v4798_v8  ;;  %v5681_v36 = vrot.slane %v5654_v18, %v5365_v53  ;;  %v5682_v54 = vrot.slane %v5679_v24, %v5367_v38 }
 0x268   : > { %v1721_v46 = vadd.f32 %v1719_v0, %v1709_v48  ;;  %v1748_v14 = vrot.slane %v1743_v63, %v5363_v41  ;;  %v1760_v62 = vrot.slane %v1743_v63, %v5365_v53  ;;  %v1772_v35 = vrot.slane %v1743_v63, %v5367_v38 }
 0x269   : > { %v1340_v5 = vmul.f32 %v5681_v36, %v5051_v31  ;;  %v1731_v51 = vmul.f32 %v5682_v54, %v4740_v28  ;;  %v2598_v8 = vsel %vm3309_vm3, 0.0, %v2594_v34  ;;  %v5683_v18 = vrot.slane %v5656_v55, %v5365_v53 }
 0x26a   : > { %v2611_v13 = vadd.f32 %v2609_v45, %v2589_v1  ;;  %v1753_v28 = vmul.f32 %v1748_v14, %v4977_v3  ;;  %v2603_v42 = vrot.slane %v2598_v8, %v5363_v41  ;;  %v2615_v16 = vrot.slane %v2598_v8, %v5365_v53 }
 0x26b   : > { %v1341_v10 = vmul.f32 %v5683_v18, %v5051_v31  ;;  %v1342_v52 = vadd.f32 %v1340_v5, %v1326_v15  ;;  %v1733_v21 = vadd.f32 %v1731_v51, %v1721_v46  ;;  %v2627_v11 = vrot.slane %v2598_v8, %v5367_v38 }
 0x26c   : > { %v2608_v58 = vmul.f32 %v2603_v42, %v4977_v3  ;;  %v1765_v55 = vmul.f32 %v1760_v62, %v5051_v31  ;;  %v1766_v17 = vmul.f32 %v1764_v30, %v5051_v31  ;;  %v1777_v26 = vmul.f32 %v1772_v35, %v4906_v57 }
 0x26d   : > { %v1343_v40 = vadd.f32 %v1341_v10, %v1327_v56  ;;  %v1358_v59 = vadd.f32 %v4919_v12, %v1342_v52  ;;  %v1755_v29 = vadd.f32 %v1753_v28, %v1733_v21  ;;  %v2620_v39 = vmul.f32 %v2615_v16, %v5051_v31 }
 0x26e   : > { %v2610_v19 = vadd.f32 %v2608_v58, %v2588_v49  ;;  %v1768_v25 = vadd.f32 %v1766_v17, %v1756_v9  ;;  %v2621_v15 = vmul.f32 %v2619_v23, %v5051_v31  ;;  %v2632_v20 = vmul.f32 %v2627_v11, %v4906_v57 }
 0x26f   : > { %v1359_v12 = vadd.f32 %v4925_v6, %v1343_v40  ;;  %v1360_v37 = vmax.f32 %v1358_v59, 0.0  ;;  %v1767_v44 = vadd.f32 %v1765_v55, %v1755_v29  ;;  %v2168_v61 = vsel %vm328_vm0, %v4877_v47, %v2167_v2 }
 0x270   : > { %v2171_v6 = vsel %vm328_vm0, %v2167_v2, 0.0  ;;  %v1780_v48 = vadd.f32 %v4932_v50, %v1768_v25  ;;  %v2622_v33 = vadd.f32 %v2620_v39, %v2610_v19  ;;  %v2623_v56 = vadd.f32 %v2621_v15, %v2611_v13 }
 0x271   : > { %v1361_v30 = vmax.f32 %v1359_v12, 0.0  ;;  %1362 = vst [vmem:[%s5103_s30] sm:$0x7] %v1360_v37  ;;  %v1779_v32 = vadd.f32 %v1777_v26, %v1767_v44  ;;  %v2175_v45 = vrot.slane %v2168_v61, %v5363_v41  ;;  %v2179_v4 = vrot.slane %v2171_v6, %v5363_v41 }
 0x272   : > { %v2187_v23 = vrot.slane %v2168_v61, %v5365_v53  ;;  %v2191_v49 = vrot.slane %v2171_v6, %v5365_v53  ;;  %v1782_v24 = vmax.f32 %v1780_v48, 0.0  ;;  %v2634_v47 = vadd.f32 %v2632_v20, %v2622_v33 }
 0x273   : > { %1363 = vst [vmem:[%s5103_s30 + $0x8] sm:$0x7] %v1361_v30  ;;  %v1781_v9 = vmax.f32 %v1779_v32, 0.0  ;;  %v2635_v60 = vadd.f32 %v4940_v27, %v2623_v56  ;;  %v2180_v50 = vmul.f32 %v2175_v45, %v4977_v3  ;;  %v2181_v0 = vmul.f32 %v2179_v4, %v4977_v3 }
 0x274   : > { %v2192_v22 = vmul.f32 %v2187_v23, %v5051_v31  ;;  %v2193_v1 = vmul.f32 %v2191_v49, %v5051_v31  ;;  %v1786_v63 = vrot.slane %v1782_v24, 5  ;;  %v2636_v53 = vmax.f32 %v2634_v47, 0.0 }
 0x275   : > { %v1785_v41 = vrot.slane %v1781_v9, 5  ;;  %v2637_v34 = vmax.f32 %v2635_v60, 0.0  ;;  %v2182_v36 = vadd.f32 %v2180_v50, %v5053_v43  ;;  %v2183_v5 = vadd.f32 %v2181_v0, %v5028_v7 }
 0x276   : > { %v2199_v27 = vrot.slane %v2168_v61, %v5367_v38  ;;  %v2203_v46 = vrot.slane %v2171_v6, %v5367_v38  ;;  %1790 = vst [vmem:[%s5103_s30 + $0x8] sm:$0x38] %v1786_v63  ;;  %v2640_v3 = vrot.slane %v2636_v53, 7 }
 0x277   : > { %1789 = vst [vmem:[%s5103_s30] sm:$0x38] %v1785_v41  ;;  %v2641_v31 = vrot.slane %v2637_v34, 7  ;;  %v2194_v54 = vadd.f32 %v2192_v22, %v2182_v36  ;;  %v2195_v51 = vadd.f32 %v2193_v1, %v2183_v5 }
 0x278   : > { %v2204_v14 = vmul.f32 %v2199_v27, %v4906_v57  ;;  %v2205_v62 = vmul.f32 %v2203_v46, %v4906_v57  ;;  %2644 = vst [vmem:[%s5103_s30 + $0x10] sm:$0xe] %v2640_v3 }
 0x279   : > { %2645 = vst [vmem:[%s5103_s30 + $0x18] sm:$0xe] %v2641_v31 }
 0x27a   : > { %v2206_v43 = vadd.f32 %v2204_v14, %v2194_v54  ;;  %v2207_v7 = vadd.f32 %v2205_v62, %v2195_v51 }
 0x27c   : > { %v2208_v35 = vmax.f32 %v2206_v43, 0.0  ;;  %v2209_v8 = vmax.f32 %v2207_v7, 0.0 }
 0x27e   : > { %v2212_v18 = vrot.slane %v2208_v35, 2  ;;  %v2213_v38 = vrot.slane %v2209_v8, 2 }
 0x280   : > { %2216 = vst [vmem:[%s5103_s30 + $0x10] ss:$-12 sps:$4 sm:$0xc1] %v2212_v18   ;;  %2217 = vst [vmem:[%s5103_s30 + $0x18] ss:$-12 sps:$4 sm:$0xc1] %v2213_v38  }
 0x281 PF: > { %p16_p8 = scmp.ge.s32.totalorder %s3054_s26, 4   ;;  %s5684_s21 = smov %s2942_s22 }
 0x282   : > { %s5685_s22 = smov %s2946_s23  ;;  %s5686_s23 = smov %s3064_s29 }
 0x283   : > { %s5687_s24 = smov %s3054_s26  ;;  %18 = sbr.rel (!%p16_p8) target bundleno = 3 (0x3), region = 84 }
 0x288   :  { %2667 = vsyncpa [#allocation4], 1 }
 0x289   :  { %2669 = vsyncpa [#allocation4 + $0x1], 1 }

</bundles_post_ra>
